<compile_context>
chip_gen: v6e
topology: v6e:2x2x1
jax: 0.10.0
libtpu: 0.0.40
codegen_flags: <defaults>
</compile_context>

<pallas_src>
import functools

import jax
import jax.numpy as jnp
from jax import lax
from jax.experimental import pallas as pl
from jax.experimental.pallas import tpu as pltpu

KSIZE = 7
PAD = KSIZE // 2
NUM_ACC = 4  # independent partial accumulators for the 49-tap conv


def _spatial_attention_kernel(w_ref, x_ref, o_ref, *, H, W):
    """One grid step: a (B, C, H*W) slab of x.

    w_ref : SMEM (2*7*7,) f32 conv weights, index = c*49 + kh*7 + kw
    x_ref : VMEM (B, C, H*W) input block (lane-dense layout)
    o_ref : VMEM (B, C, H*W) output block
    """
    HW = H * W
    x = x_ref[...]                                   # (B, C, HW), input dtype
    B = x.shape[0]

    # Channel statistics (f32 accumulation, max stays in input dtype).
    avg = jnp.mean(x, axis=1, dtype=jnp.float32)     # (B, HW)  == mean over C
    mx = jnp.max(x, axis=1).astype(jnp.float32)      # (B, HW)  == max over C

    # Flat-index / column-index iotas for the zero-padding masks.
    lane = lax.broadcasted_iota(jnp.int32, (1, HW), 1)
    if W & (W - 1) == 0:
        col = lane & (W - 1)
    else:
        col = lane % W

    # 7x7 "same" conv (2 in-channels -> 1 out-channel, no bias) in the flattened
    # layout.  For tap (kh, kw): out[i] += w * in[i + d] where d = dh*W + dw,
    # valid iff the column stays in [0, W) and the flat index stays in [0, HW)
    # (the latter is exactly the row-validity condition given a valid column).
    parts = [jnp.zeros((B, HW), jnp.float32) for _ in range(NUM_ACC)]
    tap = 0
    for kh in range(KSIZE):
        dh = kh - PAD
        for kw in range(KSIZE):
            dw = kw - PAD
            d = dh * W + dw
            if d == 0:
                sh_avg, sh_max = avg, mx
            else:
                s = (-d) % HW                        # roll so out[i] = in[i + d]
                sh_avg = pltpu.roll(avg, s, 1)
                sh_max = pltpu.roll(mx, s, 1)

            w_avg = w_ref[kh * KSIZE + kw]
            w_max = w_ref[KSIZE * KSIZE + kh * KSIZE + kw]
            contrib = w_avg * sh_avg + w_max * sh_max     # (B, HW) f32

            # Zero-padding mask; trivially-true comparisons pruned at trace time.
            conds = []
            if dw < 0:
                conds.append(col >= -dw)
            elif dw > 0:
                conds.append(col < W - dw)
            if d < 0:
                conds.append(lane >= -d)
            elif d > 0:
                conds.append(lane < HW - d)
            if conds:
                mask = functools.reduce(jnp.logical_and, conds)
                contrib = jnp.where(mask, contrib, 0.0)

            parts[tap % NUM_ACC] = parts[tap % NUM_ACC] + contrib
            tap += 1

    conv = (parts[0] + parts[1]) + (parts[2] + parts[3])  # (B, HW) f32
    attn = jax.nn.sigmoid(conv)                           # (B, HW) f32

    # Gate in the input dtype (native bf16 path on v6e/v7x), broadcast over C.
    o_ref[...] = x * attn.astype(x.dtype)[:, None, :]


def spatial_attention(x, w, *, block_batch=None, vmem_budget_bytes=2 * 1024 * 1024):
    """CBAM SpatialAttention forward.  x: (N, C, H, W); w: (1, 2, 7, 7), no bias."""
    N, C, H, W = x.shape
    HW = H * W

    # Lane-dense layout for all HBM<->VMEM traffic (free reshape of contiguous NCHW).
    x_flat = x.reshape(N, C, HW)
    w_flat = w.reshape(-1).astype(jnp.float32)            # (98,), held in SMEM

    # Batch elements per grid step: amortize per-step pipeline overhead while
    # keeping the double-buffered (in + out) blocks within a modest VMEM budget.
    if block_batch is None:
        per_batch = C * HW * x.dtype.itemsize
        block_batch = max(1, min(N, vmem_budget_bytes // max(1, per_batch)))
        while N % block_batch:
            block_batch -= 1
    grid = (N // block_batch,)

    kernel = functools.partial(_spatial_attention_kernel, H=H, W=W)

    out_flat = pl.pallas_call(
        kernel,
        out_shape=jax.ShapeDtypeStruct((N, C, HW), x.dtype),
        grid_spec=pltpu.PrefetchScalarGridSpec(
            num_scalar_prefetch=0,
            grid=grid,
            in_specs=[
                pl.BlockSpec(memory_space=pltpu.SMEM),                     # weights
                pl.BlockSpec((block_batch, C, HW), lambda b: (b, 0, 0)),   # x
            ],
            out_specs=pl.BlockSpec((block_batch, C, HW), lambda b: (b, 0, 0)),
        ),
        compiler_params=pltpu.CompilerParams(
            dimension_semantics=("parallel",),   # batch blocks are independent
            vmem_limit_bytes=48 * 1024 * 1024,
        ),
    )(w_flat, x_flat)

    return out_flat.reshape(N, C, H, W)


def spatial_attention_ref(x, w):
    """Pure-JAX reference mirroring the PyTorch module."""
    avg = jnp.mean(x, axis=1, keepdims=True)
    mx = jnp.max(x, axis=1, keepdims=True)
    feat = jnp.concatenate([avg, mx], axis=1)                          # (N, 2, H, W)
    conv = jax.lax.conv_general_dilated(
        feat, w, window_strides=(1, 1), padding=((PAD, PAD), (PAD, PAD)),
        dimension_numbers=("NCHW", "OIHW", "NCHW"),
    )                                                                  # (N, 1, H, W)
    return x * jax.nn.sigmoid(conv)


if __name__ == "__main__":
    key = jax.random.PRNGKey(0)
    kx, kw = jax.random.split(key)

    # Small shapes consistent with the module's forward (NCHW).
    N, C, H, W = 2, 4, 16, 16
    x = jax.random.normal(kx, (N, C, H, W), dtype=jnp.float32)

    # Deterministic synthetic conv weight of shape (1, 2, 7, 7), no bias.
    fan_in = 2 * KSIZE * KSIZE
    bound = 1.0 / (fan_in ** 0.5)
    w = jax.random.uniform(kw, (1, 2, KSIZE, KSIZE), jnp.float32, -bound, bound)

    out = spatial_attention(x, w)
    out = jax.block_until_ready(out)

    ref = jax.block_until_ready(spatial_attention_ref(x, w))
    assert out.shape == (N, C, H, W)
    assert jnp.allclose(out, ref, atol=1e-5, rtol=1e-5), "mismatch vs reference"

    print("KERNEL_OK")
</pallas_src>

<mosaic_0001>
module attributes {stable_mosaic.version = 11 : i64} {
  func.func @_spatial_attention_kernel(%arg0: i32, %arg1: memref<98xf32, #tpu.memory_space<smem>>, %arg2: memref<2x4x256xf32, #tpu.memory_space<vmem>>, %arg3: memref<2x4x256xf32, #tpu.memory_space<vmem>>) attributes {dimension_semantics = [#tpu.dimension_semantics<parallel>], iteration_bounds = array<i64: 1>, scalar_prefetch = 0 : i64, scratch_operands = 0 : i64, tpu.core_type = #tpu.core_type<tc>, window_params = [{transform_indices = @transform_0, window_bounds = array<i64: 98>}, {transform_indices = @transform_1, window_bounds = array<i64: 2, 4, 256>}, {transform_indices = @transform_2, window_bounds = array<i64: 2, 4, 256>}]} {
    %c0 = arith.constant 0 : index
    %c0_0 = arith.constant 0 : index
    %c0_1 = arith.constant 0 : index
    %0 = vector.load %arg2[%c0, %c0_0, %c0_1] : memref<2x4x256xf32, #tpu.memory_space<vmem>>, vector<2x4x256xf32>
    %cst = arith.constant dense<0.000000e+00> : vector<2x256xf32>
    %1 = vector.multi_reduction <add>, %0, %cst [1] : vector<2x4x256xf32> to vector<2x256xf32>
    %cst_2 = arith.constant 4.000000e+00 : f32
    %2 = vector.broadcast %cst_2 : f32 to vector<2x256xf32>
    %3 = arith.divf %1, %2 : vector<2x256xf32>
    %cst_3 = arith.constant dense<0xFF800000> : vector<2x256xf32>
    %4 = vector.multi_reduction <maximumf>, %0, %cst_3 [1] : vector<2x4x256xf32> to vector<2x256xf32>
    %5 = tpu.iota {dimensions = array<i32: 1>} : vector<1x256xi32>
    %c15_i32 = arith.constant 15 : i32
    %6 = vector.broadcast %c15_i32 : i32 to vector<1x256xi32>
    %7 = arith.andi %5, %6 : vector<1x256xi32>
    %cst_4 = arith.constant 0.000000e+00 : f32
    %8 = vector.broadcast %cst_4 : f32 to vector<2x256xf32>
    %cst_5 = arith.constant 0.000000e+00 : f32
    %9 = vector.broadcast %cst_5 : f32 to vector<2x256xf32>
    %cst_6 = arith.constant 0.000000e+00 : f32
    %10 = vector.broadcast %cst_6 : f32 to vector<2x256xf32>
    %cst_7 = arith.constant 0.000000e+00 : f32
    %11 = vector.broadcast %cst_7 : f32 to vector<2x256xf32>
    %c51_i32 = arith.constant 51 : i32
    %12 = tpu.dynamic_rotate %3 by %c51_i32 dim 1 : vector<2x256xf32>, i32 -> vector<2x256xf32>
    %c51_i32_8 = arith.constant 51 : i32
    %13 = tpu.dynamic_rotate %4 by %c51_i32_8 dim 1 : vector<2x256xf32>, i32 -> vector<2x256xf32>
    %c0_9 = arith.constant 0 : index
    %14 = memref.load %arg1[%c0_9] : memref<98xf32, #tpu.memory_space<smem>>
    %c49 = arith.constant 49 : index
    %15 = memref.load %arg1[%c49] : memref<98xf32, #tpu.memory_space<smem>>
    %16 = vector.broadcast %14 : f32 to vector<2x256xf32>
    %17 = arith.mulf %16, %12 : vector<2x256xf32>
    %18 = vector.broadcast %15 : f32 to vector<2x256xf32>
    %19 = arith.mulf %18, %13 : vector<2x256xf32>
    %20 = arith.addf %17, %19 : vector<2x256xf32>
    %c3_i32 = arith.constant 3 : i32
    %21 = vector.broadcast %c3_i32 : i32 to vector<1x256xi32>
    %22 = arith.cmpi sge, %7, %21 : vector<1x256xi32>
    %c51_i32_10 = arith.constant 51 : i32
    %23 = vector.broadcast %c51_i32_10 : i32 to vector<1x256xi32>
    %24 = arith.cmpi sge, %5, %23 : vector<1x256xi32>
    %25 = arith.andi %22, %24 : vector<1x256xi1>
    %cst_11 = arith.constant 0.000000e+00 : f32
    %26 = vector.shape_cast %25 : vector<1x256xi1> to vector<1x256xi1>
    %27 = vector.broadcast %26 : vector<1x256xi1> to vector<2x256xi1>
    %28 = vector.broadcast %cst_11 : f32 to vector<2x256xf32>
    %29 = arith.select %27, %20, %28 : vector<2x256xi1>, vector<2x256xf32>
    %30 = arith.addf %8, %29 : vector<2x256xf32>
    %c50_i32 = arith.constant 50 : i32
    %31 = tpu.dynamic_rotate %3 by %c50_i32 dim 1 : vector<2x256xf32>, i32 -> vector<2x256xf32>
    %c50_i32_12 = arith.constant 50 : i32
    %32 = tpu.dynamic_rotate %4 by %c50_i32_12 dim 1 : vector<2x256xf32>, i32 -> vector<2x256xf32>
    %c1 = arith.constant 1 : index
    %33 = memref.load %arg1[%c1] : memref<98xf32, #tpu.memory_space<smem>>
    %c50 = arith.constant 50 : index
    %34 = memref.load %arg1[%c50] : memref<98xf32, #tpu.memory_space<smem>>
    %35 = vector.broadcast %33 : f32 to vector<2x256xf32>
    %36 = arith.mulf %35, %31 : vector<2x256xf32>
    %37 = vector.broadcast %34 : f32 to vector<2x256xf32>
    %38 = arith.mulf %37, %32 : vector<2x256xf32>
    %39 = arith.addf %36, %38 : vector<2x256xf32>
    %c2_i32 = arith.constant 2 : i32
    %40 = vector.broadcast %c2_i32 : i32 to vector<1x256xi32>
    %41 = arith.cmpi sge, %7, %40 : vector<1x256xi32>
    %c50_i32_13 = arith.constant 50 : i32
    %42 = vector.broadcast %c50_i32_13 : i32 to vector<1x256xi32>
    %43 = arith.cmpi sge, %5, %42 : vector<1x256xi32>
    %44 = arith.andi %41, %43 : vector<1x256xi1>
    %cst_14 = arith.constant 0.000000e+00 : f32
    %45 = vector.shape_cast %44 : vector<1x256xi1> to vector<1x256xi1>
    %46 = vector.broadcast %45 : vector<1x256xi1> to vector<2x256xi1>
    %47 = vector.broadcast %cst_14 : f32 to vector<2x256xf32>
    %48 = arith.select %46, %39, %47 : vector<2x256xi1>, vector<2x256xf32>
    %49 = arith.addf %9, %48 : vector<2x256xf32>
    %c49_i32 = arith.constant 49 : i32
    %50 = tpu.dynamic_rotate %3 by %c49_i32 dim 1 : vector<2x256xf32>, i32 -> vector<2x256xf32>
    %c49_i32_15 = arith.constant 49 : i32
    %51 = tpu.dynamic_rotate %4 by %c49_i32_15 dim 1 : vector<2x256xf32>, i32 -> vector<2x256xf32>
    %c2 = arith.constant 2 : index
    %52 = memref.load %arg1[%c2] : memref<98xf32, #tpu.memory_space<smem>>
    %c51 = arith.constant 51 : index
    %53 = memref.load %arg1[%c51] : memref<98xf32, #tpu.memory_space<smem>>
    %54 = vector.broadcast %52 : f32 to vector<2x256xf32>
    %55 = arith.mulf %54, %50 : vector<2x256xf32>
    %56 = vector.broadcast %53 : f32 to vector<2x256xf32>
    %57 = arith.mulf %56, %51 : vector<2x256xf32>
    %58 = arith.addf %55, %57 : vector<2x256xf32>
    %c1_i32 = arith.constant 1 : i32
    %59 = vector.broadcast %c1_i32 : i32 to vector<1x256xi32>
    %60 = arith.cmpi sge, %7, %59 : vector<1x256xi32>
    %c49_i32_16 = arith.constant 49 : i32
    %61 = vector.broadcast %c49_i32_16 : i32 to vector<1x256xi32>
    %62 = arith.cmpi sge, %5, %61 : vector<1x256xi32>
    %63 = arith.andi %60, %62 : vector<1x256xi1>
    %cst_17 = arith.constant 0.000000e+00 : f32
    %64 = vector.shape_cast %63 : vector<1x256xi1> to vector<1x256xi1>
    %65 = vector.broadcast %64 : vector<1x256xi1> to vector<2x256xi1>
    %66 = vector.broadcast %cst_17 : f32 to vector<2x256xf32>
    %67 = arith.select %65, %58, %66 : vector<2x256xi1>, vector<2x256xf32>
    %68 = arith.addf %10, %67 : vector<2x256xf32>
    %c48_i32 = arith.constant 48 : i32
    %69 = tpu.dynamic_rotate %3 by %c48_i32 dim 1 : vector<2x256xf32>, i32 -> vector<2x256xf32>
    %c48_i32_18 = arith.constant 48 : i32
    %70 = tpu.dynamic_rotate %4 by %c48_i32_18 dim 1 : vector<2x256xf32>, i32 -> vector<2x256xf32>
    %c3 = arith.constant 3 : index
    %71 = memref.load %arg1[%c3] : memref<98xf32, #tpu.memory_space<smem>>
    %c52 = arith.constant 52 : index
    %72 = memref.load %arg1[%c52] : memref<98xf32, #tpu.memory_space<smem>>
    %73 = vector.broadcast %71 : f32 to vector<2x256xf32>
    %74 = arith.mulf %73, %69 : vector<2x256xf32>
    %75 = vector.broadcast %72 : f32 to vector<2x256xf32>
    %76 = arith.mulf %75, %70 : vector<2x256xf32>
    %77 = arith.addf %74, %76 : vector<2x256xf32>
    %c48_i32_19 = arith.constant 48 : i32
    %78 = vector.broadcast %c48_i32_19 : i32 to vector<1x256xi32>
    %79 = arith.cmpi sge, %5, %78 : vector<1x256xi32>
    %cst_20 = arith.constant 0.000000e+00 : f32
    %80 = vector.shape_cast %79 : vector<1x256xi1> to vector<1x256xi1>
    %81 = vector.broadcast %80 : vector<1x256xi1> to vector<2x256xi1>
    %82 = vector.broadcast %cst_20 : f32 to vector<2x256xf32>
    %83 = arith.select %81, %77, %82 : vector<2x256xi1>, vector<2x256xf32>
    %84 = arith.addf %11, %83 : vector<2x256xf32>
    %c47_i32 = arith.constant 47 : i32
    %85 = tpu.dynamic_rotate %3 by %c47_i32 dim 1 : vector<2x256xf32>, i32 -> vector<2x256xf32>
    %c47_i32_21 = arith.constant 47 : i32
    %86 = tpu.dynamic_rotate %4 by %c47_i32_21 dim 1 : vector<2x256xf32>, i32 -> vector<2x256xf32>
    %c4 = arith.constant 4 : index
    %87 = memref.load %arg1[%c4] : memref<98xf32, #tpu.memory_space<smem>>
    %c53 = arith.constant 53 : index
    %88 = memref.load %arg1[%c53] : memref<98xf32, #tpu.memory_space<smem>>
    %89 = vector.broadcast %87 : f32 to vector<2x256xf32>
    %90 = arith.mulf %89, %85 : vector<2x256xf32>
    %91 = vector.broadcast %88 : f32 to vector<2x256xf32>
    %92 = arith.mulf %91, %86 : vector<2x256xf32>
    %93 = arith.addf %90, %92 : vector<2x256xf32>
    %c15_i32_22 = arith.constant 15 : i32
    %94 = vector.broadcast %c15_i32_22 : i32 to vector<1x256xi32>
    %95 = arith.cmpi slt, %7, %94 : vector<1x256xi32>
    %c47_i32_23 = arith.constant 47 : i32
    %96 = vector.broadcast %c47_i32_23 : i32 to vector<1x256xi32>
    %97 = arith.cmpi sge, %5, %96 : vector<1x256xi32>
    %98 = arith.andi %95, %97 : vector<1x256xi1>
    %cst_24 = arith.constant 0.000000e+00 : f32
    %99 = vector.shape_cast %98 : vector<1x256xi1> to vector<1x256xi1>
    %100 = vector.broadcast %99 : vector<1x256xi1> to vector<2x256xi1>
    %101 = vector.broadcast %cst_24 : f32 to vector<2x256xf32>
    %102 = arith.select %100, %93, %101 : vector<2x256xi1>, vector<2x256xf32>
    %103 = arith.addf %30, %102 : vector<2x256xf32>
    %c46_i32 = arith.constant 46 : i32
    %104 = tpu.dynamic_rotate %3 by %c46_i32 dim 1 : vector<2x256xf32>, i32 -> vector<2x256xf32>
    %c46_i32_25 = arith.constant 46 : i32
    %105 = tpu.dynamic_rotate %4 by %c46_i32_25 dim 1 : vector<2x256xf32>, i32 -> vector<2x256xf32>
    %c5 = arith.constant 5 : index
    %106 = memref.load %arg1[%c5] : memref<98xf32, #tpu.memory_space<smem>>
    %c54 = arith.constant 54 : index
    %107 = memref.load %arg1[%c54] : memref<98xf32, #tpu.memory_space<smem>>
    %108 = vector.broadcast %106 : f32 to vector<2x256xf32>
    %109 = arith.mulf %108, %104 : vector<2x256xf32>
    %110 = vector.broadcast %107 : f32 to vector<2x256xf32>
    %111 = arith.mulf %110, %105 : vector<2x256xf32>
    %112 = arith.addf %109, %111 : vector<2x256xf32>
    %c14_i32 = arith.constant 14 : i32
    %113 = vector.broadcast %c14_i32 : i32 to vector<1x256xi32>
    %114 = arith.cmpi slt, %7, %113 : vector<1x256xi32>
    %c46_i32_26 = arith.constant 46 : i32
    %115 = vector.broadcast %c46_i32_26 : i32 to vector<1x256xi32>
    %116 = arith.cmpi sge, %5, %115 : vector<1x256xi32>
    %117 = arith.andi %114, %116 : vector<1x256xi1>
    %cst_27 = arith.constant 0.000000e+00 : f32
    %118 = vector.shape_cast %117 : vector<1x256xi1> to vector<1x256xi1>
    %119 = vector.broadcast %118 : vector<1x256xi1> to vector<2x256xi1>
    %120 = vector.broadcast %cst_27 : f32 to vector<2x256xf32>
    %121 = arith.select %119, %112, %120 : vector<2x256xi1>, vector<2x256xf32>
    %122 = arith.addf %49, %121 : vector<2x256xf32>
    %c45_i32 = arith.constant 45 : i32
    %123 = tpu.dynamic_rotate %3 by %c45_i32 dim 1 : vector<2x256xf32>, i32 -> vector<2x256xf32>
    %c45_i32_28 = arith.constant 45 : i32
    %124 = tpu.dynamic_rotate %4 by %c45_i32_28 dim 1 : vector<2x256xf32>, i32 -> vector<2x256xf32>
    %c6 = arith.constant 6 : index
    %125 = memref.load %arg1[%c6] : memref<98xf32, #tpu.memory_space<smem>>
    %c55 = arith.constant 55 : index
    %126 = memref.load %arg1[%c55] : memref<98xf32, #tpu.memory_space<smem>>
    %127 = vector.broadcast %125 : f32 to vector<2x256xf32>
    %128 = arith.mulf %127, %123 : vector<2x256xf32>
    %129 = vector.broadcast %126 : f32 to vector<2x256xf32>
    %130 = arith.mulf %129, %124 : vector<2x256xf32>
    %131 = arith.addf %128, %130 : vector<2x256xf32>
    %c13_i32 = arith.constant 13 : i32
    %132 = vector.broadcast %c13_i32 : i32 to vector<1x256xi32>
    %133 = arith.cmpi slt, %7, %132 : vector<1x256xi32>
    %c45_i32_29 = arith.constant 45 : i32
    %134 = vector.broadcast %c45_i32_29 : i32 to vector<1x256xi32>
    %135 = arith.cmpi sge, %5, %134 : vector<1x256xi32>
    %136 = arith.andi %133, %135 : vector<1x256xi1>
    %cst_30 = arith.constant 0.000000e+00 : f32
    %137 = vector.shape_cast %136 : vector<1x256xi1> to vector<1x256xi1>
    %138 = vector.broadcast %137 : vector<1x256xi1> to vector<2x256xi1>
    %139 = vector.broadcast %cst_30 : f32 to vector<2x256xf32>
    %140 = arith.select %138, %131, %139 : vector<2x256xi1>, vector<2x256xf32>
    %141 = arith.addf %68, %140 : vector<2x256xf32>
    %c35_i32 = arith.constant 35 : i32
    %142 = tpu.dynamic_rotate %3 by %c35_i32 dim 1 : vector<2x256xf32>, i32 -> vector<2x256xf32>
    %c35_i32_31 = arith.constant 35 : i32
    %143 = tpu.dynamic_rotate %4 by %c35_i32_31 dim 1 : vector<2x256xf32>, i32 -> vector<2x256xf32>
    %c7 = arith.constant 7 : index
    %144 = memref.load %arg1[%c7] : memref<98xf32, #tpu.memory_space<smem>>
    %c56 = arith.constant 56 : index
    %145 = memref.load %arg1[%c56] : memref<98xf32, #tpu.memory_space<smem>>
    %146 = vector.broadcast %144 : f32 to vector<2x256xf32>
    %147 = arith.mulf %146, %142 : vector<2x256xf32>
    %148 = vector.broadcast %145 : f32 to vector<2x256xf32>
    %149 = arith.mulf %148, %143 : vector<2x256xf32>
    %150 = arith.addf %147, %149 : vector<2x256xf32>
    %c3_i32_32 = arith.constant 3 : i32
    %151 = vector.broadcast %c3_i32_32 : i32 to vector<1x256xi32>
    %152 = arith.cmpi sge, %7, %151 : vector<1x256xi32>
    %c35_i32_33 = arith.constant 35 : i32
    %153 = vector.broadcast %c35_i32_33 : i32 to vector<1x256xi32>
    %154 = arith.cmpi sge, %5, %153 : vector<1x256xi32>
    %155 = arith.andi %152, %154 : vector<1x256xi1>
    %cst_34 = arith.constant 0.000000e+00 : f32
    %156 = vector.shape_cast %155 : vector<1x256xi1> to vector<1x256xi1>
    %157 = vector.broadcast %156 : vector<1x256xi1> to vector<2x256xi1>
    %158 = vector.broadcast %cst_34 : f32 to vector<2x256xf32>
    %159 = arith.select %157, %150, %158 : vector<2x256xi1>, vector<2x256xf32>
    %160 = arith.addf %84, %159 : vector<2x256xf32>
    %c34_i32 = arith.constant 34 : i32
    %161 = tpu.dynamic_rotate %3 by %c34_i32 dim 1 : vector<2x256xf32>, i32 -> vector<2x256xf32>
    %c34_i32_35 = arith.constant 34 : i32
    %162 = tpu.dynamic_rotate %4 by %c34_i32_35 dim 1 : vector<2x256xf32>, i32 -> vector<2x256xf32>
    %c8 = arith.constant 8 : index
    %163 = memref.load %arg1[%c8] : memref<98xf32, #tpu.memory_space<smem>>
    %c57 = arith.constant 57 : index
    %164 = memref.load %arg1[%c57] : memref<98xf32, #tpu.memory_space<smem>>
    %165 = vector.broadcast %163 : f32 to vector<2x256xf32>
    %166 = arith.mulf %165, %161 : vector<2x256xf32>
    %167 = vector.broadcast %164 : f32 to vector<2x256xf32>
    %168 = arith.mulf %167, %162 : vector<2x256xf32>
    %169 = arith.addf %166, %168 : vector<2x256xf32>
    %c2_i32_36 = arith.constant 2 : i32
    %170 = vector.broadcast %c2_i32_36 : i32 to vector<1x256xi32>
    %171 = arith.cmpi sge, %7, %170 : vector<1x256xi32>
    %c34_i32_37 = arith.constant 34 : i32
    %172 = vector.broadcast %c34_i32_37 : i32 to vector<1x256xi32>
    %173 = arith.cmpi sge, %5, %172 : vector<1x256xi32>
    %174 = arith.andi %171, %173 : vector<1x256xi1>
    %cst_38 = arith.constant 0.000000e+00 : f32
    %175 = vector.shape_cast %174 : vector<1x256xi1> to vector<1x256xi1>
    %176 = vector.broadcast %175 : vector<1x256xi1> to vector<2x256xi1>
    %177 = vector.broadcast %cst_38 : f32 to vector<2x256xf32>
    %178 = arith.select %176, %169, %177 : vector<2x256xi1>, vector<2x256xf32>
    %179 = arith.addf %103, %178 : vector<2x256xf32>
    %c33_i32 = arith.constant 33 : i32
    %180 = tpu.dynamic_rotate %3 by %c33_i32 dim 1 : vector<2x256xf32>, i32 -> vector<2x256xf32>
    %c33_i32_39 = arith.constant 33 : i32
    %181 = tpu.dynamic_rotate %4 by %c33_i32_39 dim 1 : vector<2x256xf32>, i32 -> vector<2x256xf32>
    %c9 = arith.constant 9 : index
    %182 = memref.load %arg1[%c9] : memref<98xf32, #tpu.memory_space<smem>>
    %c58 = arith.constant 58 : index
    %183 = memref.load %arg1[%c58] : memref<98xf32, #tpu.memory_space<smem>>
    %184 = vector.broadcast %182 : f32 to vector<2x256xf32>
    %185 = arith.mulf %184, %180 : vector<2x256xf32>
    %186 = vector.broadcast %183 : f32 to vector<2x256xf32>
    %187 = arith.mulf %186, %181 : vector<2x256xf32>
    %188 = arith.addf %185, %187 : vector<2x256xf32>
    %c1_i32_40 = arith.constant 1 : i32
    %189 = vector.broadcast %c1_i32_40 : i32 to vector<1x256xi32>
    %190 = arith.cmpi sge, %7, %189 : vector<1x256xi32>
    %c33_i32_41 = arith.constant 33 : i32
    %191 = vector.broadcast %c33_i32_41 : i32 to vector<1x256xi32>
    %192 = arith.cmpi sge, %5, %191 : vector<1x256xi32>
    %193 = arith.andi %190, %192 : vector<1x256xi1>
    %cst_42 = arith.constant 0.000000e+00 : f32
    %194 = vector.shape_cast %193 : vector<1x256xi1> to vector<1x256xi1>
    %195 = vector.broadcast %194 : vector<1x256xi1> to vector<2x256xi1>
    %196 = vector.broadcast %cst_42 : f32 to vector<2x256xf32>
    %197 = arith.select %195, %188, %196 : vector<2x256xi1>, vector<2x256xf32>
    %198 = arith.addf %122, %197 : vector<2x256xf32>
    %c32_i32 = arith.constant 32 : i32
    %199 = tpu.dynamic_rotate %3 by %c32_i32 dim 1 : vector<2x256xf32>, i32 -> vector<2x256xf32>
    %c32_i32_43 = arith.constant 32 : i32
    %200 = tpu.dynamic_rotate %4 by %c32_i32_43 dim 1 : vector<2x256xf32>, i32 -> vector<2x256xf32>
    %c10 = arith.constant 10 : index
    %201 = memref.load %arg1[%c10] : memref<98xf32, #tpu.memory_space<smem>>
    %c59 = arith.constant 59 : index
    %202 = memref.load %arg1[%c59] : memref<98xf32, #tpu.memory_space<smem>>
    %203 = vector.broadcast %201 : f32 to vector<2x256xf32>
    %204 = arith.mulf %203, %199 : vector<2x256xf32>
    %205 = vector.broadcast %202 : f32 to vector<2x256xf32>
    %206 = arith.mulf %205, %200 : vector<2x256xf32>
    %207 = arith.addf %204, %206 : vector<2x256xf32>
    %c32_i32_44 = arith.constant 32 : i32
    %208 = vector.broadcast %c32_i32_44 : i32 to vector<1x256xi32>
    %209 = arith.cmpi sge, %5, %208 : vector<1x256xi32>
    %cst_45 = arith.constant 0.000000e+00 : f32
    %210 = vector.shape_cast %209 : vector<1x256xi1> to vector<1x256xi1>
    %211 = vector.broadcast %210 : vector<1x256xi1> to vector<2x256xi1>
    %212 = vector.broadcast %cst_45 : f32 to vector<2x256xf32>
    %213 = arith.select %211, %207, %212 : vector<2x256xi1>, vector<2x256xf32>
    %214 = arith.addf %141, %213 : vector<2x256xf32>
    %c31_i32 = arith.constant 31 : i32
    %215 = tpu.dynamic_rotate %3 by %c31_i32 dim 1 : vector<2x256xf32>, i32 -> vector<2x256xf32>
    %c31_i32_46 = arith.constant 31 : i32
    %216 = tpu.dynamic_rotate %4 by %c31_i32_46 dim 1 : vector<2x256xf32>, i32 -> vector<2x256xf32>
    %c11 = arith.constant 11 : index
    %217 = memref.load %arg1[%c11] : memref<98xf32, #tpu.memory_space<smem>>
    %c60 = arith.constant 60 : index
    %218 = memref.load %arg1[%c60] : memref<98xf32, #tpu.memory_space<smem>>
    %219 = vector.broadcast %217 : f32 to vector<2x256xf32>
    %220 = arith.mulf %219, %215 : vector<2x256xf32>
    %221 = vector.broadcast %218 : f32 to vector<2x256xf32>
    %222 = arith.mulf %221, %216 : vector<2x256xf32>
    %223 = arith.addf %220, %222 : vector<2x256xf32>
    %c15_i32_47 = arith.constant 15 : i32
    %224 = vector.broadcast %c15_i32_47 : i32 to vector<1x256xi32>
    %225 = arith.cmpi slt, %7, %224 : vector<1x256xi32>
    %c31_i32_48 = arith.constant 31 : i32
    %226 = vector.broadcast %c31_i32_48 : i32 to vector<1x256xi32>
    %227 = arith.cmpi sge, %5, %226 : vector<1x256xi32>
    %228 = arith.andi %225, %227 : vector<1x256xi1>
    %cst_49 = arith.constant 0.000000e+00 : f32
    %229 = vector.shape_cast %228 : vector<1x256xi1> to vector<1x256xi1>
    %230 = vector.broadcast %229 : vector<1x256xi1> to vector<2x256xi1>
    %231 = vector.broadcast %cst_49 : f32 to vector<2x256xf32>
    %232 = arith.select %230, %223, %231 : vector<2x256xi1>, vector<2x256xf32>
    %233 = arith.addf %160, %232 : vector<2x256xf32>
    %c30_i32 = arith.constant 30 : i32
    %234 = tpu.dynamic_rotate %3 by %c30_i32 dim 1 : vector<2x256xf32>, i32 -> vector<2x256xf32>
    %c30_i32_50 = arith.constant 30 : i32
    %235 = tpu.dynamic_rotate %4 by %c30_i32_50 dim 1 : vector<2x256xf32>, i32 -> vector<2x256xf32>
    %c12 = arith.constant 12 : index
    %236 = memref.load %arg1[%c12] : memref<98xf32, #tpu.memory_space<smem>>
    %c61 = arith.constant 61 : index
    %237 = memref.load %arg1[%c61] : memref<98xf32, #tpu.memory_space<smem>>
    %238 = vector.broadcast %236 : f32 to vector<2x256xf32>
    %239 = arith.mulf %238, %234 : vector<2x256xf32>
    %240 = vector.broadcast %237 : f32 to vector<2x256xf32>
    %241 = arith.mulf %240, %235 : vector<2x256xf32>
    %242 = arith.addf %239, %241 : vector<2x256xf32>
    %c14_i32_51 = arith.constant 14 : i32
    %243 = vector.broadcast %c14_i32_51 : i32 to vector<1x256xi32>
    %244 = arith.cmpi slt, %7, %243 : vector<1x256xi32>
    %c30_i32_52 = arith.constant 30 : i32
    %245 = vector.broadcast %c30_i32_52 : i32 to vector<1x256xi32>
    %246 = arith.cmpi sge, %5, %245 : vector<1x256xi32>
    %247 = arith.andi %244, %246 : vector<1x256xi1>
    %cst_53 = arith.constant 0.000000e+00 : f32
    %248 = vector.shape_cast %247 : vector<1x256xi1> to vector<1x256xi1>
    %249 = vector.broadcast %248 : vector<1x256xi1> to vector<2x256xi1>
    %250 = vector.broadcast %cst_53 : f32 to vector<2x256xf32>
    %251 = arith.select %249, %242, %250 : vector<2x256xi1>, vector<2x256xf32>
    %252 = arith.addf %179, %251 : vector<2x256xf32>
    %c29_i32 = arith.constant 29 : i32
    %253 = tpu.dynamic_rotate %3 by %c29_i32 dim 1 : vector<2x256xf32>, i32 -> vector<2x256xf32>
    %c29_i32_54 = arith.constant 29 : i32
    %254 = tpu.dynamic_rotate %4 by %c29_i32_54 dim 1 : vector<2x256xf32>, i32 -> vector<2x256xf32>
    %c13 = arith.constant 13 : index
    %255 = memref.load %arg1[%c13] : memref<98xf32, #tpu.memory_space<smem>>
    %c62 = arith.constant 62 : index
    %256 = memref.load %arg1[%c62] : memref<98xf32, #tpu.memory_space<smem>>
    %257 = vector.broadcast %255 : f32 to vector<2x256xf32>
    %258 = arith.mulf %257, %253 : vector<2x256xf32>
    %259 = vector.broadcast %256 : f32 to vector<2x256xf32>
    %260 = arith.mulf %259, %254 : vector<2x256xf32>
    %261 = arith.addf %258, %260 : vector<2x256xf32>
    %c13_i32_55 = arith.constant 13 : i32
    %262 = vector.broadcast %c13_i32_55 : i32 to vector<1x256xi32>
    %263 = arith.cmpi slt, %7, %262 : vector<1x256xi32>
    %c29_i32_56 = arith.constant 29 : i32
    %264 = vector.broadcast %c29_i32_56 : i32 to vector<1x256xi32>
    %265 = arith.cmpi sge, %5, %264 : vector<1x256xi32>
    %266 = arith.andi %263, %265 : vector<1x256xi1>
    %cst_57 = arith.constant 0.000000e+00 : f32
    %267 = vector.shape_cast %266 : vector<1x256xi1> to vector<1x256xi1>
    %268 = vector.broadcast %267 : vector<1x256xi1> to vector<2x256xi1>
    %269 = vector.broadcast %cst_57 : f32 to vector<2x256xf32>
    %270 = arith.select %268, %261, %269 : vector<2x256xi1>, vector<2x256xf32>
    %271 = arith.addf %198, %270 : vector<2x256xf32>
    %c19_i32 = arith.constant 19 : i32
    %272 = tpu.dynamic_rotate %3 by %c19_i32 dim 1 : vector<2x256xf32>, i32 -> vector<2x256xf32>
    %c19_i32_58 = arith.constant 19 : i32
    %273 = tpu.dynamic_rotate %4 by %c19_i32_58 dim 1 : vector<2x256xf32>, i32 -> vector<2x256xf32>
    %c14 = arith.constant 14 : index
    %274 = memref.load %arg1[%c14] : memref<98xf32, #tpu.memory_space<smem>>
    %c63 = arith.constant 63 : index
    %275 = memref.load %arg1[%c63] : memref<98xf32, #tpu.memory_space<smem>>
    %276 = vector.broadcast %274 : f32 to vector<2x256xf32>
    %277 = arith.mulf %276, %272 : vector<2x256xf32>
    %278 = vector.broadcast %275 : f32 to vector<2x256xf32>
    %279 = arith.mulf %278, %273 : vector<2x256xf32>
    %280 = arith.addf %277, %279 : vector<2x256xf32>
    %c3_i32_59 = arith.constant 3 : i32
    %281 = vector.broadcast %c3_i32_59 : i32 to vector<1x256xi32>
    %282 = arith.cmpi sge, %7, %281 : vector<1x256xi32>
    %c19_i32_60 = arith.constant 19 : i32
    %283 = vector.broadcast %c19_i32_60 : i32 to vector<1x256xi32>
    %284 = arith.cmpi sge, %5, %283 : vector<1x256xi32>
    %285 = arith.andi %282, %284 : vector<1x256xi1>
    %cst_61 = arith.constant 0.000000e+00 : f32
    %286 = vector.shape_cast %285 : vector<1x256xi1> to vector<1x256xi1>
    %287 = vector.broadcast %286 : vector<1x256xi1> to vector<2x256xi1>
    %288 = vector.broadcast %cst_61 : f32 to vector<2x256xf32>
    %289 = arith.select %287, %280, %288 : vector<2x256xi1>, vector<2x256xf32>
    %290 = arith.addf %214, %289 : vector<2x256xf32>
    %c18_i32 = arith.constant 18 : i32
    %291 = tpu.dynamic_rotate %3 by %c18_i32 dim 1 : vector<2x256xf32>, i32 -> vector<2x256xf32>
    %c18_i32_62 = arith.constant 18 : i32
    %292 = tpu.dynamic_rotate %4 by %c18_i32_62 dim 1 : vector<2x256xf32>, i32 -> vector<2x256xf32>
    %c15 = arith.constant 15 : index
    %293 = memref.load %arg1[%c15] : memref<98xf32, #tpu.memory_space<smem>>
    %c64 = arith.constant 64 : index
    %294 = memref.load %arg1[%c64] : memref<98xf32, #tpu.memory_space<smem>>
    %295 = vector.broadcast %293 : f32 to vector<2x256xf32>
    %296 = arith.mulf %295, %291 : vector<2x256xf32>
    %297 = vector.broadcast %294 : f32 to vector<2x256xf32>
    %298 = arith.mulf %297, %292 : vector<2x256xf32>
    %299 = arith.addf %296, %298 : vector<2x256xf32>
    %c2_i32_63 = arith.constant 2 : i32
    %300 = vector.broadcast %c2_i32_63 : i32 to vector<1x256xi32>
    %301 = arith.cmpi sge, %7, %300 : vector<1x256xi32>
    %c18_i32_64 = arith.constant 18 : i32
    %302 = vector.broadcast %c18_i32_64 : i32 to vector<1x256xi32>
    %303 = arith.cmpi sge, %5, %302 : vector<1x256xi32>
    %304 = arith.andi %301, %303 : vector<1x256xi1>
    %cst_65 = arith.constant 0.000000e+00 : f32
    %305 = vector.shape_cast %304 : vector<1x256xi1> to vector<1x256xi1>
    %306 = vector.broadcast %305 : vector<1x256xi1> to vector<2x256xi1>
    %307 = vector.broadcast %cst_65 : f32 to vector<2x256xf32>
    %308 = arith.select %306, %299, %307 : vector<2x256xi1>, vector<2x256xf32>
    %309 = arith.addf %233, %308 : vector<2x256xf32>
    %c17_i32 = arith.constant 17 : i32
    %310 = tpu.dynamic_rotate %3 by %c17_i32 dim 1 : vector<2x256xf32>, i32 -> vector<2x256xf32>
    %c17_i32_66 = arith.constant 17 : i32
    %311 = tpu.dynamic_rotate %4 by %c17_i32_66 dim 1 : vector<2x256xf32>, i32 -> vector<2x256xf32>
    %c16 = arith.constant 16 : index
    %312 = memref.load %arg1[%c16] : memref<98xf32, #tpu.memory_space<smem>>
    %c65 = arith.constant 65 : index
    %313 = memref.load %arg1[%c65] : memref<98xf32, #tpu.memory_space<smem>>
    %314 = vector.broadcast %312 : f32 to vector<2x256xf32>
    %315 = arith.mulf %314, %310 : vector<2x256xf32>
    %316 = vector.broadcast %313 : f32 to vector<2x256xf32>
    %317 = arith.mulf %316, %311 : vector<2x256xf32>
    %318 = arith.addf %315, %317 : vector<2x256xf32>
    %c1_i32_67 = arith.constant 1 : i32
    %319 = vector.broadcast %c1_i32_67 : i32 to vector<1x256xi32>
    %320 = arith.cmpi sge, %7, %319 : vector<1x256xi32>
    %c17_i32_68 = arith.constant 17 : i32
    %321 = vector.broadcast %c17_i32_68 : i32 to vector<1x256xi32>
    %322 = arith.cmpi sge, %5, %321 : vector<1x256xi32>
    %323 = arith.andi %320, %322 : vector<1x256xi1>
    %cst_69 = arith.constant 0.000000e+00 : f32
    %324 = vector.shape_cast %323 : vector<1x256xi1> to vector<1x256xi1>
    %325 = vector.broadcast %324 : vector<1x256xi1> to vector<2x256xi1>
    %326 = vector.broadcast %cst_69 : f32 to vector<2x256xf32>
    %327 = arith.select %325, %318, %326 : vector<2x256xi1>, vector<2x256xf32>
    %328 = arith.addf %252, %327 : vector<2x256xf32>
    %c16_i32 = arith.constant 16 : i32
    %329 = tpu.dynamic_rotate %3 by %c16_i32 dim 1 : vector<2x256xf32>, i32 -> vector<2x256xf32>
    %c16_i32_70 = arith.constant 16 : i32
    %330 = tpu.dynamic_rotate %4 by %c16_i32_70 dim 1 : vector<2x256xf32>, i32 -> vector<2x256xf32>
    %c17 = arith.constant 17 : index
    %331 = memref.load %arg1[%c17] : memref<98xf32, #tpu.memory_space<smem>>
    %c66 = arith.constant 66 : index
    %332 = memref.load %arg1[%c66] : memref<98xf32, #tpu.memory_space<smem>>
    %333 = vector.broadcast %331 : f32 to vector<2x256xf32>
    %334 = arith.mulf %333, %329 : vector<2x256xf32>
    %335 = vector.broadcast %332 : f32 to vector<2x256xf32>
    %336 = arith.mulf %335, %330 : vector<2x256xf32>
    %337 = arith.addf %334, %336 : vector<2x256xf32>
    %c16_i32_71 = arith.constant 16 : i32
    %338 = vector.broadcast %c16_i32_71 : i32 to vector<1x256xi32>
    %339 = arith.cmpi sge, %5, %338 : vector<1x256xi32>
    %cst_72 = arith.constant 0.000000e+00 : f32
    %340 = vector.shape_cast %339 : vector<1x256xi1> to vector<1x256xi1>
    %341 = vector.broadcast %340 : vector<1x256xi1> to vector<2x256xi1>
    %342 = vector.broadcast %cst_72 : f32 to vector<2x256xf32>
    %343 = arith.select %341, %337, %342 : vector<2x256xi1>, vector<2x256xf32>
    %344 = arith.addf %271, %343 : vector<2x256xf32>
    %c15_i32_73 = arith.constant 15 : i32
    %345 = tpu.dynamic_rotate %3 by %c15_i32_73 dim 1 : vector<2x256xf32>, i32 -> vector<2x256xf32>
    %c15_i32_74 = arith.constant 15 : i32
    %346 = tpu.dynamic_rotate %4 by %c15_i32_74 dim 1 : vector<2x256xf32>, i32 -> vector<2x256xf32>
    %c18 = arith.constant 18 : index
    %347 = memref.load %arg1[%c18] : memref<98xf32, #tpu.memory_space<smem>>
    %c67 = arith.constant 67 : index
    %348 = memref.load %arg1[%c67] : memref<98xf32, #tpu.memory_space<smem>>
    %349 = vector.broadcast %347 : f32 to vector<2x256xf32>
    %350 = arith.mulf %349, %345 : vector<2x256xf32>
    %351 = vector.broadcast %348 : f32 to vector<2x256xf32>
    %352 = arith.mulf %351, %346 : vector<2x256xf32>
    %353 = arith.addf %350, %352 : vector<2x256xf32>
    %c15_i32_75 = arith.constant 15 : i32
    %354 = vector.broadcast %c15_i32_75 : i32 to vector<1x256xi32>
    %355 = arith.cmpi slt, %7, %354 : vector<1x256xi32>
    %c15_i32_76 = arith.constant 15 : i32
    %356 = vector.broadcast %c15_i32_76 : i32 to vector<1x256xi32>
    %357 = arith.cmpi sge, %5, %356 : vector<1x256xi32>
    %358 = arith.andi %355, %357 : vector<1x256xi1>
    %cst_77 = arith.constant 0.000000e+00 : f32
    %359 = vector.shape_cast %358 : vector<1x256xi1> to vector<1x256xi1>
    %360 = vector.broadcast %359 : vector<1x256xi1> to vector<2x256xi1>
    %361 = vector.broadcast %cst_77 : f32 to vector<2x256xf32>
    %362 = arith.select %360, %353, %361 : vector<2x256xi1>, vector<2x256xf32>
    %363 = arith.addf %290, %362 : vector<2x256xf32>
    %c14_i32_78 = arith.constant 14 : i32
    %364 = tpu.dynamic_rotate %3 by %c14_i32_78 dim 1 : vector<2x256xf32>, i32 -> vector<2x256xf32>
    %c14_i32_79 = arith.constant 14 : i32
    %365 = tpu.dynamic_rotate %4 by %c14_i32_79 dim 1 : vector<2x256xf32>, i32 -> vector<2x256xf32>
    %c19 = arith.constant 19 : index
    %366 = memref.load %arg1[%c19] : memref<98xf32, #tpu.memory_space<smem>>
    %c68 = arith.constant 68 : index
    %367 = memref.load %arg1[%c68] : memref<98xf32, #tpu.memory_space<smem>>
    %368 = vector.broadcast %366 : f32 to vector<2x256xf32>
    %369 = arith.mulf %368, %364 : vector<2x256xf32>
    %370 = vector.broadcast %367 : f32 to vector<2x256xf32>
    %371 = arith.mulf %370, %365 : vector<2x256xf32>
    %372 = arith.addf %369, %371 : vector<2x256xf32>
    %c14_i32_80 = arith.constant 14 : i32
    %373 = vector.broadcast %c14_i32_80 : i32 to vector<1x256xi32>
    %374 = arith.cmpi slt, %7, %373 : vector<1x256xi32>
    %c14_i32_81 = arith.constant 14 : i32
    %375 = vector.broadcast %c14_i32_81 : i32 to vector<1x256xi32>
    %376 = arith.cmpi sge, %5, %375 : vector<1x256xi32>
    %377 = arith.andi %374, %376 : vector<1x256xi1>
    %cst_82 = arith.constant 0.000000e+00 : f32
    %378 = vector.shape_cast %377 : vector<1x256xi1> to vector<1x256xi1>
    %379 = vector.broadcast %378 : vector<1x256xi1> to vector<2x256xi1>
    %380 = vector.broadcast %cst_82 : f32 to vector<2x256xf32>
    %381 = arith.select %379, %372, %380 : vector<2x256xi1>, vector<2x256xf32>
    %382 = arith.addf %309, %381 : vector<2x256xf32>
    %c13_i32_83 = arith.constant 13 : i32
    %383 = tpu.dynamic_rotate %3 by %c13_i32_83 dim 1 : vector<2x256xf32>, i32 -> vector<2x256xf32>
    %c13_i32_84 = arith.constant 13 : i32
    %384 = tpu.dynamic_rotate %4 by %c13_i32_84 dim 1 : vector<2x256xf32>, i32 -> vector<2x256xf32>
    %c20 = arith.constant 20 : index
    %385 = memref.load %arg1[%c20] : memref<98xf32, #tpu.memory_space<smem>>
    %c69 = arith.constant 69 : index
    %386 = memref.load %arg1[%c69] : memref<98xf32, #tpu.memory_space<smem>>
    %387 = vector.broadcast %385 : f32 to vector<2x256xf32>
    %388 = arith.mulf %387, %383 : vector<2x256xf32>
    %389 = vector.broadcast %386 : f32 to vector<2x256xf32>
    %390 = arith.mulf %389, %384 : vector<2x256xf32>
    %391 = arith.addf %388, %390 : vector<2x256xf32>
    %c13_i32_85 = arith.constant 13 : i32
    %392 = vector.broadcast %c13_i32_85 : i32 to vector<1x256xi32>
    %393 = arith.cmpi slt, %7, %392 : vector<1x256xi32>
    %c13_i32_86 = arith.constant 13 : i32
    %394 = vector.broadcast %c13_i32_86 : i32 to vector<1x256xi32>
    %395 = arith.cmpi sge, %5, %394 : vector<1x256xi32>
    %396 = arith.andi %393, %395 : vector<1x256xi1>
    %cst_87 = arith.constant 0.000000e+00 : f32
    %397 = vector.shape_cast %396 : vector<1x256xi1> to vector<1x256xi1>
    %398 = vector.broadcast %397 : vector<1x256xi1> to vector<2x256xi1>
    %399 = vector.broadcast %cst_87 : f32 to vector<2x256xf32>
    %400 = arith.select %398, %391, %399 : vector<2x256xi1>, vector<2x256xf32>
    %401 = arith.addf %328, %400 : vector<2x256xf32>
    %c3_i32_88 = arith.constant 3 : i32
    %402 = tpu.dynamic_rotate %3 by %c3_i32_88 dim 1 : vector<2x256xf32>, i32 -> vector<2x256xf32>
    %c3_i32_89 = arith.constant 3 : i32
    %403 = tpu.dynamic_rotate %4 by %c3_i32_89 dim 1 : vector<2x256xf32>, i32 -> vector<2x256xf32>
    %c21 = arith.constant 21 : index
    %404 = memref.load %arg1[%c21] : memref<98xf32, #tpu.memory_space<smem>>
    %c70 = arith.constant 70 : index
    %405 = memref.load %arg1[%c70] : memref<98xf32, #tpu.memory_space<smem>>
    %406 = vector.broadcast %404 : f32 to vector<2x256xf32>
    %407 = arith.mulf %406, %402 : vector<2x256xf32>
    %408 = vector.broadcast %405 : f32 to vector<2x256xf32>
    %409 = arith.mulf %408, %403 : vector<2x256xf32>
    %410 = arith.addf %407, %409 : vector<2x256xf32>
    %c3_i32_90 = arith.constant 3 : i32
    %411 = vector.broadcast %c3_i32_90 : i32 to vector<1x256xi32>
    %412 = arith.cmpi sge, %7, %411 : vector<1x256xi32>
    %c3_i32_91 = arith.constant 3 : i32
    %413 = vector.broadcast %c3_i32_91 : i32 to vector<1x256xi32>
    %414 = arith.cmpi sge, %5, %413 : vector<1x256xi32>
    %415 = arith.andi %412, %414 : vector<1x256xi1>
    %cst_92 = arith.constant 0.000000e+00 : f32
    %416 = vector.shape_cast %415 : vector<1x256xi1> to vector<1x256xi1>
    %417 = vector.broadcast %416 : vector<1x256xi1> to vector<2x256xi1>
    %418 = vector.broadcast %cst_92 : f32 to vector<2x256xf32>
    %419 = arith.select %417, %410, %418 : vector<2x256xi1>, vector<2x256xf32>
    %420 = arith.addf %344, %419 : vector<2x256xf32>
    %c2_i32_93 = arith.constant 2 : i32
    %421 = tpu.dynamic_rotate %3 by %c2_i32_93 dim 1 : vector<2x256xf32>, i32 -> vector<2x256xf32>
    %c2_i32_94 = arith.constant 2 : i32
    %422 = tpu.dynamic_rotate %4 by %c2_i32_94 dim 1 : vector<2x256xf32>, i32 -> vector<2x256xf32>
    %c22 = arith.constant 22 : index
    %423 = memref.load %arg1[%c22] : memref<98xf32, #tpu.memory_space<smem>>
    %c71 = arith.constant 71 : index
    %424 = memref.load %arg1[%c71] : memref<98xf32, #tpu.memory_space<smem>>
    %425 = vector.broadcast %423 : f32 to vector<2x256xf32>
    %426 = arith.mulf %425, %421 : vector<2x256xf32>
    %427 = vector.broadcast %424 : f32 to vector<2x256xf32>
    %428 = arith.mulf %427, %422 : vector<2x256xf32>
    %429 = arith.addf %426, %428 : vector<2x256xf32>
    %c2_i32_95 = arith.constant 2 : i32
    %430 = vector.broadcast %c2_i32_95 : i32 to vector<1x256xi32>
    %431 = arith.cmpi sge, %7, %430 : vector<1x256xi32>
    %c2_i32_96 = arith.constant 2 : i32
    %432 = vector.broadcast %c2_i32_96 : i32 to vector<1x256xi32>
    %433 = arith.cmpi sge, %5, %432 : vector<1x256xi32>
    %434 = arith.andi %431, %433 : vector<1x256xi1>
    %cst_97 = arith.constant 0.000000e+00 : f32
    %435 = vector.shape_cast %434 : vector<1x256xi1> to vector<1x256xi1>
    %436 = vector.broadcast %435 : vector<1x256xi1> to vector<2x256xi1>
    %437 = vector.broadcast %cst_97 : f32 to vector<2x256xf32>
    %438 = arith.select %436, %429, %437 : vector<2x256xi1>, vector<2x256xf32>
    %439 = arith.addf %363, %438 : vector<2x256xf32>
    %c1_i32_98 = arith.constant 1 : i32
    %440 = tpu.dynamic_rotate %3 by %c1_i32_98 dim 1 : vector<2x256xf32>, i32 -> vector<2x256xf32>
    %c1_i32_99 = arith.constant 1 : i32
    %441 = tpu.dynamic_rotate %4 by %c1_i32_99 dim 1 : vector<2x256xf32>, i32 -> vector<2x256xf32>
    %c23 = arith.constant 23 : index
    %442 = memref.load %arg1[%c23] : memref<98xf32, #tpu.memory_space<smem>>
    %c72 = arith.constant 72 : index
    %443 = memref.load %arg1[%c72] : memref<98xf32, #tpu.memory_space<smem>>
    %444 = vector.broadcast %442 : f32 to vector<2x256xf32>
    %445 = arith.mulf %444, %440 : vector<2x256xf32>
    %446 = vector.broadcast %443 : f32 to vector<2x256xf32>
    %447 = arith.mulf %446, %441 : vector<2x256xf32>
    %448 = arith.addf %445, %447 : vector<2x256xf32>
    %c1_i32_100 = arith.constant 1 : i32
    %449 = vector.broadcast %c1_i32_100 : i32 to vector<1x256xi32>
    %450 = arith.cmpi sge, %7, %449 : vector<1x256xi32>
    %c1_i32_101 = arith.constant 1 : i32
    %451 = vector.broadcast %c1_i32_101 : i32 to vector<1x256xi32>
    %452 = arith.cmpi sge, %5, %451 : vector<1x256xi32>
    %453 = arith.andi %450, %452 : vector<1x256xi1>
    %cst_102 = arith.constant 0.000000e+00 : f32
    %454 = vector.shape_cast %453 : vector<1x256xi1> to vector<1x256xi1>
    %455 = vector.broadcast %454 : vector<1x256xi1> to vector<2x256xi1>
    %456 = vector.broadcast %cst_102 : f32 to vector<2x256xf32>
    %457 = arith.select %455, %448, %456 : vector<2x256xi1>, vector<2x256xf32>
    %458 = arith.addf %382, %457 : vector<2x256xf32>
    %c24 = arith.constant 24 : index
    %459 = memref.load %arg1[%c24] : memref<98xf32, #tpu.memory_space<smem>>
    %c73 = arith.constant 73 : index
    %460 = memref.load %arg1[%c73] : memref<98xf32, #tpu.memory_space<smem>>
    %461 = vector.broadcast %459 : f32 to vector<2x256xf32>
    %462 = arith.mulf %461, %3 : vector<2x256xf32>
    %463 = vector.broadcast %460 : f32 to vector<2x256xf32>
    %464 = arith.mulf %463, %4 : vector<2x256xf32>
    %465 = arith.addf %462, %464 : vector<2x256xf32>
    %466 = arith.addf %401, %465 : vector<2x256xf32>
    %c255_i32 = arith.constant 255 : i32
    %467 = tpu.dynamic_rotate %3 by %c255_i32 dim 1 : vector<2x256xf32>, i32 -> vector<2x256xf32>
    %c255_i32_103 = arith.constant 255 : i32
    %468 = tpu.dynamic_rotate %4 by %c255_i32_103 dim 1 : vector<2x256xf32>, i32 -> vector<2x256xf32>
    %c25 = arith.constant 25 : index
    %469 = memref.load %arg1[%c25] : memref<98xf32, #tpu.memory_space<smem>>
    %c74 = arith.constant 74 : index
    %470 = memref.load %arg1[%c74] : memref<98xf32, #tpu.memory_space<smem>>
    %471 = vector.broadcast %469 : f32 to vector<2x256xf32>
    %472 = arith.mulf %471, %467 : vector<2x256xf32>
    %473 = vector.broadcast %470 : f32 to vector<2x256xf32>
    %474 = arith.mulf %473, %468 : vector<2x256xf32>
    %475 = arith.addf %472, %474 : vector<2x256xf32>
    %c15_i32_104 = arith.constant 15 : i32
    %476 = vector.broadcast %c15_i32_104 : i32 to vector<1x256xi32>
    %477 = arith.cmpi slt, %7, %476 : vector<1x256xi32>
    %c255_i32_105 = arith.constant 255 : i32
    %478 = vector.broadcast %c255_i32_105 : i32 to vector<1x256xi32>
    %479 = arith.cmpi slt, %5, %478 : vector<1x256xi32>
    %480 = arith.andi %477, %479 : vector<1x256xi1>
    %cst_106 = arith.constant 0.000000e+00 : f32
    %481 = vector.shape_cast %480 : vector<1x256xi1> to vector<1x256xi1>
    %482 = vector.broadcast %481 : vector<1x256xi1> to vector<2x256xi1>
    %483 = vector.broadcast %cst_106 : f32 to vector<2x256xf32>
    %484 = arith.select %482, %475, %483 : vector<2x256xi1>, vector<2x256xf32>
    %485 = arith.addf %420, %484 : vector<2x256xf32>
    %c254_i32 = arith.constant 254 : i32
    %486 = tpu.dynamic_rotate %3 by %c254_i32 dim 1 : vector<2x256xf32>, i32 -> vector<2x256xf32>
    %c254_i32_107 = arith.constant 254 : i32
    %487 = tpu.dynamic_rotate %4 by %c254_i32_107 dim 1 : vector<2x256xf32>, i32 -> vector<2x256xf32>
    %c26 = arith.constant 26 : index
    %488 = memref.load %arg1[%c26] : memref<98xf32, #tpu.memory_space<smem>>
    %c75 = arith.constant 75 : index
    %489 = memref.load %arg1[%c75] : memref<98xf32, #tpu.memory_space<smem>>
    %490 = vector.broadcast %488 : f32 to vector<2x256xf32>
    %491 = arith.mulf %490, %486 : vector<2x256xf32>
    %492 = vector.broadcast %489 : f32 to vector<2x256xf32>
    %493 = arith.mulf %492, %487 : vector<2x256xf32>
    %494 = arith.addf %491, %493 : vector<2x256xf32>
    %c14_i32_108 = arith.constant 14 : i32
    %495 = vector.broadcast %c14_i32_108 : i32 to vector<1x256xi32>
    %496 = arith.cmpi slt, %7, %495 : vector<1x256xi32>
    %c254_i32_109 = arith.constant 254 : i32
    %497 = vector.broadcast %c254_i32_109 : i32 to vector<1x256xi32>
    %498 = arith.cmpi slt, %5, %497 : vector<1x256xi32>
    %499 = arith.andi %496, %498 : vector<1x256xi1>
    %cst_110 = arith.constant 0.000000e+00 : f32
    %500 = vector.shape_cast %499 : vector<1x256xi1> to vector<1x256xi1>
    %501 = vector.broadcast %500 : vector<1x256xi1> to vector<2x256xi1>
    %502 = vector.broadcast %cst_110 : f32 to vector<2x256xf32>
    %503 = arith.select %501, %494, %502 : vector<2x256xi1>, vector<2x256xf32>
    %504 = arith.addf %439, %503 : vector<2x256xf32>
    %c253_i32 = arith.constant 253 : i32
    %505 = tpu.dynamic_rotate %3 by %c253_i32 dim 1 : vector<2x256xf32>, i32 -> vector<2x256xf32>
    %c253_i32_111 = arith.constant 253 : i32
    %506 = tpu.dynamic_rotate %4 by %c253_i32_111 dim 1 : vector<2x256xf32>, i32 -> vector<2x256xf32>
    %c27 = arith.constant 27 : index
    %507 = memref.load %arg1[%c27] : memref<98xf32, #tpu.memory_space<smem>>
    %c76 = arith.constant 76 : index
    %508 = memref.load %arg1[%c76] : memref<98xf32, #tpu.memory_space<smem>>
    %509 = vector.broadcast %507 : f32 to vector<2x256xf32>
    %510 = arith.mulf %509, %505 : vector<2x256xf32>
    %511 = vector.broadcast %508 : f32 to vector<2x256xf32>
    %512 = arith.mulf %511, %506 : vector<2x256xf32>
    %513 = arith.addf %510, %512 : vector<2x256xf32>
    %c13_i32_112 = arith.constant 13 : i32
    %514 = vector.broadcast %c13_i32_112 : i32 to vector<1x256xi32>
    %515 = arith.cmpi slt, %7, %514 : vector<1x256xi32>
    %c253_i32_113 = arith.constant 253 : i32
    %516 = vector.broadcast %c253_i32_113 : i32 to vector<1x256xi32>
    %517 = arith.cmpi slt, %5, %516 : vector<1x256xi32>
    %518 = arith.andi %515, %517 : vector<1x256xi1>
    %cst_114 = arith.constant 0.000000e+00 : f32
    %519 = vector.shape_cast %518 : vector<1x256xi1> to vector<1x256xi1>
    %520 = vector.broadcast %519 : vector<1x256xi1> to vector<2x256xi1>
    %521 = vector.broadcast %cst_114 : f32 to vector<2x256xf32>
    %522 = arith.select %520, %513, %521 : vector<2x256xi1>, vector<2x256xf32>
    %523 = arith.addf %458, %522 : vector<2x256xf32>
    %c243_i32 = arith.constant 243 : i32
    %524 = tpu.dynamic_rotate %3 by %c243_i32 dim 1 : vector<2x256xf32>, i32 -> vector<2x256xf32>
    %c243_i32_115 = arith.constant 243 : i32
    %525 = tpu.dynamic_rotate %4 by %c243_i32_115 dim 1 : vector<2x256xf32>, i32 -> vector<2x256xf32>
    %c28 = arith.constant 28 : index
    %526 = memref.load %arg1[%c28] : memref<98xf32, #tpu.memory_space<smem>>
    %c77 = arith.constant 77 : index
    %527 = memref.load %arg1[%c77] : memref<98xf32, #tpu.memory_space<smem>>
    %528 = vector.broadcast %526 : f32 to vector<2x256xf32>
    %529 = arith.mulf %528, %524 : vector<2x256xf32>
    %530 = vector.broadcast %527 : f32 to vector<2x256xf32>
    %531 = arith.mulf %530, %525 : vector<2x256xf32>
    %532 = arith.addf %529, %531 : vector<2x256xf32>
    %c3_i32_116 = arith.constant 3 : i32
    %533 = vector.broadcast %c3_i32_116 : i32 to vector<1x256xi32>
    %534 = arith.cmpi sge, %7, %533 : vector<1x256xi32>
    %c243_i32_117 = arith.constant 243 : i32
    %535 = vector.broadcast %c243_i32_117 : i32 to vector<1x256xi32>
    %536 = arith.cmpi slt, %5, %535 : vector<1x256xi32>
    %537 = arith.andi %534, %536 : vector<1x256xi1>
    %cst_118 = arith.constant 0.000000e+00 : f32
    %538 = vector.shape_cast %537 : vector<1x256xi1> to vector<1x256xi1>
    %539 = vector.broadcast %538 : vector<1x256xi1> to vector<2x256xi1>
    %540 = vector.broadcast %cst_118 : f32 to vector<2x256xf32>
    %541 = arith.select %539, %532, %540 : vector<2x256xi1>, vector<2x256xf32>
    %542 = arith.addf %466, %541 : vector<2x256xf32>
    %c242_i32 = arith.constant 242 : i32
    %543 = tpu.dynamic_rotate %3 by %c242_i32 dim 1 : vector<2x256xf32>, i32 -> vector<2x256xf32>
    %c242_i32_119 = arith.constant 242 : i32
    %544 = tpu.dynamic_rotate %4 by %c242_i32_119 dim 1 : vector<2x256xf32>, i32 -> vector<2x256xf32>
    %c29 = arith.constant 29 : index
    %545 = memref.load %arg1[%c29] : memref<98xf32, #tpu.memory_space<smem>>
    %c78 = arith.constant 78 : index
    %546 = memref.load %arg1[%c78] : memref<98xf32, #tpu.memory_space<smem>>
    %547 = vector.broadcast %545 : f32 to vector<2x256xf32>
    %548 = arith.mulf %547, %543 : vector<2x256xf32>
    %549 = vector.broadcast %546 : f32 to vector<2x256xf32>
    %550 = arith.mulf %549, %544 : vector<2x256xf32>
    %551 = arith.addf %548, %550 : vector<2x256xf32>
    %c2_i32_120 = arith.constant 2 : i32
    %552 = vector.broadcast %c2_i32_120 : i32 to vector<1x256xi32>
    %553 = arith.cmpi sge, %7, %552 : vector<1x256xi32>
    %c242_i32_121 = arith.constant 242 : i32
    %554 = vector.broadcast %c242_i32_121 : i32 to vector<1x256xi32>
    %555 = arith.cmpi slt, %5, %554 : vector<1x256xi32>
    %556 = arith.andi %553, %555 : vector<1x256xi1>
    %cst_122 = arith.constant 0.000000e+00 : f32
    %557 = vector.shape_cast %556 : vector<1x256xi1> to vector<1x256xi1>
    %558 = vector.broadcast %557 : vector<1x256xi1> to vector<2x256xi1>
    %559 = vector.broadcast %cst_122 : f32 to vector<2x256xf32>
    %560 = arith.select %558, %551, %559 : vector<2x256xi1>, vector<2x256xf32>
    %561 = arith.addf %485, %560 : vector<2x256xf32>
    %c241_i32 = arith.constant 241 : i32
    %562 = tpu.dynamic_rotate %3 by %c241_i32 dim 1 : vector<2x256xf32>, i32 -> vector<2x256xf32>
    %c241_i32_123 = arith.constant 241 : i32
    %563 = tpu.dynamic_rotate %4 by %c241_i32_123 dim 1 : vector<2x256xf32>, i32 -> vector<2x256xf32>
    %c30 = arith.constant 30 : index
    %564 = memref.load %arg1[%c30] : memref<98xf32, #tpu.memory_space<smem>>
    %c79 = arith.constant 79 : index
    %565 = memref.load %arg1[%c79] : memref<98xf32, #tpu.memory_space<smem>>
    %566 = vector.broadcast %564 : f32 to vector<2x256xf32>
    %567 = arith.mulf %566, %562 : vector<2x256xf32>
    %568 = vector.broadcast %565 : f32 to vector<2x256xf32>
    %569 = arith.mulf %568, %563 : vector<2x256xf32>
    %570 = arith.addf %567, %569 : vector<2x256xf32>
    %c1_i32_124 = arith.constant 1 : i32
    %571 = vector.broadcast %c1_i32_124 : i32 to vector<1x256xi32>
    %572 = arith.cmpi sge, %7, %571 : vector<1x256xi32>
    %c241_i32_125 = arith.constant 241 : i32
    %573 = vector.broadcast %c241_i32_125 : i32 to vector<1x256xi32>
    %574 = arith.cmpi slt, %5, %573 : vector<1x256xi32>
    %575 = arith.andi %572, %574 : vector<1x256xi1>
    %cst_126 = arith.constant 0.000000e+00 : f32
    %576 = vector.shape_cast %575 : vector<1x256xi1> to vector<1x256xi1>
    %577 = vector.broadcast %576 : vector<1x256xi1> to vector<2x256xi1>
    %578 = vector.broadcast %cst_126 : f32 to vector<2x256xf32>
    %579 = arith.select %577, %570, %578 : vector<2x256xi1>, vector<2x256xf32>
    %580 = arith.addf %504, %579 : vector<2x256xf32>
    %c240_i32 = arith.constant 240 : i32
    %581 = tpu.dynamic_rotate %3 by %c240_i32 dim 1 : vector<2x256xf32>, i32 -> vector<2x256xf32>
    %c240_i32_127 = arith.constant 240 : i32
    %582 = tpu.dynamic_rotate %4 by %c240_i32_127 dim 1 : vector<2x256xf32>, i32 -> vector<2x256xf32>
    %c31 = arith.constant 31 : index
    %583 = memref.load %arg1[%c31] : memref<98xf32, #tpu.memory_space<smem>>
    %c80 = arith.constant 80 : index
    %584 = memref.load %arg1[%c80] : memref<98xf32, #tpu.memory_space<smem>>
    %585 = vector.broadcast %583 : f32 to vector<2x256xf32>
    %586 = arith.mulf %585, %581 : vector<2x256xf32>
    %587 = vector.broadcast %584 : f32 to vector<2x256xf32>
    %588 = arith.mulf %587, %582 : vector<2x256xf32>
    %589 = arith.addf %586, %588 : vector<2x256xf32>
    %c240_i32_128 = arith.constant 240 : i32
    %590 = vector.broadcast %c240_i32_128 : i32 to vector<1x256xi32>
    %591 = arith.cmpi slt, %5, %590 : vector<1x256xi32>
    %cst_129 = arith.constant 0.000000e+00 : f32
    %592 = vector.shape_cast %591 : vector<1x256xi1> to vector<1x256xi1>
    %593 = vector.broadcast %592 : vector<1x256xi1> to vector<2x256xi1>
    %594 = vector.broadcast %cst_129 : f32 to vector<2x256xf32>
    %595 = arith.select %593, %589, %594 : vector<2x256xi1>, vector<2x256xf32>
    %596 = arith.addf %523, %595 : vector<2x256xf32>
    %c239_i32 = arith.constant 239 : i32
    %597 = tpu.dynamic_rotate %3 by %c239_i32 dim 1 : vector<2x256xf32>, i32 -> vector<2x256xf32>
    %c239_i32_130 = arith.constant 239 : i32
    %598 = tpu.dynamic_rotate %4 by %c239_i32_130 dim 1 : vector<2x256xf32>, i32 -> vector<2x256xf32>
    %c32 = arith.constant 32 : index
    %599 = memref.load %arg1[%c32] : memref<98xf32, #tpu.memory_space<smem>>
    %c81 = arith.constant 81 : index
    %600 = memref.load %arg1[%c81] : memref<98xf32, #tpu.memory_space<smem>>
    %601 = vector.broadcast %599 : f32 to vector<2x256xf32>
    %602 = arith.mulf %601, %597 : vector<2x256xf32>
    %603 = vector.broadcast %600 : f32 to vector<2x256xf32>
    %604 = arith.mulf %603, %598 : vector<2x256xf32>
    %605 = arith.addf %602, %604 : vector<2x256xf32>
    %c15_i32_131 = arith.constant 15 : i32
    %606 = vector.broadcast %c15_i32_131 : i32 to vector<1x256xi32>
    %607 = arith.cmpi slt, %7, %606 : vector<1x256xi32>
    %c239_i32_132 = arith.constant 239 : i32
    %608 = vector.broadcast %c239_i32_132 : i32 to vector<1x256xi32>
    %609 = arith.cmpi slt, %5, %608 : vector<1x256xi32>
    %610 = arith.andi %607, %609 : vector<1x256xi1>
    %cst_133 = arith.constant 0.000000e+00 : f32
    %611 = vector.shape_cast %610 : vector<1x256xi1> to vector<1x256xi1>
    %612 = vector.broadcast %611 : vector<1x256xi1> to vector<2x256xi1>
    %613 = vector.broadcast %cst_133 : f32 to vector<2x256xf32>
    %614 = arith.select %612, %605, %613 : vector<2x256xi1>, vector<2x256xf32>
    %615 = arith.addf %542, %614 : vector<2x256xf32>
    %c238_i32 = arith.constant 238 : i32
    %616 = tpu.dynamic_rotate %3 by %c238_i32 dim 1 : vector<2x256xf32>, i32 -> vector<2x256xf32>
    %c238_i32_134 = arith.constant 238 : i32
    %617 = tpu.dynamic_rotate %4 by %c238_i32_134 dim 1 : vector<2x256xf32>, i32 -> vector<2x256xf32>
    %c33 = arith.constant 33 : index
    %618 = memref.load %arg1[%c33] : memref<98xf32, #tpu.memory_space<smem>>
    %c82 = arith.constant 82 : index
    %619 = memref.load %arg1[%c82] : memref<98xf32, #tpu.memory_space<smem>>
    %620 = vector.broadcast %618 : f32 to vector<2x256xf32>
    %621 = arith.mulf %620, %616 : vector<2x256xf32>
    %622 = vector.broadcast %619 : f32 to vector<2x256xf32>
    %623 = arith.mulf %622, %617 : vector<2x256xf32>
    %624 = arith.addf %621, %623 : vector<2x256xf32>
    %c14_i32_135 = arith.constant 14 : i32
    %625 = vector.broadcast %c14_i32_135 : i32 to vector<1x256xi32>
    %626 = arith.cmpi slt, %7, %625 : vector<1x256xi32>
    %c238_i32_136 = arith.constant 238 : i32
    %627 = vector.broadcast %c238_i32_136 : i32 to vector<1x256xi32>
    %628 = arith.cmpi slt, %5, %627 : vector<1x256xi32>
    %629 = arith.andi %626, %628 : vector<1x256xi1>
    %cst_137 = arith.constant 0.000000e+00 : f32
    %630 = vector.shape_cast %629 : vector<1x256xi1> to vector<1x256xi1>
    %631 = vector.broadcast %630 : vector<1x256xi1> to vector<2x256xi1>
    %632 = vector.broadcast %cst_137 : f32 to vector<2x256xf32>
    %633 = arith.select %631, %624, %632 : vector<2x256xi1>, vector<2x256xf32>
    %634 = arith.addf %561, %633 : vector<2x256xf32>
    %c237_i32 = arith.constant 237 : i32
    %635 = tpu.dynamic_rotate %3 by %c237_i32 dim 1 : vector<2x256xf32>, i32 -> vector<2x256xf32>
    %c237_i32_138 = arith.constant 237 : i32
    %636 = tpu.dynamic_rotate %4 by %c237_i32_138 dim 1 : vector<2x256xf32>, i32 -> vector<2x256xf32>
    %c34 = arith.constant 34 : index
    %637 = memref.load %arg1[%c34] : memref<98xf32, #tpu.memory_space<smem>>
    %c83 = arith.constant 83 : index
    %638 = memref.load %arg1[%c83] : memref<98xf32, #tpu.memory_space<smem>>
    %639 = vector.broadcast %637 : f32 to vector<2x256xf32>
    %640 = arith.mulf %639, %635 : vector<2x256xf32>
    %641 = vector.broadcast %638 : f32 to vector<2x256xf32>
    %642 = arith.mulf %641, %636 : vector<2x256xf32>
    %643 = arith.addf %640, %642 : vector<2x256xf32>
    %c13_i32_139 = arith.constant 13 : i32
    %644 = vector.broadcast %c13_i32_139 : i32 to vector<1x256xi32>
    %645 = arith.cmpi slt, %7, %644 : vector<1x256xi32>
    %c237_i32_140 = arith.constant 237 : i32
    %646 = vector.broadcast %c237_i32_140 : i32 to vector<1x256xi32>
    %647 = arith.cmpi slt, %5, %646 : vector<1x256xi32>
    %648 = arith.andi %645, %647 : vector<1x256xi1>
    %cst_141 = arith.constant 0.000000e+00 : f32
    %649 = vector.shape_cast %648 : vector<1x256xi1> to vector<1x256xi1>
    %650 = vector.broadcast %649 : vector<1x256xi1> to vector<2x256xi1>
    %651 = vector.broadcast %cst_141 : f32 to vector<2x256xf32>
    %652 = arith.select %650, %643, %651 : vector<2x256xi1>, vector<2x256xf32>
    %653 = arith.addf %580, %652 : vector<2x256xf32>
    %c227_i32 = arith.constant 227 : i32
    %654 = tpu.dynamic_rotate %3 by %c227_i32 dim 1 : vector<2x256xf32>, i32 -> vector<2x256xf32>
    %c227_i32_142 = arith.constant 227 : i32
    %655 = tpu.dynamic_rotate %4 by %c227_i32_142 dim 1 : vector<2x256xf32>, i32 -> vector<2x256xf32>
    %c35 = arith.constant 35 : index
    %656 = memref.load %arg1[%c35] : memref<98xf32, #tpu.memory_space<smem>>
    %c84 = arith.constant 84 : index
    %657 = memref.load %arg1[%c84] : memref<98xf32, #tpu.memory_space<smem>>
    %658 = vector.broadcast %656 : f32 to vector<2x256xf32>
    %659 = arith.mulf %658, %654 : vector<2x256xf32>
    %660 = vector.broadcast %657 : f32 to vector<2x256xf32>
    %661 = arith.mulf %660, %655 : vector<2x256xf32>
    %662 = arith.addf %659, %661 : vector<2x256xf32>
    %c3_i32_143 = arith.constant 3 : i32
    %663 = vector.broadcast %c3_i32_143 : i32 to vector<1x256xi32>
    %664 = arith.cmpi sge, %7, %663 : vector<1x256xi32>
    %c227_i32_144 = arith.constant 227 : i32
    %665 = vector.broadcast %c227_i32_144 : i32 to vector<1x256xi32>
    %666 = arith.cmpi slt, %5, %665 : vector<1x256xi32>
    %667 = arith.andi %664, %666 : vector<1x256xi1>
    %cst_145 = arith.constant 0.000000e+00 : f32
    %668 = vector.shape_cast %667 : vector<1x256xi1> to vector<1x256xi1>
    %669 = vector.broadcast %668 : vector<1x256xi1> to vector<2x256xi1>
    %670 = vector.broadcast %cst_145 : f32 to vector<2x256xf32>
    %671 = arith.select %669, %662, %670 : vector<2x256xi1>, vector<2x256xf32>
    %672 = arith.addf %596, %671 : vector<2x256xf32>
    %c226_i32 = arith.constant 226 : i32
    %673 = tpu.dynamic_rotate %3 by %c226_i32 dim 1 : vector<2x256xf32>, i32 -> vector<2x256xf32>
    %c226_i32_146 = arith.constant 226 : i32
    %674 = tpu.dynamic_rotate %4 by %c226_i32_146 dim 1 : vector<2x256xf32>, i32 -> vector<2x256xf32>
    %c36 = arith.constant 36 : index
    %675 = memref.load %arg1[%c36] : memref<98xf32, #tpu.memory_space<smem>>
    %c85 = arith.constant 85 : index
    %676 = memref.load %arg1[%c85] : memref<98xf32, #tpu.memory_space<smem>>
    %677 = vector.broadcast %675 : f32 to vector<2x256xf32>
    %678 = arith.mulf %677, %673 : vector<2x256xf32>
    %679 = vector.broadcast %676 : f32 to vector<2x256xf32>
    %680 = arith.mulf %679, %674 : vector<2x256xf32>
    %681 = arith.addf %678, %680 : vector<2x256xf32>
    %c2_i32_147 = arith.constant 2 : i32
    %682 = vector.broadcast %c2_i32_147 : i32 to vector<1x256xi32>
    %683 = arith.cmpi sge, %7, %682 : vector<1x256xi32>
    %c226_i32_148 = arith.constant 226 : i32
    %684 = vector.broadcast %c226_i32_148 : i32 to vector<1x256xi32>
    %685 = arith.cmpi slt, %5, %684 : vector<1x256xi32>
    %686 = arith.andi %683, %685 : vector<1x256xi1>
    %cst_149 = arith.constant 0.000000e+00 : f32
    %687 = vector.shape_cast %686 : vector<1x256xi1> to vector<1x256xi1>
    %688 = vector.broadcast %687 : vector<1x256xi1> to vector<2x256xi1>
    %689 = vector.broadcast %cst_149 : f32 to vector<2x256xf32>
    %690 = arith.select %688, %681, %689 : vector<2x256xi1>, vector<2x256xf32>
    %691 = arith.addf %615, %690 : vector<2x256xf32>
    %c225_i32 = arith.constant 225 : i32
    %692 = tpu.dynamic_rotate %3 by %c225_i32 dim 1 : vector<2x256xf32>, i32 -> vector<2x256xf32>
    %c225_i32_150 = arith.constant 225 : i32
    %693 = tpu.dynamic_rotate %4 by %c225_i32_150 dim 1 : vector<2x256xf32>, i32 -> vector<2x256xf32>
    %c37 = arith.constant 37 : index
    %694 = memref.load %arg1[%c37] : memref<98xf32, #tpu.memory_space<smem>>
    %c86 = arith.constant 86 : index
    %695 = memref.load %arg1[%c86] : memref<98xf32, #tpu.memory_space<smem>>
    %696 = vector.broadcast %694 : f32 to vector<2x256xf32>
    %697 = arith.mulf %696, %692 : vector<2x256xf32>
    %698 = vector.broadcast %695 : f32 to vector<2x256xf32>
    %699 = arith.mulf %698, %693 : vector<2x256xf32>
    %700 = arith.addf %697, %699 : vector<2x256xf32>
    %c1_i32_151 = arith.constant 1 : i32
    %701 = vector.broadcast %c1_i32_151 : i32 to vector<1x256xi32>
    %702 = arith.cmpi sge, %7, %701 : vector<1x256xi32>
    %c225_i32_152 = arith.constant 225 : i32
    %703 = vector.broadcast %c225_i32_152 : i32 to vector<1x256xi32>
    %704 = arith.cmpi slt, %5, %703 : vector<1x256xi32>
    %705 = arith.andi %702, %704 : vector<1x256xi1>
    %cst_153 = arith.constant 0.000000e+00 : f32
    %706 = vector.shape_cast %705 : vector<1x256xi1> to vector<1x256xi1>
    %707 = vector.broadcast %706 : vector<1x256xi1> to vector<2x256xi1>
    %708 = vector.broadcast %cst_153 : f32 to vector<2x256xf32>
    %709 = arith.select %707, %700, %708 : vector<2x256xi1>, vector<2x256xf32>
    %710 = arith.addf %634, %709 : vector<2x256xf32>
    %c224_i32 = arith.constant 224 : i32
    %711 = tpu.dynamic_rotate %3 by %c224_i32 dim 1 : vector<2x256xf32>, i32 -> vector<2x256xf32>
    %c224_i32_154 = arith.constant 224 : i32
    %712 = tpu.dynamic_rotate %4 by %c224_i32_154 dim 1 : vector<2x256xf32>, i32 -> vector<2x256xf32>
    %c38 = arith.constant 38 : index
    %713 = memref.load %arg1[%c38] : memref<98xf32, #tpu.memory_space<smem>>
    %c87 = arith.constant 87 : index
    %714 = memref.load %arg1[%c87] : memref<98xf32, #tpu.memory_space<smem>>
    %715 = vector.broadcast %713 : f32 to vector<2x256xf32>
    %716 = arith.mulf %715, %711 : vector<2x256xf32>
    %717 = vector.broadcast %714 : f32 to vector<2x256xf32>
    %718 = arith.mulf %717, %712 : vector<2x256xf32>
    %719 = arith.addf %716, %718 : vector<2x256xf32>
    %c224_i32_155 = arith.constant 224 : i32
    %720 = vector.broadcast %c224_i32_155 : i32 to vector<1x256xi32>
    %721 = arith.cmpi slt, %5, %720 : vector<1x256xi32>
    %cst_156 = arith.constant 0.000000e+00 : f32
    %722 = vector.shape_cast %721 : vector<1x256xi1> to vector<1x256xi1>
    %723 = vector.broadcast %722 : vector<1x256xi1> to vector<2x256xi1>
    %724 = vector.broadcast %cst_156 : f32 to vector<2x256xf32>
    %725 = arith.select %723, %719, %724 : vector<2x256xi1>, vector<2x256xf32>
    %726 = arith.addf %653, %725 : vector<2x256xf32>
    %c223_i32 = arith.constant 223 : i32
    %727 = tpu.dynamic_rotate %3 by %c223_i32 dim 1 : vector<2x256xf32>, i32 -> vector<2x256xf32>
    %c223_i32_157 = arith.constant 223 : i32
    %728 = tpu.dynamic_rotate %4 by %c223_i32_157 dim 1 : vector<2x256xf32>, i32 -> vector<2x256xf32>
    %c39 = arith.constant 39 : index
    %729 = memref.load %arg1[%c39] : memref<98xf32, #tpu.memory_space<smem>>
    %c88 = arith.constant 88 : index
    %730 = memref.load %arg1[%c88] : memref<98xf32, #tpu.memory_space<smem>>
    %731 = vector.broadcast %729 : f32 to vector<2x256xf32>
    %732 = arith.mulf %731, %727 : vector<2x256xf32>
    %733 = vector.broadcast %730 : f32 to vector<2x256xf32>
    %734 = arith.mulf %733, %728 : vector<2x256xf32>
    %735 = arith.addf %732, %734 : vector<2x256xf32>
    %c15_i32_158 = arith.constant 15 : i32
    %736 = vector.broadcast %c15_i32_158 : i32 to vector<1x256xi32>
    %737 = arith.cmpi slt, %7, %736 : vector<1x256xi32>
    %c223_i32_159 = arith.constant 223 : i32
    %738 = vector.broadcast %c223_i32_159 : i32 to vector<1x256xi32>
    %739 = arith.cmpi slt, %5, %738 : vector<1x256xi32>
    %740 = arith.andi %737, %739 : vector<1x256xi1>
    %cst_160 = arith.constant 0.000000e+00 : f32
    %741 = vector.shape_cast %740 : vector<1x256xi1> to vector<1x256xi1>
    %742 = vector.broadcast %741 : vector<1x256xi1> to vector<2x256xi1>
    %743 = vector.broadcast %cst_160 : f32 to vector<2x256xf32>
    %744 = arith.select %742, %735, %743 : vector<2x256xi1>, vector<2x256xf32>
    %745 = arith.addf %672, %744 : vector<2x256xf32>
    %c222_i32 = arith.constant 222 : i32
    %746 = tpu.dynamic_rotate %3 by %c222_i32 dim 1 : vector<2x256xf32>, i32 -> vector<2x256xf32>
    %c222_i32_161 = arith.constant 222 : i32
    %747 = tpu.dynamic_rotate %4 by %c222_i32_161 dim 1 : vector<2x256xf32>, i32 -> vector<2x256xf32>
    %c40 = arith.constant 40 : index
    %748 = memref.load %arg1[%c40] : memref<98xf32, #tpu.memory_space<smem>>
    %c89 = arith.constant 89 : index
    %749 = memref.load %arg1[%c89] : memref<98xf32, #tpu.memory_space<smem>>
    %750 = vector.broadcast %748 : f32 to vector<2x256xf32>
    %751 = arith.mulf %750, %746 : vector<2x256xf32>
    %752 = vector.broadcast %749 : f32 to vector<2x256xf32>
    %753 = arith.mulf %752, %747 : vector<2x256xf32>
    %754 = arith.addf %751, %753 : vector<2x256xf32>
    %c14_i32_162 = arith.constant 14 : i32
    %755 = vector.broadcast %c14_i32_162 : i32 to vector<1x256xi32>
    %756 = arith.cmpi slt, %7, %755 : vector<1x256xi32>
    %c222_i32_163 = arith.constant 222 : i32
    %757 = vector.broadcast %c222_i32_163 : i32 to vector<1x256xi32>
    %758 = arith.cmpi slt, %5, %757 : vector<1x256xi32>
    %759 = arith.andi %756, %758 : vector<1x256xi1>
    %cst_164 = arith.constant 0.000000e+00 : f32
    %760 = vector.shape_cast %759 : vector<1x256xi1> to vector<1x256xi1>
    %761 = vector.broadcast %760 : vector<1x256xi1> to vector<2x256xi1>
    %762 = vector.broadcast %cst_164 : f32 to vector<2x256xf32>
    %763 = arith.select %761, %754, %762 : vector<2x256xi1>, vector<2x256xf32>
    %764 = arith.addf %691, %763 : vector<2x256xf32>
    %c221_i32 = arith.constant 221 : i32
    %765 = tpu.dynamic_rotate %3 by %c221_i32 dim 1 : vector<2x256xf32>, i32 -> vector<2x256xf32>
    %c221_i32_165 = arith.constant 221 : i32
    %766 = tpu.dynamic_rotate %4 by %c221_i32_165 dim 1 : vector<2x256xf32>, i32 -> vector<2x256xf32>
    %c41 = arith.constant 41 : index
    %767 = memref.load %arg1[%c41] : memref<98xf32, #tpu.memory_space<smem>>
    %c90 = arith.constant 90 : index
    %768 = memref.load %arg1[%c90] : memref<98xf32, #tpu.memory_space<smem>>
    %769 = vector.broadcast %767 : f32 to vector<2x256xf32>
    %770 = arith.mulf %769, %765 : vector<2x256xf32>
    %771 = vector.broadcast %768 : f32 to vector<2x256xf32>
    %772 = arith.mulf %771, %766 : vector<2x256xf32>
    %773 = arith.addf %770, %772 : vector<2x256xf32>
    %c13_i32_166 = arith.constant 13 : i32
    %774 = vector.broadcast %c13_i32_166 : i32 to vector<1x256xi32>
    %775 = arith.cmpi slt, %7, %774 : vector<1x256xi32>
    %c221_i32_167 = arith.constant 221 : i32
    %776 = vector.broadcast %c221_i32_167 : i32 to vector<1x256xi32>
    %777 = arith.cmpi slt, %5, %776 : vector<1x256xi32>
    %778 = arith.andi %775, %777 : vector<1x256xi1>
    %cst_168 = arith.constant 0.000000e+00 : f32
    %779 = vector.shape_cast %778 : vector<1x256xi1> to vector<1x256xi1>
    %780 = vector.broadcast %779 : vector<1x256xi1> to vector<2x256xi1>
    %781 = vector.broadcast %cst_168 : f32 to vector<2x256xf32>
    %782 = arith.select %780, %773, %781 : vector<2x256xi1>, vector<2x256xf32>
    %783 = arith.addf %710, %782 : vector<2x256xf32>
    %c211_i32 = arith.constant 211 : i32
    %784 = tpu.dynamic_rotate %3 by %c211_i32 dim 1 : vector<2x256xf32>, i32 -> vector<2x256xf32>
    %c211_i32_169 = arith.constant 211 : i32
    %785 = tpu.dynamic_rotate %4 by %c211_i32_169 dim 1 : vector<2x256xf32>, i32 -> vector<2x256xf32>
    %c42 = arith.constant 42 : index
    %786 = memref.load %arg1[%c42] : memref<98xf32, #tpu.memory_space<smem>>
    %c91 = arith.constant 91 : index
    %787 = memref.load %arg1[%c91] : memref<98xf32, #tpu.memory_space<smem>>
    %788 = vector.broadcast %786 : f32 to vector<2x256xf32>
    %789 = arith.mulf %788, %784 : vector<2x256xf32>
    %790 = vector.broadcast %787 : f32 to vector<2x256xf32>
    %791 = arith.mulf %790, %785 : vector<2x256xf32>
    %792 = arith.addf %789, %791 : vector<2x256xf32>
    %c3_i32_170 = arith.constant 3 : i32
    %793 = vector.broadcast %c3_i32_170 : i32 to vector<1x256xi32>
    %794 = arith.cmpi sge, %7, %793 : vector<1x256xi32>
    %c211_i32_171 = arith.constant 211 : i32
    %795 = vector.broadcast %c211_i32_171 : i32 to vector<1x256xi32>
    %796 = arith.cmpi slt, %5, %795 : vector<1x256xi32>
    %797 = arith.andi %794, %796 : vector<1x256xi1>
    %cst_172 = arith.constant 0.000000e+00 : f32
    %798 = vector.shape_cast %797 : vector<1x256xi1> to vector<1x256xi1>
    %799 = vector.broadcast %798 : vector<1x256xi1> to vector<2x256xi1>
    %800 = vector.broadcast %cst_172 : f32 to vector<2x256xf32>
    %801 = arith.select %799, %792, %800 : vector<2x256xi1>, vector<2x256xf32>
    %802 = arith.addf %726, %801 : vector<2x256xf32>
    %c210_i32 = arith.constant 210 : i32
    %803 = tpu.dynamic_rotate %3 by %c210_i32 dim 1 : vector<2x256xf32>, i32 -> vector<2x256xf32>
    %c210_i32_173 = arith.constant 210 : i32
    %804 = tpu.dynamic_rotate %4 by %c210_i32_173 dim 1 : vector<2x256xf32>, i32 -> vector<2x256xf32>
    %c43 = arith.constant 43 : index
    %805 = memref.load %arg1[%c43] : memref<98xf32, #tpu.memory_space<smem>>
    %c92 = arith.constant 92 : index
    %806 = memref.load %arg1[%c92] : memref<98xf32, #tpu.memory_space<smem>>
    %807 = vector.broadcast %805 : f32 to vector<2x256xf32>
    %808 = arith.mulf %807, %803 : vector<2x256xf32>
    %809 = vector.broadcast %806 : f32 to vector<2x256xf32>
    %810 = arith.mulf %809, %804 : vector<2x256xf32>
    %811 = arith.addf %808, %810 : vector<2x256xf32>
    %c2_i32_174 = arith.constant 2 : i32
    %812 = vector.broadcast %c2_i32_174 : i32 to vector<1x256xi32>
    %813 = arith.cmpi sge, %7, %812 : vector<1x256xi32>
    %c210_i32_175 = arith.constant 210 : i32
    %814 = vector.broadcast %c210_i32_175 : i32 to vector<1x256xi32>
    %815 = arith.cmpi slt, %5, %814 : vector<1x256xi32>
    %816 = arith.andi %813, %815 : vector<1x256xi1>
    %cst_176 = arith.constant 0.000000e+00 : f32
    %817 = vector.shape_cast %816 : vector<1x256xi1> to vector<1x256xi1>
    %818 = vector.broadcast %817 : vector<1x256xi1> to vector<2x256xi1>
    %819 = vector.broadcast %cst_176 : f32 to vector<2x256xf32>
    %820 = arith.select %818, %811, %819 : vector<2x256xi1>, vector<2x256xf32>
    %821 = arith.addf %745, %820 : vector<2x256xf32>
    %c209_i32 = arith.constant 209 : i32
    %822 = tpu.dynamic_rotate %3 by %c209_i32 dim 1 : vector<2x256xf32>, i32 -> vector<2x256xf32>
    %c209_i32_177 = arith.constant 209 : i32
    %823 = tpu.dynamic_rotate %4 by %c209_i32_177 dim 1 : vector<2x256xf32>, i32 -> vector<2x256xf32>
    %c44 = arith.constant 44 : index
    %824 = memref.load %arg1[%c44] : memref<98xf32, #tpu.memory_space<smem>>
    %c93 = arith.constant 93 : index
    %825 = memref.load %arg1[%c93] : memref<98xf32, #tpu.memory_space<smem>>
    %826 = vector.broadcast %824 : f32 to vector<2x256xf32>
    %827 = arith.mulf %826, %822 : vector<2x256xf32>
    %828 = vector.broadcast %825 : f32 to vector<2x256xf32>
    %829 = arith.mulf %828, %823 : vector<2x256xf32>
    %830 = arith.addf %827, %829 : vector<2x256xf32>
    %c1_i32_178 = arith.constant 1 : i32
    %831 = vector.broadcast %c1_i32_178 : i32 to vector<1x256xi32>
    %832 = arith.cmpi sge, %7, %831 : vector<1x256xi32>
    %c209_i32_179 = arith.constant 209 : i32
    %833 = vector.broadcast %c209_i32_179 : i32 to vector<1x256xi32>
    %834 = arith.cmpi slt, %5, %833 : vector<1x256xi32>
    %835 = arith.andi %832, %834 : vector<1x256xi1>
    %cst_180 = arith.constant 0.000000e+00 : f32
    %836 = vector.shape_cast %835 : vector<1x256xi1> to vector<1x256xi1>
    %837 = vector.broadcast %836 : vector<1x256xi1> to vector<2x256xi1>
    %838 = vector.broadcast %cst_180 : f32 to vector<2x256xf32>
    %839 = arith.select %837, %830, %838 : vector<2x256xi1>, vector<2x256xf32>
    %840 = arith.addf %764, %839 : vector<2x256xf32>
    %c208_i32 = arith.constant 208 : i32
    %841 = tpu.dynamic_rotate %3 by %c208_i32 dim 1 : vector<2x256xf32>, i32 -> vector<2x256xf32>
    %c208_i32_181 = arith.constant 208 : i32
    %842 = tpu.dynamic_rotate %4 by %c208_i32_181 dim 1 : vector<2x256xf32>, i32 -> vector<2x256xf32>
    %c45 = arith.constant 45 : index
    %843 = memref.load %arg1[%c45] : memref<98xf32, #tpu.memory_space<smem>>
    %c94 = arith.constant 94 : index
    %844 = memref.load %arg1[%c94] : memref<98xf32, #tpu.memory_space<smem>>
    %845 = vector.broadcast %843 : f32 to vector<2x256xf32>
    %846 = arith.mulf %845, %841 : vector<2x256xf32>
    %847 = vector.broadcast %844 : f32 to vector<2x256xf32>
    %848 = arith.mulf %847, %842 : vector<2x256xf32>
    %849 = arith.addf %846, %848 : vector<2x256xf32>
    %c208_i32_182 = arith.constant 208 : i32
    %850 = vector.broadcast %c208_i32_182 : i32 to vector<1x256xi32>
    %851 = arith.cmpi slt, %5, %850 : vector<1x256xi32>
    %cst_183 = arith.constant 0.000000e+00 : f32
    %852 = vector.shape_cast %851 : vector<1x256xi1> to vector<1x256xi1>
    %853 = vector.broadcast %852 : vector<1x256xi1> to vector<2x256xi1>
    %854 = vector.broadcast %cst_183 : f32 to vector<2x256xf32>
    %855 = arith.select %853, %849, %854 : vector<2x256xi1>, vector<2x256xf32>
    %856 = arith.addf %783, %855 : vector<2x256xf32>
    %c207_i32 = arith.constant 207 : i32
    %857 = tpu.dynamic_rotate %3 by %c207_i32 dim 1 : vector<2x256xf32>, i32 -> vector<2x256xf32>
    %c207_i32_184 = arith.constant 207 : i32
    %858 = tpu.dynamic_rotate %4 by %c207_i32_184 dim 1 : vector<2x256xf32>, i32 -> vector<2x256xf32>
    %c46 = arith.constant 46 : index
    %859 = memref.load %arg1[%c46] : memref<98xf32, #tpu.memory_space<smem>>
    %c95 = arith.constant 95 : index
    %860 = memref.load %arg1[%c95] : memref<98xf32, #tpu.memory_space<smem>>
    %861 = vector.broadcast %859 : f32 to vector<2x256xf32>
    %862 = arith.mulf %861, %857 : vector<2x256xf32>
    %863 = vector.broadcast %860 : f32 to vector<2x256xf32>
    %864 = arith.mulf %863, %858 : vector<2x256xf32>
    %865 = arith.addf %862, %864 : vector<2x256xf32>
    %c15_i32_185 = arith.constant 15 : i32
    %866 = vector.broadcast %c15_i32_185 : i32 to vector<1x256xi32>
    %867 = arith.cmpi slt, %7, %866 : vector<1x256xi32>
    %c207_i32_186 = arith.constant 207 : i32
    %868 = vector.broadcast %c207_i32_186 : i32 to vector<1x256xi32>
    %869 = arith.cmpi slt, %5, %868 : vector<1x256xi32>
    %870 = arith.andi %867, %869 : vector<1x256xi1>
    %cst_187 = arith.constant 0.000000e+00 : f32
    %871 = vector.shape_cast %870 : vector<1x256xi1> to vector<1x256xi1>
    %872 = vector.broadcast %871 : vector<1x256xi1> to vector<2x256xi1>
    %873 = vector.broadcast %cst_187 : f32 to vector<2x256xf32>
    %874 = arith.select %872, %865, %873 : vector<2x256xi1>, vector<2x256xf32>
    %875 = arith.addf %802, %874 : vector<2x256xf32>
    %c206_i32 = arith.constant 206 : i32
    %876 = tpu.dynamic_rotate %3 by %c206_i32 dim 1 : vector<2x256xf32>, i32 -> vector<2x256xf32>
    %c206_i32_188 = arith.constant 206 : i32
    %877 = tpu.dynamic_rotate %4 by %c206_i32_188 dim 1 : vector<2x256xf32>, i32 -> vector<2x256xf32>
    %c47 = arith.constant 47 : index
    %878 = memref.load %arg1[%c47] : memref<98xf32, #tpu.memory_space<smem>>
    %c96 = arith.constant 96 : index
    %879 = memref.load %arg1[%c96] : memref<98xf32, #tpu.memory_space<smem>>
    %880 = vector.broadcast %878 : f32 to vector<2x256xf32>
    %881 = arith.mulf %880, %876 : vector<2x256xf32>
    %882 = vector.broadcast %879 : f32 to vector<2x256xf32>
    %883 = arith.mulf %882, %877 : vector<2x256xf32>
    %884 = arith.addf %881, %883 : vector<2x256xf32>
    %c14_i32_189 = arith.constant 14 : i32
    %885 = vector.broadcast %c14_i32_189 : i32 to vector<1x256xi32>
    %886 = arith.cmpi slt, %7, %885 : vector<1x256xi32>
    %c206_i32_190 = arith.constant 206 : i32
    %887 = vector.broadcast %c206_i32_190 : i32 to vector<1x256xi32>
    %888 = arith.cmpi slt, %5, %887 : vector<1x256xi32>
    %889 = arith.andi %886, %888 : vector<1x256xi1>
    %cst_191 = arith.constant 0.000000e+00 : f32
    %890 = vector.shape_cast %889 : vector<1x256xi1> to vector<1x256xi1>
    %891 = vector.broadcast %890 : vector<1x256xi1> to vector<2x256xi1>
    %892 = vector.broadcast %cst_191 : f32 to vector<2x256xf32>
    %893 = arith.select %891, %884, %892 : vector<2x256xi1>, vector<2x256xf32>
    %894 = arith.addf %821, %893 : vector<2x256xf32>
    %c205_i32 = arith.constant 205 : i32
    %895 = tpu.dynamic_rotate %3 by %c205_i32 dim 1 : vector<2x256xf32>, i32 -> vector<2x256xf32>
    %c205_i32_192 = arith.constant 205 : i32
    %896 = tpu.dynamic_rotate %4 by %c205_i32_192 dim 1 : vector<2x256xf32>, i32 -> vector<2x256xf32>
    %c48 = arith.constant 48 : index
    %897 = memref.load %arg1[%c48] : memref<98xf32, #tpu.memory_space<smem>>
    %c97 = arith.constant 97 : index
    %898 = memref.load %arg1[%c97] : memref<98xf32, #tpu.memory_space<smem>>
    %899 = vector.broadcast %897 : f32 to vector<2x256xf32>
    %900 = arith.mulf %899, %895 : vector<2x256xf32>
    %901 = vector.broadcast %898 : f32 to vector<2x256xf32>
    %902 = arith.mulf %901, %896 : vector<2x256xf32>
    %903 = arith.addf %900, %902 : vector<2x256xf32>
    %c13_i32_193 = arith.constant 13 : i32
    %904 = vector.broadcast %c13_i32_193 : i32 to vector<1x256xi32>
    %905 = arith.cmpi slt, %7, %904 : vector<1x256xi32>
    %c205_i32_194 = arith.constant 205 : i32
    %906 = vector.broadcast %c205_i32_194 : i32 to vector<1x256xi32>
    %907 = arith.cmpi slt, %5, %906 : vector<1x256xi32>
    %908 = arith.andi %905, %907 : vector<1x256xi1>
    %cst_195 = arith.constant 0.000000e+00 : f32
    %909 = vector.shape_cast %908 : vector<1x256xi1> to vector<1x256xi1>
    %910 = vector.broadcast %909 : vector<1x256xi1> to vector<2x256xi1>
    %911 = vector.broadcast %cst_195 : f32 to vector<2x256xf32>
    %912 = arith.select %910, %903, %911 : vector<2x256xi1>, vector<2x256xf32>
    %913 = arith.addf %840, %912 : vector<2x256xf32>
    %914 = arith.addf %913, %856 : vector<2x256xf32>
    %915 = arith.addf %875, %894 : vector<2x256xf32>
    %916 = arith.addf %914, %915 : vector<2x256xf32>
    %917 = arith.negf %916 : vector<2x256xf32>
    %918 = math.exp %917 : vector<2x256xf32>
    %cst_196 = arith.constant 1.000000e+00 : f32
    %919 = vector.broadcast %cst_196 : f32 to vector<2x256xf32>
    %920 = arith.addf %919, %918 : vector<2x256xf32>
    %921 = arith.divf %919, %920 : vector<2x256xf32>
    %922 = vector.shape_cast %921 : vector<2x256xf32> to vector<2x1x256xf32>
    %923 = vector.broadcast %922 : vector<2x1x256xf32> to vector<2x4x256xf32>
    %924 = arith.mulf %0, %923 : vector<2x4x256xf32>
    %c0_197 = arith.constant 0 : index
    %c0_198 = arith.constant 0 : index
    %c0_199 = arith.constant 0 : index
    %925 = vector.load %arg3[%c0_197, %c0_198, %c0_199] : memref<2x4x256xf32, #tpu.memory_space<vmem>>, vector<2x4x256xf32>
    tpu.vector_store %arg3[%c0_197, %c0_198, %c0_199], %924 {strides = array<i32>} : memref<2x4x256xf32, #tpu.memory_space<vmem>>, vector<2x4x256xf32>,
    return
  }
  func.func @transform_0(%arg0: i32) -> i32 {
    %c0_i32 = arith.constant 0 : i32
    %c0_i32_0 = arith.constant 0 : i32
    return %c0_i32 : i32
  }
  func.func @transform_1(%arg0: i32) -> (i32, i32, i32) {
    %c0_i32 = arith.constant 0 : i32
    %c0_i32_0 = arith.constant 0 : i32
    %c0_i32_1 = arith.constant 0 : i32
    return %arg0, %c0_i32, %c0_i32_0 : i32, i32, i32
  }
  func.func @transform_2(%arg0: i32) -> (i32, i32, i32) {
    %c0_i32 = arith.constant 0 : i32
    %c0_i32_0 = arith.constant 0 : i32
    %c0_i32_1 = arith.constant 0 : i32
    return %arg0, %c0_i32, %c0_i32_0 : i32, i32, i32
  }
}

</mosaic_0001>

<bundles_post_ra>
// kernel: tpu_custom_call.1
= control target key start
LH: loop header
LB: loop body
LE: loop exit
PB: predicated region body
PF: predicated region fallthrough
CT: control target
= control target key end

     0   :  { %s4683_s0 = inlined_call_operand.hbm [shape: f32[98], index: 0, kind: input, shape index: {}]   ;;  %s4684_s1 = inlined_call_operand.hbm [shape: f32[2,4,256], index: 1, kind: input, shape index: {}]   ;;  %s4685_s2 = inlined_call_operand.hbm [shape: f32[2,4,256], index: 2, kind: output, shape index: {}]  }
   0x1   :  { %4763 = sst [smem:[#allocation60_spill]] %s4685_s2 }
   0x2   :  { %7 = vsyncpa [#allocation5], 0 }
   0x3   :  { %8 = vsyncpa [#allocation3], 0 }
   0x4   :  { %9 = vsyncpa [#allocation4], 0  ;;  %s2139_s9 = smov [#allocation2]   ;;  %s2140_s12 = smov [#allocation6]  }
   0x5   :  { %17 = dma.hbm_to_smem %s4683_s0, 16, %s2139_s9, [#allocation5]  }
   0x6   :  { %s23_s13 = sshll.u32 %s2140_s12, 4  ;;  %s24_s13 = int_to_ptr.vmem [resolvable:$true] %s23_s13 }
   0x7   :  { %s2101_s14 = scalar_lea.vmem %s24_s13, 256  ;;  %p2106_p1 = scmp.lt.s32.totalorder %s24_s13, %s24_s13 }
   0x8   :  { %p2102_p0 = scmp.ne.s32.totalorder %s24_s13, %s2101_s14  ;;  %p2107_p2 = scmp.lt.s32.totalorder %s2101_s14, %s2101_s14 }
   0xa   :  { %p2108_p3 = por %p2107_p2, %p2106_p1 }
   0xc   :  { %p2109_p4 = pnand %p2108_p3, %p2102_p0 }
   0xe   :  { %2112 = shalt.err (!%p2109_p4)
}
   0xf   :  { %s4703_s15 = smov 128   ;;  %s4707_s16 = smov 8  }
  0x10   :  { %29 = dma.hbm_to_vmem [thread:$0]  %s4684_s1, 256, %s24_s13, [#allocation3], %s4703_s15, %s4703_s15, %s4707_s16  }
  0x11   :  { %2133 = dma.done.wait [#allocation5], 16  }
  0x12   :  { %2134 = vsyncadd [#allocation5], 4294967280 }
  0x13   :  { %2135 = dma.done.wait [#allocation3], 256  }
  0x14   :  { %2136 = vsyncadd [#allocation3], 4294967040 }
  0x15   :  { %36 = sfence }
  0x16   :  { %v37_v0 = vld [vmem:[#allocation6] sm:$0xff]  ;;  %v38_v1 = vld [vmem:[#allocation6 + $0x8] sm:$0xff]  ;;  %vm45_vm0 = vcmask 1043456   ;;  %vm4738_vm1 = vcmask 1041409   ;;  %s2143_s0 = smov 50   ;;  %s2144_s1 = smov 51  }
  0x17   :  { %v79_v2 = vsel %vm45_vm0, %v37_v0, -inf  ;;  %v93_v3 = vsel %vm45_vm0, %v38_v1, -inf  ;;  %v46_v4 = vsel %vm45_vm0, %v37_v0, 0.0  ;;  %v60_v5 = vsel %vm45_vm0, %v38_v1, 0.0  ;;  %s2145_s19 = smov 49   ;;  %s2146_s20 = smov 48  }
  0x18   :  { %v80_v6 = vrot.slane %v79_v2, 4  ;;  %v94_v7 = vrot.slane %v93_v3, 4  ;;  %v47_v8 = vrot.slane %v46_v4, 4  ;;  %v61_v9 = vrot.slane %v60_v5, 4  ;;  %s2147_s21 = smov 47   ;;  %s2148_s22 = smov 46  }
  0x19   :  { %v41_v10 = vcombine.high %v37_v0, %v37_v0  ;;  %v42_v11 = vcombine.high %v38_v1, %v38_v1  ;;  %s2149_s23 = smov 45   ;;  %s2150_s24 = smov 35  }
  0x1a   :  { %v81_v12 = vmax.f32 %v79_v2, %v80_v6  ;;  %v95_v13 = vmax.f32 %v93_v3, %v94_v7  ;;  %v48_v14 = vadd.f32 %v47_v8, %v46_v4  ;;  %v62_v15 = vadd.f32 %v61_v9, %v60_v5  ;;  %s2151_s25 = smov 34   ;;  %s2152_s26 = smov 33  }
  0x1b   :  { %v86_v16 = vsel %vm45_vm0, %v41_v10, -inf  ;;  %v100_v17 = vsel %vm45_vm0, %v42_v11, -inf  ;;  %v53_v18 = vsel %vm45_vm0, %v41_v10, 0.0  ;;  %v67_v19 = vsel %vm45_vm0, %v42_v11, 0.0  ;;  %s2153_s27 = smov 32   ;;  %s2154_s28 = smov 31  }
  0x1c   :  { %v82_v20 = vrot.slane %v81_v12, 2  ;;  %v96_v21 = vrot.slane %v95_v13, 2  ;;  %v49_v22 = vrot.slane %v48_v14, 2  ;;  %v63_v23 = vrot.slane %v62_v15, 2  ;;  %s2155_s29 = smov 30   ;;  %s2156_s30 = smov 29  }
  0x1d   :  { %v87_v24 = vrot.slane %v86_v16, 4  ;;  %v101_v25 = vrot.slane %v100_v17, 4  ;;  %v54_v26 = vrot.slane %v53_v18, 4  ;;  %v68_v27 = vrot.slane %v67_v19, 4  ;;  %s2157_s3 = smov 19   ;;  %s2158_s4 = smov 18  }
  0x1e   :  { %v83_v28 = vmax.f32 %v81_v12, %v82_v20  ;;  %v97_v29 = vmax.f32 %v95_v13, %v96_v21  ;;  %v50_v30 = vadd.f32 %v49_v22, %v48_v14  ;;  %v64_v31 = vadd.f32 %v63_v23, %v62_v15  ;;  %s2159_s5 = smov 17   ;;  %s2160_s6 = smov 16  }
  0x1f   :  { %v88_v32 = vmax.f32 %v86_v16, %v87_v24  ;;  %v102_v33 = vmax.f32 %v100_v17, %v101_v25  ;;  %v55_v34 = vadd.f32 %v54_v26, %v53_v18  ;;  %v69_v35 = vadd.f32 %v68_v27, %v67_v19  ;;  %s2161_s7 = smov 15   ;;  %s2162_s8 = smov 14  }
  0x20   :  { %v84_v36 = vrot.slane %v83_v28, 1  ;;  %v98_v37 = vrot.slane %v97_v29, 1  ;;  %v51_v38 = vrot.slane %v50_v30, 1  ;;  %v65_v39 = vrot.slane %v64_v31, 1  ;;  %s2163_s9 = smov 13   ;;  %s2164_s10 = smov 3  }
  0x21   :  { %v89_v40 = vrot.slane %v88_v32, 2  ;;  %v103_v41 = vrot.slane %v102_v33, 2  ;;  %v56_v42 = vrot.slane %v55_v34, 2  ;;  %v70_v43 = vrot.slane %v69_v35, 2  ;;  %s2165_s11 = smov 2   ;;  %s2166_s12 = smov 1  }
  0x22   :  { %v2225_v44 = vmax.f32 %v83_v28, %v84_v36  ;;  %v2227_v45 = vmax.f32 %v97_v29, %v98_v37  ;;  %v52_v46 = vadd.f32 %v51_v38, %v50_v30  ;;  %v66_v47 = vadd.f32 %v65_v39, %v64_v31  ;;  %s2167_s13 = smov 127   ;;  %s2168_s14 = smov 126  }
  0x23   :  { %v90_v48 = vmax.f32 %v88_v32, %v89_v40  ;;  %v104_v49 = vmax.f32 %v102_v33, %v103_v41  ;;  %v57_v50 = vadd.f32 %v56_v42, %v55_v34  ;;  %v71_v51 = vadd.f32 %v70_v43, %v69_v35  ;;  %s2169_s17 = smov 125   ;;  %s2468_s18 = sld [smem:[#allocation2 + $0x31]] }
  0x24   :  { %v2232_v52 = vsel %vm4738_vm1, %v2227_v45, %v2225_v44  ;;  %v2234_v53 = vmul.f32 0.25, %v52_v46  ;;  %v2236_v54 = vmul.f32 0.25, %v66_v47  ;;  %s2574_s15 = sld [smem:[#allocation2 + $0x3e]] }
  0x25   :  { %173 = vrot.lane.b32.xlu0 %v2232_v52, %s2143_s0  ;;  %136 = vrot.lane.b32.xlu1 %v2232_v52, %s2144_s1  ;;  %v91_v55 = vrot.slane %v90_v48, 1  ;;  %v105_v56 = vrot.slane %v104_v49, 1  ;;  %v58_v57 = vrot.slane %v57_v50, 1  ;;  %v72_v58 = vrot.slane %v71_v51, 1  ;;  %s2584_s16 = sld [smem:[#allocation2 + $0xe]] }
  0x26   :  { %v2243_v59 = vsel %vm4738_vm1, %v2236_v54, %v2234_v53  ;;  %s2594_s2 = sld [smem:[#allocation2 + $0x3f]] }
  0x27   :  { %v2245_v60 = vmax.f32 %v90_v48, %v91_v55  ;;  %v2247_v61 = vmax.f32 %v104_v49, %v105_v56  ;;  %v59_v62 = vadd.f32 %v58_v57, %v57_v50  ;;  %v73_v63 = vadd.f32 %v72_v58, %v71_v51 }
  0x29   :  { %121 = vrot.lane.b32.xlu0 %v2243_v59, %s2144_s1  ;;  %v2253_v0 = vsel %vm4738_vm1, %v2247_v61, %v2245_v60  ;;  %v2256_v1 = vmul.f32 0.25, %v59_v62  ;;  %v2258_v2 = vmul.f32 0.25, %v73_v63 }
  0x2a   :  { %138 = vrot.lane.b32.xlu1 %v2253_v0, %s2144_s1 }
  0x2b   :  { %v2265_v3 = vsel %vm4738_vm1, %v2258_v2, %v2256_v1 }
  0x2d   :  { %166 = vrot.lane.b32.xlu0 %v2243_v59, %s2143_s0 }
  0x2e   :  { %175 = vrot.lane.b32.xlu1 %v2253_v0, %s2143_s0 }
  0x31   :  { %203 = vrot.lane.b32.xlu0 %v2243_v59, %s2145_s19 }
  0x32   :  { %168 = vrot.lane.b32.xlu1 %v2265_v3, %s2143_s0  ;;  %s2471_s0 = sld [smem:[#allocation2 + $0x32]] }
  0x35   :  { %123 = vrot.lane.b32.xlu0 %v2265_v3, %s2144_s1  ;;  %s2475_s1 = sld [smem:[#allocation2 + $0x1]] }
  0x36   :  { %205 = vrot.lane.b32.xlu1 %v2265_v3, %s2145_s19 }
  0x39   :  { %210 = vrot.lane.b32.xlu0 %v2232_v52, %s2145_s19 }
  0x3a   :  { %212 = vrot.lane.b32.xlu1 %v2253_v0, %s2145_s19  ;;  %s2479_s19 = sld [smem:[#allocation2 + $0x2]] }
  0x3d   :  { %240 = vrot.lane.b32.xlu0 %v2243_v59, %s2146_s20 }
  0x3e   :  { %242 = vrot.lane.b32.xlu1 %v2265_v3, %s2146_s20 }
  0x41   :  { %247 = vrot.lane.b32.xlu0 %v2232_v52, %s2146_s20 }
  0x42   :  { %249 = vrot.lane.b32.xlu1 %v2253_v0, %s2146_s20  ;;  %s2170_s20 = smov 115  }
  0x45   :  { %273 = vrot.lane.b32.xlu0 %v2243_v59, %s2147_s21 }
  0x46   :  { %275 = vrot.lane.b32.xlu1 %v2265_v3, %s2147_s21 }
  0x49   :  { %280 = vrot.lane.b32.xlu0 %v2232_v52, %s2147_s21 }
  0x4a   :  { %282 = vrot.lane.b32.xlu1 %v2253_v0, %s2147_s21  ;;  %s2482_s21 = sld [smem:[#allocation2]] }
  0x4d   :  { %310 = vrot.lane.b32.xlu0 %v2243_v59, %s2148_s22 }
  0x4e   :  { %312 = vrot.lane.b32.xlu1 %v2265_v3, %s2148_s22 }
  0x51   :  { %317 = vrot.lane.b32.xlu0 %v2232_v52, %s2148_s22 }
  0x52   :  { %319 = vrot.lane.b32.xlu1 %v2253_v0, %s2148_s22  ;;  %s2485_s22 = sld [smem:[#allocation2 + $0x33]] }
  0x55   :  { %347 = vrot.lane.b32.xlu0 %v2243_v59, %s2149_s23 }
  0x56   :  { %349 = vrot.lane.b32.xlu1 %v2265_v3, %s2149_s23 }
  0x59   :  { %354 = vrot.lane.b32.xlu0 %v2232_v52, %s2149_s23 }
  0x5a   :  { %356 = vrot.lane.b32.xlu1 %v2253_v0, %s2149_s23  ;;  %s2489_s23 = sld [smem:[#allocation2 + $0x3]] }
  0x5d   :  { %384 = vrot.lane.b32.xlu0 %v2243_v59, %s2150_s24 }
  0x5e   :  { %386 = vrot.lane.b32.xlu1 %v2265_v3, %s2150_s24 }
  0x60   :  { %4780 = sst [smem:[#allocation27_spill]] %s2489_s23  ;;  %s4800_s23 = smov 112  }
  0x61   :  { %391 = vrot.lane.b32.xlu0 %v2232_v52, %s2150_s24 }
  0x62   :  { %393 = vrot.lane.b32.xlu1 %v2253_v0, %s2150_s24  ;;  %s2493_s24 = sld [smem:[#allocation2 + $0x34]] }
  0x65   :  { %419 = vrot.lane.b32.xlu0 %v2243_v59, %s2151_s25 }
  0x66   :  { %421 = vrot.lane.b32.xlu1 %v2265_v3, %s2151_s25 }
  0x69   :  { %426 = vrot.lane.b32.xlu0 %v2232_v52, %s2151_s25 }
  0x6a   :  { %428 = vrot.lane.b32.xlu1 %v2253_v0, %s2151_s25  ;;  %s2496_s25 = sld [smem:[#allocation2 + $0x4]] }
  0x6d   :  { %454 = vrot.lane.b32.xlu0 %v2243_v59, %s2152_s26 }
  0x6e   :  { %456 = vrot.lane.b32.xlu1 %v2265_v3, %s2152_s26 }
  0x71   :  { %461 = vrot.lane.b32.xlu0 %v2232_v52, %s2152_s26 }
  0x72   :  { %463 = vrot.lane.b32.xlu1 %v2253_v0, %s2152_s26  ;;  %s2499_s26 = sld [smem:[#allocation2 + $0x35]] }
  0x75   :  { %489 = vrot.lane.b32.xlu0 %v2243_v59, %s2153_s27 }
  0x76   :  { %491 = vrot.lane.b32.xlu1 %v2265_v3, %s2153_s27 }
  0x79   :  { %496 = vrot.lane.b32.xlu0 %v2232_v52, %s2153_s27 }
  0x7a   :  { %498 = vrot.lane.b32.xlu1 %v2253_v0, %s2153_s27  ;;  %s2503_s27 = sld [smem:[#allocation2 + $0x5]] }
  0x7d   :  { %522 = vrot.lane.b32.xlu0 %v2243_v59, %s2154_s28 }
  0x7e   :  { %524 = vrot.lane.b32.xlu1 %v2265_v3, %s2154_s28 }
  0x81   :  { %529 = vrot.lane.b32.xlu0 %v2232_v52, %s2154_s28 }
  0x82   :  { %531 = vrot.lane.b32.xlu1 %v2253_v0, %s2154_s28  ;;  %s2507_s28 = sld [smem:[#allocation2 + $0x36]] }
  0x85   :  { %557 = vrot.lane.b32.xlu0 %v2243_v59, %s2155_s29 }
  0x86   :  { %559 = vrot.lane.b32.xlu1 %v2265_v3, %s2155_s29 }
  0x89   :  { %564 = vrot.lane.b32.xlu0 %v2232_v52, %s2155_s29 }
  0x8a   :  { %566 = vrot.lane.b32.xlu1 %v2253_v0, %s2155_s29  ;;  %s2171_s29 = smov 114  }
  0x8d   :  { %592 = vrot.lane.b32.xlu0 %v2243_v59, %s2156_s30 }
  0x8e   :  { %594 = vrot.lane.b32.xlu1 %v2265_v3, %s2156_s30 }
  0x91   :  { %599 = vrot.lane.b32.xlu0 %v2232_v52, %s2156_s30 }
  0x92   :  { %601 = vrot.lane.b32.xlu1 %v2253_v0, %s2156_s30  ;;  %s2510_s30 = sld [smem:[#allocation2 + $0x6]] }
  0x95   :  { %627 = vrot.lane.b32.xlu0 %v2243_v59, %s2157_s3 }
  0x96   :  { %629 = vrot.lane.b32.xlu1 %v2265_v3, %s2157_s3 }
  0x97   :  { %v2319_v4 = vpop.permute.xlu0 %173  ;;  %v2321_v5 = vpop.permute.xlu1 %136 }
  0x98   :  { %4784 = sst [smem:[#allocation31_spill]] %s2510_s30 }
  0x99   :  { %634 = vrot.lane.b32.xlu0 %v2232_v52, %s2157_s3  ;;  %s2623_s30 = sld [smem:[#allocation2 + $0x10]] }
  0x9a   :  { %636 = vrot.lane.b32.xlu1 %v2253_v0, %s2157_s3  ;;  %s2513_s3 = sld [smem:[#allocation2 + $0x37]] }
  0x9b   :  { %v2325_v6 = vpop.permute.xlu0 %121 }
  0x9c   :  { %v2327_v7 = vpop.permute.xlu1 %138 }
  0x9d   :  { %662 = vrot.lane.b32.xlu0 %v2243_v59, %s2158_s4 }
  0x9e   :  { %664 = vrot.lane.b32.xlu1 %v2265_v3, %s2158_s4 }
  0x9f   :  { %v2331_v8 = vpop.permute.xlu0 %166  ;;  %4801 = sst [smem:[#allocation47_spill]] %s2623_s30 }
  0xa0   :  { %v2333_v9 = vpop.permute.xlu1 %175  ;;  %4785 = sst [smem:[#allocation32_spill]] %s2513_s3 }
  0xa1   :  { %669 = vrot.lane.b32.xlu0 %v2232_v52, %s2158_s4  ;;  %s2631_s3 = sld [smem:[#allocation2 + $0x41]] }
  0xa2   :  { %671 = vrot.lane.b32.xlu1 %v2253_v0, %s2158_s4  ;;  %s2517_s4 = sld [smem:[#allocation2 + $0x7]] }
  0xa3   :  { %v2337_v10 = vpop.permute.xlu0 %203  ;;  %s2839_s30 = sld [smem:[#allocation2 + $0x45]] }
  0xa4   :  { %v2339_v11 = vpop.permute.xlu1 %168 }
  0xa5   :  { %697 = vrot.lane.b32.xlu0 %v2243_v59, %s2159_s5 }
  0xa6   :  { %699 = vrot.lane.b32.xlu1 %v2265_v3, %s2159_s5 }
  0xa7   :  { %v2343_v12 = vpop.permute.xlu0 %123  ;;  %4802 = sst [smem:[#allocation48_spill]] %s2631_s3 }
  0xa8   :  { %v2345_v13 = vpop.permute.xlu1 %205  ;;  %s2788_s3 = sld [smem:[#allocation2 + $0x14]] }
  0xa9   :  { %704 = vrot.lane.b32.xlu0 %v2232_v52, %s2159_s5 }
  0xaa   :  { %706 = vrot.lane.b32.xlu1 %v2253_v0, %s2159_s5  ;;  %s2521_s5 = sld [smem:[#allocation2 + $0x38]] }
  0xab   :  { %v2349_v14 = vpop.permute.xlu0 %210 }
  0xac   :  { %v2351_v15 = vpop.permute.xlu1 %212 }
  0xad   :  { %732 = vrot.lane.b32.xlu0 %v2243_v59, %s2160_s6 }
  0xae   :  { %734 = vrot.lane.b32.xlu1 %v2265_v3, %s2160_s6 }
  0xaf   :  { %v2355_v16 = vpop.permute.xlu0 %240 }
  0xb0   :  { %v2357_v17 = vpop.permute.xlu1 %242 }
  0xb1   :  { %739 = vrot.lane.b32.xlu0 %v2232_v52, %s2160_s6 }
  0xb2   :  { %741 = vrot.lane.b32.xlu1 %v2253_v0, %s2160_s6  ;;  %s2524_s6 = sld [smem:[#allocation2 + $0x8]] }
  0xb3   :  { %v2361_v18 = vpop.permute.xlu0 %247 }
  0xb4   :  { %v2363_v19 = vpop.permute.xlu1 %249 }
  0xb5   :  { %765 = vrot.lane.b32.xlu0 %v2243_v59, %s2161_s7 }
  0xb6   :  { %767 = vrot.lane.b32.xlu1 %v2265_v3, %s2161_s7 }
  0xb7   :  { %v2367_v20 = vpop.permute.xlu0 %273 }
  0xb8   :  { %v2369_v21 = vpop.permute.xlu1 %275 }
  0xb9   :  { %772 = vrot.lane.b32.xlu0 %v2232_v52, %s2161_s7 }
  0xba   :  { %774 = vrot.lane.b32.xlu1 %v2253_v0, %s2161_s7  ;;  %s2527_s7 = sld [smem:[#allocation2 + $0x39]] }
  0xbb   :  { %v2373_v22 = vpop.permute.xlu0 %280 }
  0xbc   :  { %v2375_v23 = vpop.permute.xlu1 %282 }
  0xbd   :  { %800 = vrot.lane.b32.xlu0 %v2243_v59, %s2162_s8 }
  0xbe   :  { %802 = vrot.lane.b32.xlu1 %v2265_v3, %s2162_s8 }
  0xbf   :  { %v2379_v24 = vpop.permute.xlu0 %310 }
  0xc0   :  { %v2381_v25 = vpop.permute.xlu1 %312 }
  0xc1   :  { %807 = vrot.lane.b32.xlu0 %v2232_v52, %s2162_s8 }
  0xc2   :  { %809 = vrot.lane.b32.xlu1 %v2253_v0, %s2162_s8  ;;  %s2531_s8 = sld [smem:[#allocation2 + $0x9]] }
  0xc3   :  { %v2385_v26 = vpop.permute.xlu0 %317 }
  0xc4   :  { %v2387_v27 = vpop.permute.xlu1 %319 }
  0xc5   :  { %835 = vrot.lane.b32.xlu0 %v2243_v59, %s2163_s9 }
  0xc6   :  { %837 = vrot.lane.b32.xlu1 %v2265_v3, %s2163_s9 }
  0xc7   :  { %v2391_v28 = vpop.permute.xlu0 %347 }
  0xc8   :  { %v2393_v29 = vpop.permute.xlu1 %349 }
  0xc9   :  { %842 = vrot.lane.b32.xlu0 %v2232_v52, %s2163_s9 }
  0xca   :  { %844 = vrot.lane.b32.xlu1 %v2253_v0, %s2163_s9  ;;  %s2535_s9 = sld [smem:[#allocation2 + $0x3a]] }
  0xcb   :  { %v2397_v30 = vpop.permute.xlu0 %354 }
  0xcc   :  { %v2399_v31 = vpop.permute.xlu1 %356 }
  0xcd   :  { %870 = vrot.lane.b32.xlu0 %v2243_v59, %s2164_s10 }
  0xce   :  { %872 = vrot.lane.b32.xlu1 %v2265_v3, %s2164_s10 }
  0xcf   :  { %v2403_v32 = vpop.permute.xlu0 %384 }
  0xd0   :  { %v2405_v33 = vpop.permute.xlu1 %386 }
  0xd1   :  { %877 = vrot.lane.b32.xlu0 %v2232_v52, %s2164_s10 }
  0xd2   :  { %879 = vrot.lane.b32.xlu1 %v2253_v0, %s2164_s10  ;;  %s2172_s10 = smov 113  }
  0xd3   :  { %v2409_v34 = vpop.permute.xlu0 %391 }
  0xd4   :  { %v2411_v35 = vpop.permute.xlu1 %393 }
  0xd5   :  { %905 = vrot.lane.b32.xlu0 %v2243_v59, %s2165_s11 }
  0xd6   :  { %907 = vrot.lane.b32.xlu1 %v2265_v3, %s2165_s11 }
  0xd7   :  { %v2415_v36 = vpop.permute.xlu0 %419 }
  0xd8   :  { %v2417_v37 = vpop.permute.xlu1 %421 }
  0xd9   :  { %912 = vrot.lane.b32.xlu0 %v2232_v52, %s2165_s11 }
  0xda   :  { %914 = vrot.lane.b32.xlu1 %v2253_v0, %s2165_s11  ;;  %s2538_s11 = sld [smem:[#allocation2 + $0xa]] }
  0xdb   :  { %v2421_v38 = vpop.permute.xlu0 %426 }
  0xdc   :  { %v2423_v39 = vpop.permute.xlu1 %428 }
  0xdd   :  { %940 = vrot.lane.b32.xlu0 %v2243_v59, %s2166_s12 }
  0xde   :  { %942 = vrot.lane.b32.xlu1 %v2265_v3, %s2166_s12 }
  0xdf   :  { %v2427_v40 = vpop.permute.xlu0 %454 }
  0xe0   :  { %4764 = vst [vmem:[#allocation11_spill] sm:$0xff] %v2427_v40  ;;  %v2429_v41 = vpop.permute.xlu1 %456  ;;  %4790 = sst [smem:[#allocation37_spill]] %s2538_s11  ;;  %s4733_s11 = smov 111  }
  0xe1   :  { %4765 = vst [vmem:[#allocation12_spill] sm:$0xff] %v2429_v41  ;;  %947 = vrot.lane.b32.xlu0 %v2232_v52, %s2166_s12 }
  0xe2   :  { %949 = vrot.lane.b32.xlu1 %v2253_v0, %s2166_s12  ;;  %s2541_s12 = sld [smem:[#allocation2 + $0x3b]] }
  0xe3   :  { %v2433_v42 = vpop.permute.xlu0 %461 }
  0xe4   :  { %v2435_v43 = vpop.permute.xlu1 %463 }
  0xe5   :  { %4766 = vst [vmem:[#allocation13_spill] sm:$0xff] %v2435_v43  ;;  %1001 = vrot.lane.b32.xlu0 %v2243_v59, %s2167_s13 }
  0xe6   :  { %1003 = vrot.lane.b32.xlu1 %v2265_v3, %s2167_s13 }
  0xe7   :  { %v2439_v46 = vpop.permute.xlu0 %489 }
  0xe8   :  { %4767 = vst [vmem:[#allocation14_spill] sm:$0xff] %v2439_v46  ;;  %v2441_v47 = vpop.permute.xlu1 %491 }
  0xe9   :  { %4768 = vst [vmem:[#allocation15_spill] sm:$0xff] %v2441_v47  ;;  %1008 = vrot.lane.b32.xlu0 %v2232_v52, %s2167_s13 }
  0xea   :  { %1010 = vrot.lane.b32.xlu1 %v2253_v0, %s2167_s13  ;;  %s2548_s13 = sld [smem:[#allocation2 + $0xb]] }
  0xeb   :  { %v2445_v48 = vpop.permute.xlu0 %496 }
  0xec   :  { %4769 = vst [vmem:[#allocation16_spill] sm:$0xff] %v2445_v48  ;;  %v2447_v49 = vpop.permute.xlu1 %498 }
  0xed   :  { %4770 = vst [vmem:[#allocation17_spill] sm:$0xff] %v2447_v49  ;;  %1036 = vrot.lane.b32.xlu0 %v2243_v59, %s2168_s14 }
  0xee   :  { %1038 = vrot.lane.b32.xlu1 %v2265_v3, %s2168_s14 }
  0xef   :  { %v2451_v50 = vpop.permute.xlu0 %522 }
  0xf0   :  { %4771 = vst [vmem:[#allocation18_spill] sm:$0xff] %v2451_v50  ;;  %v2453_v51 = vpop.permute.xlu1 %524  ;;  %4792 = sst [smem:[#allocation39_spill]] %s2548_s13 }
  0xf1   :  { %4772 = vst [vmem:[#allocation19_spill] sm:$0xff] %v2453_v51  ;;  %1043 = vrot.lane.b32.xlu0 %v2232_v52, %s2168_s14  ;;  %s2660_s13 = sld [smem:[#allocation2 + $0x42]] }
  0xf2   :  { %1045 = vrot.lane.b32.xlu1 %v2253_v0, %s2168_s14  ;;  %s2552_s14 = sld [smem:[#allocation2 + $0x3c]] }
  0xf3   :  { %v2457_v55 = vpop.permute.xlu0 %529 }
  0xf4   :  { %4773 = vst [vmem:[#allocation20_spill] sm:$0xff] %v2457_v55  ;;  %v2459_v56 = vpop.permute.xlu1 %531  ;;  %v181_v55 = vstv %s2475_s1  ;;  %s2602_s1 = sld [smem:[#allocation2 + $0xf]] }
  0xf5   :  { %4774 = vst [vmem:[#allocation21_spill] sm:$0xff] %v2459_v56  ;;  %1071 = vrot.lane.b32.xlu0 %v2243_v59, %s2169_s17  ;;  %v4808_v56 = vstv %s2482_s21 }
  0xf6   :  { %1073 = vrot.lane.b32.xlu1 %v2265_v3, %s2169_s17 }
  0xf7   :  { %v2463_v57 = vpop.permute.xlu0 %557  ;;  %4805 = sst [smem:[#allocation51_spill]] %s2660_s13 }
  0xf8   :  { %4775 = vst [vmem:[#allocation22_spill] sm:$0xff] %v2463_v57  ;;  %v2465_v58 = vpop.permute.xlu1 %559  ;;  %s2858_s13 = sld [smem:[#allocation2 + $0x15]] }
  0xf9   :  { %4776 = vst [vmem:[#allocation23_spill] sm:$0xff] %v2465_v58  ;;  %1078 = vrot.lane.b32.xlu0 %v2232_v52, %s2169_s17 }
  0xfa   :  { %1080 = vrot.lane.b32.xlu1 %v2253_v0, %s2169_s17  ;;  %s2558_s17 = sld [smem:[#allocation2 + $0xc]] }
  0xfb   :  { %v2473_v62 = vpop.permute.xlu0 %564 }
  0xfc   :  { %4777 = vst [vmem:[#allocation24_spill] sm:$0xff] %v2473_v62  ;;  %v2477_v63 = vpop.permute.xlu1 %566 }
  0xfd   :  { %4778 = vst [vmem:[#allocation25_spill] sm:$0xff] %v2477_v63  ;;  %1106 = vrot.lane.b32.xlu0 %v2243_v59, %s2170_s20 }
  0xfe   :  { %1108 = vrot.lane.b32.xlu1 %v2265_v3, %s2170_s20 }
  0xff   :  { %v2487_v57 = vpop.permute.xlu0 %592 }
 0x100   :  { %4779 = vst [vmem:[#allocation26_spill] sm:$0xff] %v2487_v57  ;;  %v2491_v58 = vpop.permute.xlu1 %594  ;;  %4795 = sst [smem:[#allocation42_spill]] %s2558_s17  ;;  %s4810_s17 = smov 111  }
 0x101   :  { %4781 = vst [vmem:[#allocation28_spill] sm:$0xff] %v2491_v58  ;;  %1113 = vrot.lane.b32.xlu0 %v2232_v52, %s2170_s20 }
 0x102   :  { %1115 = vrot.lane.b32.xlu1 %v2253_v0, %s2170_s20  ;;  %s2564_s20 = sld [smem:[#allocation2 + $0x3d]] }
 0x103   :  { %v2501_v63 = vpop.permute.xlu0 %599 }
 0x104   :  { %4782 = vst [vmem:[#allocation29_spill] sm:$0xff] %v2501_v63  ;;  %v2505_v62 = vpop.permute.xlu1 %601 }
 0x105   :  { %4783 = vst [vmem:[#allocation30_spill] sm:$0xff] %v2505_v62  ;;  %1141 = vrot.lane.b32.xlu0 %v2243_v59, %s2171_s29  ;;  %v4699_v62 = vlaneseq }
 0x106   :  { %1143 = vrot.lane.b32.xlu1 %v2265_v3, %s2171_s29 }
 0x107   :  { %v2515_v57 = vpop.permute.xlu0 %627 }
 0x108   :  { %4786 = vst [vmem:[#allocation33_spill] sm:$0xff] %v2515_v57  ;;  %v2519_v58 = vpop.permute.xlu1 %629 }
 0x109   :  { %4787 = vst [vmem:[#allocation34_spill] sm:$0xff] %v2519_v58  ;;  %1148 = vrot.lane.b32.xlu0 %v2232_v52, %s2171_s29 }
 0x10a   :  { %1150 = vrot.lane.b32.xlu1 %v2253_v0, %s2171_s29  ;;  %s2568_s29 = sld [smem:[#allocation2 + $0xd]] }
 0x10b   :  { %v2529_v63 = vpop.permute.xlu0 %634 }
 0x10c   :  { %4788 = vst [vmem:[#allocation35_spill] sm:$0xff] %v2529_v63  ;;  %v2533_v57 = vpop.permute.xlu1 %636  ;;  %v2546_v63 = vand.u32 127, %v4699_v62 }
 0x10d   :  { %4789 = vst [vmem:[#allocation36_spill] sm:$0xff] %v2533_v57  ;;  %1176 = vrot.lane.b32.xlu0 %v2243_v59, %s2172_s10 }
 0x10e   :  { %1178 = vrot.lane.b32.xlu1 %v2265_v3, %s2172_s10  ;;  %v2556_v51 = vadd.s32 128, %v2546_v63  ;;  %v2562_v62 = vand.u32 15, %v2546_v63  ;;  %vm125_vm2 = vcmp.lt.s32.totalorder %v2546_v63, 51  ;;  %vm170_vm3 = vcmp.lt.s32.totalorder %v2546_v63, 50 }
 0x10f   :  { %v2543_v58 = vpop.permute.xlu0 %662  ;;  %vm191_vm5 = vcmp.ge.s32.totalorder %v2546_v63, 50  ;;  %vm207_vm6 = vcmp.lt.s32.totalorder %v2546_v63, 49  ;;  %v172_v41 = vsel %vm170_vm3, %v2339_v11, %v2331_v8  ;;  %vm154_vm8 = vcmp.ge.s32.totalorder %v2546_v63, 51 }
 0x110   :  { %4791 = vst [vmem:[#allocation38_spill] sm:$0xff] %v2543_v58  ;;  %v2550_v57 = vpop.permute.xlu1 %664  ;;  %4794 = vst [vmem:[#allocation41_spill] sm:$0xff] %v2556_v51  ;;  %vm4742_vm4 = vcmp.ge.s32.totalorder %v2562_v62, 2  ;;  %vm4750_vm7 = vcmp.ge.s32.totalorder %v2562_v62, 3  ;;  %v178_v50 = vsel %vm170_vm3, %v2333_v9, %v2319_v4  ;;  %v171_v48 = vsel %vm170_vm3, %v2331_v8, %v2339_v11 }
 0x111   :  { %4793 = vst [vmem:[#allocation40_spill] sm:$0xff] %v2550_v57  ;;  %1183 = vrot.lane.b32.xlu0 %v2232_v52, %s2172_s10  ;;  %v182_v47 = vmul.f32 %v181_v55, %v172_v41  ;;  %v127_v49 = vsel %vm125_vm2, %v2343_v12, %v2325_v6  ;;  %vm244_vm10 = vcmp.lt.s32.totalorder %v2546_v63, 48  ;;  %vm277_vm11 = vcmp.lt.s32.totalorder %v2546_v63, 47  ;;  %vm2715_vm15 = vmand %vm4742_vm4, %vm191_vm5 }
 0x112   :  { %1185 = vrot.lane.b32.xlu1 %v2253_v0, %s2172_s10  ;;  %s4717_s10 = smov 112   ;;  %v177_v41 = vsel %vm170_vm3, %v2319_v4, %v2333_v9  ;;  %v141_v11 = vsel %vm125_vm2, %v2327_v7, %v2321_v5  ;;  %v4806_v8 = vstv %s2471_s0  ;;  %v126_v4 = vsel %vm125_vm2, %v2325_v6, %v2343_v12  ;;  %s2729_s0 = sld [smem:[#allocation2 + $0x43]] }
 0x113   :  { %v2566_v58 = vpop.permute.xlu0 %669  ;;  %vm4762_vm13 = vcmp.ge.s32.totalorder %v2562_v62, 1  ;;  %vm228_vm14 = vcmp.ge.s32.totalorder %v2546_v63, 49  ;;  %v140_v6 = vsel %vm125_vm2, %v2321_v5, %v2327_v7  ;;  %v4809_v12 = vmov %v4806_v8 }
 0x114   :  { %4796 = vst [vmem:[#allocation43_spill] sm:$0xff] %v2566_v58  ;;  %v2570_v57 = vpop.permute.xlu1 %671  ;;  %v209_v7 = vsel %vm207_vm6, %v2345_v13, %v2337_v10  ;;  %vm314_vm0 = vcmp.lt.s32.totalorder %v2546_v63, 46  ;;  %vm4755_vm2 = vcmp.lt.s32.totalorder %v2562_v62, 15  ;;  %vm298_vm3 = vcmp.ge.s32.totalorder %v2546_v63, 47 }
 0x115   :  { %4797 = vst [vmem:[#allocation44_spill] sm:$0xff] %v2570_v57  ;;  %1211 = vrot.lane.b32.xlu0 %v2243_v59, %s4717_s10  ;;  %v2581_v57 = vand.u32 15, %v2556_v51  ;;  %vm263_vm1 = vcmp.ge.s32.totalorder %v2546_v63, 48  ;;  %vm335_vm4 = vcmp.ge.s32.totalorder %v2546_v63, 46 }
 0x116   :  { %1213 = vrot.lane.b32.xlu1 %v2265_v3, %s4717_s10  ;;  %s2610_s10 = sld [smem:[#allocation2 + $0x40]] }
 0x117   :  { %v2596_v51 = vpop.permute.xlu0 %697  ;;  %vm4741_vm9 = vcmp.ge.s32.totalorder %v2581_v57, 2  ;;  %vm153_vm12 = vcmp.ge.s32.totalorder %v2581_v57, 3  ;;  %vm4758_vm5 = vcmp.ge.s32.totalorder %v2581_v57, 1 }
 0x118   :  { %4798 = vst [vmem:[#allocation45_spill] sm:$0xff] %v2596_v51  ;;  %v2604_v40 = vpop.permute.xlu1 %699 }
 0x119   :  { %4799 = vst [vmem:[#allocation46_spill] sm:$0xff] %v2604_v40  ;;  %1218 = vrot.lane.b32.xlu0 %v2232_v52, %s4800_s23  ;;  %v183_v40 = vmul.f32 %v181_v55, %v171_v48  ;;  %v145_v48 = vmul.f32 %v4808_v56, %v127_v49  ;;  %v215_v49 = vsel %vm207_vm6, %v2351_v15, %v2349_v14  ;;  %v4811_v56 = vstv %s2468_s18  ;;  %s4743_s18 = smov 110  }
 0x11a   :  { %1220 = vrot.lane.b32.xlu1 %v2253_v0, %s4800_s23  ;;  %s2648_s23 = sld [smem:[#allocation2 + $0x11]] }
 0x11b   :  { %v2633_v51 = vpop.permute.xlu0 %704 }
 0x11c   :  { %4803 = vst [vmem:[#allocation49_spill] sm:$0xff] %v2633_v51  ;;  %v2646_v58 = vpop.permute.xlu1 %706  ;;  %v186_v51 = vmul.f32 %v4809_v12, %v177_v41  ;;  %v214_v12 = vsel %vm207_vm6, %v2349_v14, %v2351_v15  ;;  %v4816_v41 = vmov %v4811_v56  ;;  %v4817_v14 = vstv %s2485_s22  ;;  %s2804_s22 = sld [smem:[#allocation2 + $0x18]] }
 0x11d   :  { %4804 = vst [vmem:[#allocation50_spill] sm:$0xff] %v2646_v58  ;;  %1244 = vrot.lane.b32.xlu0 %v2243_v59, %s4733_s11  ;;  %v185_v58 = vmul.f32 %v4806_v8, %v178_v50  ;;  %v148_v8 = vmul.f32 %v4811_v56, %v141_v11  ;;  %v149_v50 = vmul.f32 %v4816_v41, %v140_v6  ;;  %v4818_v41 = vstv %s2479_s19 }
 0x11e   :  { %1246 = vrot.lane.b32.xlu1 %v2265_v3, %s4733_s11  ;;  %s2686_s11 = sld [smem:[#allocation2 + $0x12]]  ;;  %v188_v11 = vadd.f32 %v186_v51, %v183_v40  ;;  %v208_v40 = vsel %vm207_vm6, %v2337_v10, %v2345_v13  ;;  %v222_v15 = vmul.f32 %v4817_v14, %v215_v49  ;;  %v219_v56 = vmul.f32 %v4818_v41, %v209_v7  ;;  %vm2765_vm6 = vmand %vm4750_vm7, %vm154_vm8 }
 0x11f   :  { %v2684_v9 = vpop.permute.xlu0 %732  ;;  %v2701_v43 = vadd.f32 %v185_v58, %v182_v47  ;;  %v4814_v47 = vstv %s2482_s21  ;;  %v2747_v51 = vadd.f32 %v148_v8, %v145_v48  ;;  %s2754_s21 = sld [smem:[#allocation2 + $0x13]]  ;;  %v4821_v49 = vmov %v4817_v14  ;;  %vm2849_vm7 = vmand %vm4762_vm13, %vm228_vm14 }
 0x120   :  { %v2693_v46 = vpop.permute.xlu1 %734  ;;  %v146_v58 = vmul.f32 %v4814_v47, %v126_v4  ;;  %v223_v7 = vmul.f32 %v4821_v49, %v214_v12  ;;  %v252_v14 = vsel %vm244_vm10, %v2363_v19, %v2361_v18  ;;  %v285_v41 = vsel %vm277_vm11, %v2375_v23, %v2373_v22  ;;  %vm2903_vm14 = vmand %vm4755_vm2, %vm298_vm3 }
 0x121   :  { %1251 = vrot.lane.b32.xlu0 %v2232_v52, %s4810_s17  ;;  %vm4756_vm8 = vcmp.lt.s32.totalorder %v2581_v57, 15  ;;  %v284_v49 = vsel %vm277_vm11, %v2373_v22, %v2375_v23  ;;  %v2809_v13 = vadd.f32 %v222_v15, %v219_v56  ;;  %v279_v22 = vsel %vm277_vm11, %v2369_v21, %v2367_v20 }
 0x122   :  { %1253 = vrot.lane.b32.xlu1 %v2253_v0, %s4810_s17  ;;  %s2773_s17 = sld [smem:[#allocation2 + $0x44]]  ;;  %v151_v8 = vadd.f32 %v149_v50, %v146_v58  ;;  %v2792_v50 = vsel %vm4741_vm9, %v188_v11, 0.0  ;;  %v4822_v58 = vstv %s2479_s19  ;;  %vm333_vm9 = vcmp.lt.s32.totalorder %v2562_v62, 14 }
 0x123   :  { %v2739_v47 = vpop.permute.xlu0 %739  ;;  %v220_v12 = vmul.f32 %v4822_v58, %v208_v40  ;;  %v246_v40 = vsel %vm244_vm10, %v2357_v17, %v2355_v16  ;;  %s4825_s19 = sld [smem:[#allocation27_spill]]  ;;  %v251_v56 = vsel %vm244_vm10, %v2361_v18, %v2363_v19  ;;  %v4826_v15 = vstv %s2493_s24 }
 0x124   :  { %4807 = sst [smem:[#allocation52_spill]] %s2686_s11  ;;  %4815 = vst [vmem:[#allocation53_spill] sm:$0xff] %v2739_v47  ;;  %v2752_v55 = vpop.permute.xlu1 %741  ;;  %v259_v58 = vmul.f32 %v4826_v15, %v252_v14  ;;  %v278_v4 = vsel %vm277_vm11, %v2367_v20, %v2369_v21  ;;  %v4827_v6 = vstv %s2499_s26  ;;  %s4828_s11 = smov 110   ;;  %v4833_v15 = vstv %s2496_s25 }
 0x125   :  { %1279 = vrot.lane.b32.xlu0 %v2243_v59, %s4743_s18  ;;  %v292_v11 = vmul.f32 %v4827_v6, %v285_v41  ;;  %v225_v19 = vadd.f32 %v223_v7, %v220_v12  ;;  %v4831_v20 = vmov %v4827_v6  ;;  %v322_v7 = vsel %vm314_vm0, %v2387_v27, %v2385_v26  ;;  %s2895_s25 = sld [smem:[#allocation2 + $0x46]] }
 0x126   :  { %1281 = vrot.lane.b32.xlu1 %v2265_v3, %s4743_s18  ;;  %s2823_s18 = sld [smem:[#allocation2 + $0x49]]  ;;  %v293_v21 = vmul.f32 %v4831_v20, %v284_v49  ;;  %vm351_vm11 = vcmp.lt.s32.totalorder %v2546_v63, 45  ;;  %v4834_v49 = vstv %s2493_s24  ;;  %v4835_v6 = vmov %v4833_v15  ;;  %s2176_s24 = smov 109  }
 0x127   :  { %v2802_v48 = vpop.permute.xlu0 %765  ;;  %v260_v20 = vmul.f32 %v4834_v49, %v251_v56  ;;  %v290_v47 = vmul.f32 %v4835_v6, %v278_v4  ;;  %v316_v4 = vsel %vm314_vm0, %v2381_v25, %v2379_v24  ;;  %v4839_v6 = vstv %s2507_s28  ;;  %s2932_s26 = sld [smem:[#allocation2 + $0x16]]  ;;  %s2177_s28 = smov 99  }
 0x128   :  { %4823 = vst [vmem:[#allocation54_spill] sm:$0xff] %v2802_v48  ;;  %v2821_v23 = vpop.permute.xlu1 %767  ;;  %v2843_v48 = vsel %vm153_vm12, %v151_v8, 0.0  ;;  %v245_v8 = vsel %vm244_vm10, %v2355_v16, %v2357_v17  ;;  %vm4757_vm10 = vcmp.lt.s32.totalorder %v2581_v57, 14  ;;  %v321_v16 = vsel %vm314_vm0, %v2385_v26, %v2387_v27 }
 0x129   :  { %4824 = vst [vmem:[#allocation55_spill] sm:$0xff] %v2821_v23  ;;  %1286 = vrot.lane.b32.xlu0 %v2232_v52, %s4828_s11  ;;  %v4832_v14 = vstv %s4825_s19  ;;  %v289_v23 = vmul.f32 %v4833_v15, %v279_v22  ;;  %v4836_v26 = vstv %s4825_s19  ;;  %v4840_v15 = vmov %v4839_v6  ;;  %s3104_s19 = sld [smem:[#allocation2 + $0x48]] }
 0x12a   :  { %1288 = vrot.lane.b32.xlu1 %v2253_v0, %s4828_s11  ;;  %v256_v41 = vmul.f32 %v4832_v14, %v246_v40  ;;  %v257_v27 = vmul.f32 %v4836_v26, %v245_v8  ;;  %v2916_v8 = vsel %vm4758_vm5, %v225_v19, 0.0  ;;  %v330_v49 = vmul.f32 %v4840_v15, %v321_v16  ;;  %s4847_s11 = sld [smem:[#allocation31_spill]] }
 0x12b   :  { %v2873_v12 = vpop.permute.xlu0 %772  ;;  %v294_v56 = vadd.f32 %v292_v11, %v289_v23  ;;  %v295_v23 = vadd.f32 %v293_v21, %v290_v47  ;;  %vm388_vm3 = vcmp.lt.s32.totalorder %v2546_v63, 35  ;;  %v977_v26 = vstv %s2804_s22  ;;  %s3076_s22 = sld [smem:[#allocation2 + $0x17]] }
 0x12c   :  { %v2884_v17 = vpop.permute.xlu1 %774  ;;  %v261_v14 = vadd.f32 %v259_v58, %v256_v41  ;;  %v315_v58 = vsel %vm314_vm0, %v2379_v24, %v2381_v25  ;;  %v329_v41 = vmul.f32 %v4839_v6, %v322_v7  ;;  %v2925_v24 = vadd.f32 %v260_v20, %v257_v27  ;;  %v4913_v20 = vld [vmem:[#allocation34_spill] sm:$0xff] }
 0x12d   :  { %1314 = vrot.lane.b32.xlu0 %v2243_v59, %s2176_s24  ;;  %v4841_v25 = vstv %s2503_s27  ;;  %v982_v19 = vstv %s2823_s18  ;;  %v306_v15 = vsel %vm2903_vm14, %v294_v56, 0.0  ;;  %vm423_vm0 = vcmp.lt.s32.totalorder %v2546_v63, 34  ;;  %s4846_s27 = sld [smem:[#allocation32_spill]] }
 0x12e   :  { %1316 = vrot.lane.b32.xlu1 %v2265_v3, %s2176_s24  ;;  %v326_v7 = vmul.f32 %v4841_v25, %v316_v4  ;;  %v2937_v16 = vsel %vm263_vm1, %v261_v14, 0.0  ;;  %v4842_v21 = vmov %v4841_v25  ;;  %v307_v4 = vsel %vm4756_vm8, %v295_v23, 0.0  ;;  %vm2955_vm1 = vmand %vm333_vm9, %vm335_vm4  ;;  %s3006_s18 = sld [smem:[#allocation2 + $0x47]]  ;;  %v4902_v25 = vld [vmem:[#allocation30_spill] sm:$0xff] }
 0x12f   :  { %v2921_v47 = vpop.permute.xlu0 %800  ;;  %v327_v22 = vmul.f32 %v4842_v21, %v315_v58  ;;  %v978_v14 = vmul.f32 %v977_v26, %v2234_v53  ;;  %vm4759_vm14 = vcmp.lt.s32.totalorder %v2562_v62, 13  ;;  %vm372_vm2 = vcmp.ge.s32.totalorder %v2546_v63, 45 }
 0x130   :  { %v2929_v6 = vpop.permute.xlu1 %802  ;;  %v331_v27 = vadd.f32 %v329_v41, %v326_v7  ;;  %vm458_vm8 = vcmp.lt.s32.totalorder %v2546_v63, 33  ;;  %v979_v53 = vmul.f32 %v977_v26, %v2256_v1  ;;  %v983_v58 = vmul.f32 %v982_v19, %v2225_v44 }
 0x131   :  { %1321 = vrot.lane.b32.xlu0 %v2232_v52, %s2176_s24  ;;  %v332_v11 = vadd.f32 %v330_v49, %v327_v22  ;;  %v984_v41 = vmul.f32 %v982_v19, %v2245_v60  ;;  %v4845_v21 = vsel %vm2765_vm6, %v2747_v51, 0.0  ;;  %v359_v49 = vsel %vm351_vm11, %v2399_v31, %v2397_v30 }
 0x132   :  { %1323 = vrot.lane.b32.xlu1 %v2253_v0, %s2176_s24  ;;  %v2971_v22 = vadd.f32 %v306_v15, %v4845_v21  ;;  %v980_v40 = vmul.f32 %v977_v26, %v2236_v54  ;;  %v985_v1 = vmul.f32 %v982_v19, %v2227_v45  ;;  %v2982_v44 = vadd.f32 %v307_v4, %v2843_v48  ;;  %s3125_s24 = sld [smem:[#allocation2 + $0x19]] }
 0x133   :  { %v2962_v23 = vpop.permute.xlu0 %807  ;;  %v358_v60 = vsel %vm351_vm11, %v2397_v30, %v2399_v31  ;;  %vm407_vm4 = vcmp.ge.s32.totalorder %v2546_v63, 35  ;;  %v981_v54 = vmul.f32 %v977_v26, %v2258_v2  ;;  %v343_v45 = vsel %vm2955_vm1, %v331_v27, 0.0 }
 0x134   :  { %v2977_v7 = vpop.permute.xlu1 %809  ;;  %v352_v10 = vsel %vm351_vm11, %v2391_v28, %v2393_v29  ;;  %v353_v30 = vsel %vm351_vm11, %v2393_v29, %v2391_v28  ;;  %vm371_vm6 = vcmp.lt.s32.totalorder %v2581_v57, 13  ;;  %v986_v2 = vmul.f32 %v982_v19, %v2247_v61 }
 0x135   :  { %1349 = vrot.lane.b32.xlu0 %v2243_v59, %s2177_s28  ;;  %v344_v31 = vsel %vm4757_vm10, %v332_v11, 0.0  ;;  %v4848_v48 = vstv %s4846_s27  ;;  %vm442_vm1 = vcmp.ge.s32.totalorder %v2546_v63, 34  ;;  %vm493_vm11 = vcmp.lt.s32.totalorder %v2546_v63, 32  ;;  %s3201_s27 = sld [smem:[#allocation2 + $0x4c]] }
 0x136   :  { %1351 = vrot.lane.b32.xlu1 %v2265_v3, %s2177_s28  ;;  %v366_v26 = vmul.f32 %v4848_v48, %v359_v49  ;;  %v3017_v29 = vadd.f32 %v983_v58, %v978_v14  ;;  %v3019_v15 = vadd.f32 %v984_v41, %v979_v53  ;;  %v4851_v4 = vmov %v4848_v48 }
 0x137   :  { %v3015_v28 = vpop.permute.xlu0 %835  ;;  %v367_v27 = vmul.f32 %v4851_v4, %v358_v60  ;;  %v396_v61 = vsel %vm388_vm3, %v2411_v35, %v2409_v34  ;;  %v3030_v11 = vadd.f32 %v985_v1, %v980_v40  ;;  %v4853_v14 = vsel %vm2715_vm15, %v2701_v43, 0.0  ;;  %vm3110_vm15 = vmand %vm4759_vm14, %vm372_vm2 }
 0x138   :  { %4849 = vst [vmem:[#allocation56_spill] sm:$0xff] %v3017_v29  ;;  %4850 = vst [vmem:[#allocation57_spill] sm:$0xff] %v3019_v15  ;;  %v3027_v19 = vpop.permute.xlu1 %837  ;;  %v3036_v58 = vadd.f32 %v343_v45, %v4853_v14  ;;  %v4854_v53 = vstv %s4847_s11  ;;  %v395_v60 = vsel %vm388_vm3, %v2409_v34, %v2411_v35  ;;  %vm477_vm10 = vcmp.ge.s32.totalorder %v2546_v63, 33  ;;  %s3234_s11 = sld [smem:[#allocation2 + $0x1c]] }
 0x139   :  { %4852 = vst [vmem:[#allocation58_spill] sm:$0xff] %v3030_v11  ;;  %v363_v41 = vmul.f32 %v4854_v53, %v353_v30  ;;  %v4855_v21 = vmov %v4854_v53  ;;  %1356 = vrot.lane.b32.xlu0 %v2232_v52, %s2177_s28  ;;  %v3050_v5 = vadd.f32 %v344_v31, %v2792_v50  ;;  %v390_v43 = vsel %vm388_vm3, %v2405_v33, %v2403_v32 }
 0x13a   :  { %v364_v49 = vmul.f32 %v4855_v21, %v352_v10  ;;  %v431_v40 = vsel %vm423_vm0, %v2423_v39, %v2421_v38  ;;  %1358 = vrot.lane.b32.xlu1 %v2253_v0, %s2177_s28  ;;  %v3062_v34 = vadd.f32 %v986_v2, %v981_v54  ;;  %v389_v50 = vsel %vm388_vm3, %v2403_v32, %v2405_v33  ;;  %v4859_v33 = vld [vmem:[#allocation13_spill] sm:$0xff]  ;;  %v4866_v21 = vld [vmem:[#allocation11_spill] sm:$0xff]  ;;  %s2179_s28 = smov 97  }
 0x13b   :  { %v368_v35 = vadd.f32 %v366_v26, %v363_v41  ;;  %v4857_v1 = vstv %s2521_s5  ;;  %v430_v10 = vsel %vm423_vm0, %v2421_v38, %v2423_v39  ;;  %v3074_v30 = vpop.permute.xlu0 %842  ;;  %v425_v32 = vsel %vm423_vm0, %v2417_v37, %v2415_v36  ;;  %s2178_s5 = smov 98  }
 0x13c   :  { %4856 = vst [vmem:[#allocation59_spill] sm:$0xff] %v3062_v34  ;;  %v403_v45 = vmul.f32 %v4857_v1, %v396_v61  ;;  %v369_v54 = vadd.f32 %v367_v27, %v364_v49  ;;  %v4858_v2 = vmov %v4857_v1  ;;  %v466_v38 = vsel %vm458_vm8, %v4859_v33, %v2433_v42  ;;  %v3088_v39 = vpop.permute.xlu1 %844  ;;  %v4867_v49 = vld [vmem:[#allocation12_spill] sm:$0xff] }
 0x13d   :  { %v404_v31 = vmul.f32 %v4858_v2, %v395_v60  ;;  %v4860_v48 = vstv %s2517_s4  ;;  %v424_v4 = vsel %vm423_vm0, %v2415_v36, %v2417_v37  ;;  %v4861_v27 = vstv %s2527_s7  ;;  %1384 = vrot.lane.b32.xlu0 %v2243_v59, %s2178_s5  ;;  %s3138_s4 = sld [smem:[#allocation2 + $0x4a]] }
 0x13e   :  { %v400_v26 = vmul.f32 %v4860_v48, %v390_v43  ;;  %v438_v61 = vmul.f32 %v4861_v27, %v431_v40  ;;  %v465_v14 = vsel %vm458_vm8, %v2433_v42, %v4859_v33  ;;  %v4864_v37 = vmov %v4860_v48  ;;  %1386 = vrot.lane.b32.xlu1 %v2265_v3, %s2178_s5  ;;  %s3159_s7 = sld [smem:[#allocation2 + $0x1a]] }
 0x13f   :  { %v401_v53 = vmul.f32 %v4864_v37, %v389_v50  ;;  %v4865_v41 = vmov %v4861_v27  ;;  %v460_v60 = vsel %vm458_vm8, %v4867_v49, %v4866_v21  ;;  %v4868_v1 = vstv %s2524_s6  ;;  %v3136_v48 = vpop.permute.xlu0 %870  ;;  %s3169_s6 = sld [smem:[#allocation2 + $0x4b]] }
 0x140   :  { %v439_v42 = vmul.f32 %v4865_v41, %v430_v10  ;;  %v405_v40 = vadd.f32 %v403_v45, %v400_v26  ;;  %v435_v2 = vmul.f32 %v4868_v1, %v425_v32  ;;  %v459_v50 = vsel %vm458_vm8, %v4866_v21, %v4867_v49  ;;  %v4875_v41 = vld [vmem:[#allocation16_spill] sm:$0xff]  ;;  %v4876_v21 = vld [vmem:[#allocation17_spill] sm:$0xff] }
 0x141   :  { %v4869_v10 = vstv %s2535_s9  ;;  %vm526_vm2 = vcmp.lt.s32.totalorder %v2546_v63, 31  ;;  %vm4870_vm3 = vcmp.ge.s32.totalorder %v2562_v62, 3  ;;  %v406_v32 = vadd.f32 %v404_v31, %v401_v53  ;;  %1391 = vrot.lane.b32.xlu0 %v2232_v52, %s2178_s5  ;;  %s3191_s9 = sld [smem:[#allocation2 + $0x1b]] }
 0x142   :  { %v473_v33 = vmul.f32 %v4869_v10, %v466_v38  ;;  %vm3144_vm0 = vmand %vm4870_vm3, %vm407_vm4  ;;  %v4873_v26 = vmov %v4868_v1  ;;  %v4874_v37 = vmov %v4869_v10  ;;  %vm512_vm8 = vcmp.ge.s32.totalorder %v2546_v63, 32  ;;  %v3157_v1 = vpop.permute.xlu1 %872  ;;  %1393 = vrot.lane.b32.xlu1 %v2253_v0, %s2178_s5  ;;  %s4899_s5 = sld [smem:[#allocation39_spill]] }
 0x143   :  { %v436_v27 = vmul.f32 %v4873_v26, %v424_v4  ;;  %v474_v38 = vmul.f32 %v4874_v37, %v465_v14  ;;  %v501_v49 = vsel %vm493_vm11, %v4876_v21, %v4875_v41  ;;  %v380_v10 = vsel %vm3110_vm15, %v368_v35, 0.0  ;;  %vm3215_vm15 = vmand %vm4762_vm13, %vm477_vm10 }
 0x144   :  { %v381_v31 = vsel %vm371_vm6, %v369_v54, 0.0  ;;  %v440_v4 = vadd.f32 %v438_v61, %v435_v2  ;;  %v4877_v14 = vstv %s2531_s8  ;;  %vm4878_vm4 = vcmp.ge.s32.totalorder %v2562_v62, 2  ;;  %v4882_v61 = vld [vmem:[#allocation14_spill] sm:$0xff]  ;;  %v4883_v2 = vld [vmem:[#allocation15_spill] sm:$0xff]  ;;  %s4884_s8 = sld [smem:[#allocation37_spill]] }
 0x145   :  { %v470_v53 = vmul.f32 %v4877_v14, %v460_v60  ;;  %vm3175_vm3 = vmand %vm4878_vm4, %vm442_vm1  ;;  %v441_v35 = vadd.f32 %v439_v42, %v436_v27  ;;  %v4881_v26 = vmov %v4877_v14  ;;  %v495_v60 = vsel %vm493_vm11, %v4883_v2, %v4882_v61  ;;  %1419 = vrot.lane.b32.xlu0 %v2243_v59, %s2179_s28 }
 0x146   :  { %v471_v54 = vmul.f32 %v4881_v26, %v459_v50  ;;  %v500_v37 = vsel %vm493_vm11, %v4875_v41, %v4876_v21  ;;  %v415_v42 = vsel %vm3144_vm0, %v405_v40, 0.0  ;;  %v4885_v27 = vstv %s2541_s12  ;;  %v3198_v26 = vpop.permute.xlu0 %877  ;;  %v3224_v18 = vpop.permute.xlu1 %879  ;;  %1421 = vrot.lane.b32.xlu1 %v2265_v3, %s2179_s28  ;;  %s3255_s12 = sld [smem:[#allocation2 + $0x4d]] }
 0x147   :  { %v475_v50 = vadd.f32 %v473_v33, %v470_v53  ;;  %v508_v14 = vmul.f32 %v4885_v27, %v501_v49  ;;  %vm596_vm1 = vcmp.lt.s32.totalorder %v2546_v63, 29  ;;  %v4886_v41 = vsel %vm2849_vm7, %v2809_v13, 0.0  ;;  %v4895_v33 = vld [vmem:[#allocation21_spill] sm:$0xff] }
 0x148   :  { %v3207_v21 = vadd.f32 %v380_v10, %v4886_v41  ;;  %v416_v40 = vsel %vm153_vm12, %v406_v32, 0.0  ;;  %v476_v45 = vadd.f32 %v474_v38, %v471_v54  ;;  %v494_v13 = vsel %vm493_vm11, %v4882_v61, %v4883_v2 }
 0x149   :  { %vm631_vm7 = vcmp.lt.s32.totalorder %v2546_v63, 19  ;;  %v383_v32 = vadd.f32 %v381_v31, %v2916_v8  ;;  %v450_v49 = vsel %vm3175_vm3, %v440_v4, 0.0  ;;  %v4890_v38 = vmov %v4885_v27  ;;  %1426 = vrot.lane.b32.xlu0 %v2232_v52, %s2179_s28  ;;  %v4915_v4 = vld [vmem:[#allocation25_spill] sm:$0xff] }
 0x14a   :  { %v4889_v10 = vstv %s4884_s8  ;;  %v509_v54 = vmul.f32 %v4890_v38, %v500_v37  ;;  %v3237_v61 = vadd.f32 %v415_v42, %v2937_v16  ;;  %vm4891_vm10 = vcmp.ge.s32.totalorder %v2581_v57, 2  ;;  %v3253_v42 = vpop.permute.xlu0 %905  ;;  %1428 = vrot.lane.b32.xlu1 %v2253_v0, %s2179_s28  ;;  %s3290_s8 = sld [smem:[#allocation2 + $0x1d]] }
 0x14b   :  { %v505_v53 = vmul.f32 %v4889_v10, %v495_v60  ;;  %v451_v8 = vsel %vm4891_vm10, %v441_v35, 0.0  ;;  %vm545_vm11 = vcmp.ge.s32.totalorder %v2546_v63, 31  ;;  %vm561_vm0 = vcmp.lt.s32.totalorder %v2546_v63, 30  ;;  %s4926_s28 = sld [smem:[#allocation42_spill]] }
 0x14c   :  { %v3247_v36 = vadd.f32 %v416_v40, %v2925_v24  ;;  %v485_v16 = vsel %vm3215_vm15, %v475_v50, 0.0  ;;  %v4892_v2 = vmov %v4889_v10  ;;  %v3258_v35 = vadd.f32 %v450_v49, %v2971_v22  ;;  %v3262_v24 = vpop.permute.xlu1 %907  ;;  %v4898_v49 = vld [vmem:[#allocation19_spill] sm:$0xff] }
 0x14d   :  { %v506_v60 = vmul.f32 %v4892_v2, %v494_v13  ;;  %v510_v37 = vadd.f32 %v508_v14, %v505_v53  ;;  %v486_v27 = vsel %vm4758_vm5, %v476_v45, 0.0  ;;  %v3267_v50 = vadd.f32 %v451_v8, %v2982_v44  ;;  %v4896_v13 = vld [vmem:[#allocation20_spill] sm:$0xff]  ;;  %v4897_v45 = vld [vmem:[#allocation18_spill] sm:$0xff] }
 0x14e   :  { %4893 = vst [vmem:[#allocation13_spill] sm:$0xff] %v3258_v35  ;;  %v533_v10 = vsel %vm526_vm2, %v4896_v13, %v4895_v33  ;;  %v534_v22 = vsel %vm526_vm2, %v4895_v33, %v4896_v13  ;;  %vm615_vm4 = vcmp.ge.s32.totalorder %v2546_v63, 29  ;;  %v3280_v44 = vadd.f32 %v485_v16, %v3036_v58  ;;  %v3301_v2 = vpop.permute.xlu0 %912 }
 0x14f   :  { %4894 = vst [vmem:[#allocation11_spill] sm:$0xff] %v3267_v50  ;;  %v511_v14 = vadd.f32 %v509_v54, %v506_v60  ;;  %v528_v53 = vsel %vm526_vm2, %v4898_v49, %v4897_v45  ;;  %vm650_vm3 = vcmp.ge.s32.totalorder %v2546_v63, 19  ;;  %v3293_v8 = vadd.f32 %v486_v27, %v3050_v5  ;;  %v4903_v5 = vld [vmem:[#allocation29_spill] sm:$0xff] }
 0x150   :  { %v518_v58 = vsel %vm512_vm8, %v510_v37, 0.0  ;;  %v527_v16 = vsel %vm526_vm2, %v4897_v45, %v4898_v49  ;;  %v4900_v33 = vstv %s2552_s14  ;;  %v603_v27 = vsel %vm596_vm1, %v4903_v5, %v4902_v25  ;;  %v3316_v45 = vpop.permute.xlu1 %914  ;;  %s2180_s14 = smov 96  }
 0x151   :  { %v541_v13 = vmul.f32 %v4900_v33, %v534_v22  ;;  %v4901_v43 = vmov %v4900_v33  ;;  %v604_v37 = vsel %vm596_vm1, %v4902_v25, %v4903_v5  ;;  %vm944_vm2 = vcmp.lt.s32.totalorder %v2546_v63, 1  ;;  %v4906_v33 = vld [vmem:[#allocation36_spill] sm:$0xff]  ;;  %1454 = vrot.lane.b32.xlu0 %v2243_v59, %s2180_s14  ;;  %v4908_v5 = vld [vmem:[#allocation28_spill] sm:$0xff]  ;;  %1456 = vrot.lane.b32.xlu1 %v2265_v3, %s2180_s14 }
 0x152   :  { %v542_v56 = vmul.f32 %v4901_v43, %v533_v10  ;;  %v3319_v49 = vadd.f32 %v511_v14, %v383_v32  ;;  %v4904_v22 = vstv %s4899_s5  ;;  %vm580_vm8 = vcmp.ge.s32.totalorder %v2546_v63, 30  ;;  %v4905_v10 = vld [vmem:[#allocation35_spill] sm:$0xff]  ;;  %v3354_v40 = vpop.permute.xlu0 %940  ;;  %s3408_s5 = sld [smem:[#allocation2 + $0x4f]] }
 0x153   :  { %v538_v43 = vmul.f32 %v4904_v22, %v528_v53  ;;  %v639_v51 = vsel %vm631_vm7, %v4906_v33, %v4905_v10  ;;  %vm666_vm15 = vcmp.lt.s32.totalorder %v2546_v63, 18  ;;  %v3332_v32 = vadd.f32 %v518_v58, %v3207_v21 }
 0x154   :  { %v4907_v14 = vmov %v4904_v22  ;;  %v4909_v22 = vld [vmem:[#allocation26_spill] sm:$0xff]  ;;  %vm1005_vm10 = vcmp.lt.s32.totalorder %v2546_v63, 127  ;;  %v4910_v21 = vstv %s2574_s15  ;;  %s3386_s15 = sld [smem:[#allocation2 + $0x4e]] }
 0x155   :  { %v539_v53 = vmul.f32 %v4907_v14, %v527_v16  ;;  %v597_v60 = vsel %vm596_vm1, %v4909_v22, %v4908_v5  ;;  %v598_v54 = vsel %vm596_vm1, %v4908_v5, %v4909_v22  ;;  %v611_v58 = vmul.f32 %v4910_v21, %v604_v37  ;;  %v4912_v14 = vld [vmem:[#allocation33_spill] sm:$0xff]  ;;  %v4914_v22 = vld [vmem:[#allocation24_spill] sm:$0xff]  ;;  %1461 = vrot.lane.b32.xlu0 %v2232_v52, %s2180_s14 }
 0x156   :  { %v4911_v25 = vmov %v4910_v21  ;;  %v633_v38 = vsel %vm631_vm7, %v4913_v20, %v4912_v14  ;;  %v543_v41 = vadd.f32 %v541_v13, %v538_v43  ;;  %v569_v34 = vsel %vm561_vm0, %v4915_v4, %v4914_v22  ;;  %v4920_v13 = vld [vmem:[#allocation23_spill] sm:$0xff]  ;;  %1463 = vrot.lane.b32.xlu1 %v2253_v0, %s2180_s14  ;;  %s4255_s14 = sld [smem:[#allocation2 + $0x25]] }
 0x157   :  { %v612_v16 = vmul.f32 %v4911_v25, %v603_v27  ;;  %v544_v5 = vadd.f32 %v542_v56, %v539_v53  ;;  %v4916_v37 = vstv %s2594_s2  ;;  %v3363_v25 = vpop.permute.xlu1 %942  ;;  %vm4917_vm1 = vcmp.lt.s32.totalorder %v2562_v62, 15  ;;  %v4921_v56 = vld [vmem:[#allocation22_spill] sm:$0xff] }
 0x158   :  { %v646_v27 = vmul.f32 %v4916_v37, %v639_v51  ;;  %vm3369_vm5 = vmand %vm4917_vm1, %vm545_vm11  ;;  %v562_v43 = vsel %vm561_vm0, %v4921_v56, %v4920_v13  ;;  %v4922_v53 = vstv %s2568_s29  ;;  %v638_v51 = vsel %vm631_vm7, %v4905_v10, %v4906_v33  ;;  %s3400_s29 = sld [smem:[#allocation2 + $0x1e]] }
 0x159   :  { %v608_v31 = vmul.f32 %v4922_v53, %v598_v54  ;;  %v4923_v15 = vmov %v4922_v53  ;;  %v563_v37 = vsel %vm561_vm0, %v4920_v13, %v4921_v56  ;;  %v4924_v54 = vstv %s2584_s16  ;;  %v948_v56 = vpop.permute.xlu0 %947  ;;  %s2182_s16 = smov 94  }
 0x15a   :  { %v609_v11 = vmul.f32 %v4923_v15, %v597_v60  ;;  %v568_v15 = vsel %vm561_vm0, %v4914_v22, %v4915_v4  ;;  %v643_v60 = vmul.f32 %v4924_v54, %v633_v38  ;;  %v4925_v33 = vstv %s2564_s20  ;;  %vm3418_vm0 = vmand %vm4759_vm14, %vm615_vm4  ;;  %s4967_s20 = sld [smem:[#allocation51_spill]] }
 0x15b   :  { %v576_v53 = vmul.f32 %v4925_v33, %v569_v34  ;;  %v613_v29 = vadd.f32 %v611_v58, %v608_v31  ;;  %v632_v13 = vsel %vm631_vm7, %v4912_v14, %v4913_v20  ;;  %v553_v4 = vsel %vm3369_vm5, %v543_v41, 0.0  ;;  %v950_v41 = vpop.permute.xlu1 %949 }
 0x15c   :  { %v614_v50 = vadd.f32 %v612_v16, %v609_v11  ;;  %vm4927_vm11 = vcmp.lt.s32.totalorder %v2581_v57, 15  ;;  %v4930_v34 = vstv %s2594_s2  ;;  %v648_v31 = vadd.f32 %v646_v27, %v643_v60  ;;  %s2181_s2 = smov 95   ;;  %v4938_v60 = vld [vmem:[#allocation44_spill] sm:$0xff] }
 0x15d   :  { %v554_v38 = vsel %vm4927_vm11, %v544_v5, 0.0  ;;  %v647_v20 = vmul.f32 %v4930_v34, %v638_v51  ;;  %vm685_vm7 = vcmp.ge.s32.totalorder %v2546_v63, 18  ;;  %vm701_vm5 = vcmp.lt.s32.totalorder %v2546_v63, 17  ;;  %1487 = vrot.lane.b32.xlu0 %v2243_v59, %s2181_s2  ;;  %1489 = vrot.lane.b32.xlu1 %v2265_v3, %s2181_s2 }
 0x15e   :  { %vm736_vm1 = vcmp.lt.s32.totalorder %v2546_v63, 16  ;;  %v4931_v58 = vstv %s4926_s28  ;;  %vm4933_vm4 = vcmp.ge.s32.totalorder %v2562_v62, 3  ;;  %vm804_vm14 = vcmp.lt.s32.totalorder %v2546_v63, 14  ;;  %s4291_s28 = sld [smem:[#allocation2 + $0x57]] }
 0x15f   :  { %v573_v16 = vmul.f32 %v4931_v58, %v563_v37  ;;  %v4932_v14 = vmov %v4931_v58  ;;  %vm3435_vm11 = vmand %vm4933_vm4, %vm650_vm3  ;;  %v3442_v27 = vsel %vm944_vm2, %v948_v56, %v950_v41  ;;  %v3446_v21 = vsel %vm944_vm2, %v950_v41, %v948_v56 }
 0x160   :  { %v574_v5 = vmul.f32 %v4932_v14, %v562_v43  ;;  %v4936_v43 = vmov %v4925_v33  ;;  %v4937_v37 = vmov %v4924_v54  ;;  %v4939_v33 = vld [vmem:[#allocation43_spill] sm:$0xff]  ;;  %vm1040_vm3 = vcmp.lt.s32.totalorder %v2546_v63, 126  ;;  %v1002_v14 = vpop.permute.xlu0 %1001  ;;  %vm3476_vm4 = vmand %vm333_vm9, %vm580_vm8 }
 0x161   :  { %v577_v51 = vmul.f32 %v4936_v43, %v568_v15  ;;  %v644_v54 = vmul.f32 %v4937_v37, %v632_v13  ;;  %v673_v34 = vsel %vm666_vm15, %v4939_v33, %v4938_v60  ;;  %v674_v56 = vsel %vm666_vm15, %v4938_v60, %v4939_v33  ;;  %1494 = vrot.lane.b32.xlu0 %v2232_v52, %s2181_s2 }
 0x162   :  { %v3464_v15 = vadd.f32 %v553_v4, %v3237_v61  ;;  %v3466_v13 = vadd.f32 %v576_v53, %v573_v16  ;;  %v623_v41 = vsel %vm3418_vm0, %v613_v29, 0.0  ;;  %v624_v58 = vsel %vm371_vm6, %v614_v50, 0.0  ;;  %v4944_v29 = vld [vmem:[#allocation40_spill] sm:$0xff]  ;;  %v4945_v4 = vld [vmem:[#allocation38_spill] sm:$0xff]  ;;  %v1004_v16 = vpop.permute.xlu1 %1003  ;;  %1496 = vrot.lane.b32.xlu1 %v2253_v0, %s2181_s2  ;;  %s4317_s2 = sld [smem:[#allocation2 + $0x58]] }
 0x163   :  { %v4941_v43 = vmov 0  ;;  %v649_v61 = vadd.f32 %v647_v20, %v644_v54  ;;  %v658_v53 = vsel %vm3435_vm11, %v648_v31, 0.0  ;;  %v667_v50 = vsel %vm666_vm15, %v4945_v4, %v4944_v29 }
 0x164   :  { %4940 = vst [vmem:[#allocation12_spill] sm:$0xff] %v3466_v13  ;;  %v4942_v43 = vsel %vm3476_vm4, 4294967295, %v4941_v43  ;;  %v668_v11 = vsel %vm666_vm15, %v4944_v29, %v4945_v4  ;;  %v4946_v37 = vstv %s2610_s10  ;;  %v1006_v31 = vsel %vm1005_vm10, %v1002_v14, %v1004_v16  ;;  %s2183_s10 = smov 93  }
 0x165   :  { %4943 = vst [vmem:[#allocation16_spill] sm:$0xff] %v4942_v43  ;;  %v681_v60 = vmul.f32 %v4946_v37, %v674_v56  ;;  %v4947_v20 = vmov %v4946_v37  ;;  %v1007_v22 = vsel %vm1005_vm10, %v1004_v16, %v1002_v14  ;;  %v3500_v33 = vadd.f32 %v554_v38, %v3247_v36  ;;  %v1009_v16 = vpop.permute.xlu0 %1008  ;;  %1522 = vrot.lane.b32.xlu0 %v2243_v59, %s2182_s16 }
 0x166   :  { %v682_v54 = vmul.f32 %v4947_v20, %v673_v34  ;;  %v3502_v10 = vadd.f32 %v577_v51, %v574_v5  ;;  %v4949_v56 = vstv %s2602_s1  ;;  %v3516_v38 = vadd.f32 %v623_v41, %v3280_v44  ;;  %1524 = vrot.lane.b32.xlu1 %v2265_v3, %s2182_s16  ;;  %s4978_s1 = sld [smem:[#allocation47_spill]] }
 0x167   :  { %v678_v37 = vmul.f32 %v4949_v56, %v668_v11  ;;  %v4950_v20 = vmov %v4949_v56  ;;  %v3519_v5 = vadd.f32 %v624_v58, %v3293_v8  ;;  %v659_v51 = vsel %vm153_vm12, %v649_v61, 0.0  ;;  %v1011_v11 = vpop.permute.xlu1 %1010 }
 0x168   :  { %4948 = vst [vmem:[#allocation17_spill] sm:$0xff] %v3502_v10  ;;  %v679_v14 = vmul.f32 %v4950_v20, %v667_v50  ;;  %v3524_v34 = vadd.f32 %v658_v53, %v3332_v32  ;;  %v1012_v20 = vsel %vm1005_vm10, %v1009_v16, %v1011_v11  ;;  %v1013_v44 = vsel %vm1005_vm10, %v1011_v11, %v1009_v16 }
 0x169   :  { %v3526_v56 = vadd.f32 %v681_v60, %v678_v37  ;;  %vm823_vm8 = vcmp.ge.s32.totalorder %v2546_v63, 14  ;;  %v4951_v8 = vstv %s3125_s24  ;;  %v4953_v61 = vstv %s3138_s4  ;;  %v1037_v11 = vpop.permute.xlu0 %1036  ;;  %1529 = vrot.lane.b32.xlu0 %v2232_v52, %s2182_s16  ;;  %s4141_s24 = sld [smem:[#allocation2 + $0x52]]  ;;  %s2189_s4 = smov 78  }
 0x16a   :  { %v684_v50 = vadd.f32 %v682_v54, %v679_v14  ;;  %v1017_v41 = vmul.f32 %v4951_v8, %v1006_v31  ;;  %v4952_v32 = vmov %v4951_v8  ;;  %v1020_v53 = vmul.f32 %v4953_v61, %v1012_v20  ;;  %v4959_v14 = vld [vmem:[#allocation45_spill] sm:$0xff]  ;;  %1531 = vrot.lane.b32.xlu1 %v2253_v0, %s2182_s16  ;;  %s4332_s16 = sld [smem:[#allocation2 + $0x28]] }
 0x16b   :  { %v1018_v58 = vmul.f32 %v4952_v32, %v1007_v22  ;;  %v4954_v60 = vmov %v4953_v61  ;;  %vm1075_vm15 = vcmp.lt.s32.totalorder %v2546_v63, 125  ;;  %v3547_v37 = vadd.f32 %v659_v51, %v3319_v49  ;;  %v4958_v22 = vld [vmem:[#allocation46_spill] sm:$0xff]  ;;  %v1039_v61 = vpop.permute.xlu1 %1038 }
 0x16c   :  { %v1021_v54 = vmul.f32 %v4954_v60, %v1013_v44  ;;  %vm4955_vm10 = vcmp.ge.s32.totalorder %v2562_v62, 2  ;;  %v3561_v16 = vsel %vm701_vm5, %v4959_v14, %v4958_v22  ;;  %v703_v49 = vsel %vm701_vm5, %v4958_v22, %v4959_v14  ;;  %v4962_v22 = vld [vmem:[#allocation53_spill] sm:$0xff] }
 0x16d   :  { %vm3553_vm0 = vmand %vm4955_vm10, %vm685_vm7  ;;  %v738_v51 = vsel %vm736_vm1, %v2693_v46, %v2684_v9  ;;  %vm963_vm7 = vcmp.ge.s32.totalorder %v2546_v63, 1  ;;  %v805_v20 = vsel %vm804_vm14, %v2921_v47, %v2929_v6  ;;  %v806_v44 = vsel %vm804_vm14, %v2929_v6, %v2921_v47  ;;  %1557 = vrot.lane.b32.xlu0 %v2243_v59, %s2183_s10 }
 0x16e   :  { %v3580_v8 = vadd.f32 %v1020_v53, %v1017_v41  ;;  %v3582_v32 = vadd.f32 %v1021_v54, %v1018_v58  ;;  %vm769_vm11 = vcmp.lt.s32.totalorder %v2546_v63, 15  ;;  %v811_v60 = vsel %vm804_vm14, %v2962_v23, %v2977_v7  ;;  %1559 = vrot.lane.b32.xlu1 %v2265_v3, %s2183_s10 }
 0x16f   :  { %v812_v47 = vsel %vm804_vm14, %v2977_v7, %v2962_v23  ;;  %v1041_v6 = vsel %vm1040_vm3, %v1037_v11, %v1039_v61  ;;  %v1042_v41 = vsel %vm1040_vm3, %v1039_v61, %v1037_v11  ;;  %v693_v58 = vsel %vm3553_vm0, %v3526_v56, 0.0  ;;  %vm3676_vm0 = vmand %vm333_vm9, %vm823_vm8 }
 0x170   :  { %vm4960_vm10 = vcmp.ge.s32.totalorder %v2581_v57, 2  ;;  %v737_v23 = vsel %vm736_vm1, %v2684_v9, %v2693_v46  ;;  %v4961_v7 = vstv %s2648_s23  ;;  %v743_v56 = vsel %vm736_vm1, %v4962_v22, %v2752_v55  ;;  %v1044_v9 = vpop.permute.xlu0 %1043  ;;  %vm3701_vm8 = vmand %vm4762_vm13, %vm963_vm7 }
 0x171   :  { %v694_v53 = vsel %vm4960_vm10, %v684_v50, 0.0  ;;  %v748_v54 = vmul.f32 %v4961_v7, %v738_v51  ;;  %v744_v50 = vsel %vm736_vm1, %v2752_v55, %v4962_v22  ;;  %v4963_v31 = vstv %s2754_s21  ;;  %v4968_v22 = vld [vmem:[#allocation41_spill] sm:$0xff]  ;;  %1564 = vrot.lane.b32.xlu0 %v2232_v52, %s2183_s10  ;;  %s4999_s21 = sld [smem:[#allocation52_spill]] }
 0x172   :  { %v816_v14 = vmul.f32 %v4963_v31, %v806_v44  ;;  %v4964_v11 = vmov %v4963_v31  ;;  %vm755_vm14 = vcmp.ge.s32.totalorder %v2546_v63, 16  ;;  %v4965_v51 = vstv %s2773_s17  ;;  %v1046_v44 = vpop.permute.xlu1 %1045  ;;  %1566 = vrot.lane.b32.xlu1 %v2253_v0, %s2183_s10  ;;  %s2185_s17 = smov 82   ;;  %s4386_s10 = sld [smem:[#allocation2 + $0x29]] }
 0x173   :  { %v817_v46 = vmul.f32 %v4964_v11, %v805_v20  ;;  %v819_v61 = vmul.f32 %v4965_v51, %v812_v47  ;;  %v4966_v7 = vmov %v4965_v51  ;;  %v945_v55 = vsel %vm944_vm2, %v3354_v40, %v3363_v25 }
 0x174   :  { %v820_v36 = vmul.f32 %v4966_v7, %v811_v60  ;;  %v946_v20 = vsel %vm944_vm2, %v3363_v25, %v3354_v40  ;;  %vm1095_vm1 = vcmp.lt.s32.totalorder %v4968_v22, 253  ;;  %v4969_v31 = vstv %s3104_s19  ;;  %s4135_s19 = sld [smem:[#allocation2 + $0x21]] }
 0x175   :  { %v959_v47 = vmul.f32 %v4969_v31, %v3446_v21  ;;  %v4970_v60 = vmov %v4969_v31  ;;  %v1047_v51 = vsel %vm1040_vm3, %v1044_v9, %v1046_v44  ;;  %v1048_v7 = vsel %vm1040_vm3, %v1046_v44, %v1044_v9 }
 0x176   :  { %v960_v11 = vmul.f32 %v4970_v60, %v3442_v27  ;;  %v4971_v40 = vstv %s3159_s7  ;;  %v4973_v13 = vstv %s3169_s6  ;;  %vm1110_vm2 = vcmp.lt.s32.totalorder %v2546_v63, 115  ;;  %s4175_s7 = sld [smem:[#allocation2 + $0x22]] }
 0x177   :  { %v1052_v25 = vmul.f32 %v4971_v40, %v1041_v6  ;;  %v4972_v4 = vmov %v4971_v40  ;;  %v1055_v43 = vmul.f32 %v4973_v13, %v1047_v51  ;;  %v4974_v21 = vmov %v4973_v13  ;;  %v1072_v13 = vpop.permute.xlu0 %1071  ;;  %s4183_s6 = sld [smem:[#allocation2 + $0x53]] }
 0x178   :  { %v1053_v29 = vmul.f32 %v4972_v4, %v1042_v41  ;;  %v1056_v31 = vmul.f32 %v4974_v21, %v1048_v7  ;;  %v4975_v27 = vstv %s4967_s20  ;;  %vm874_vm3 = vcmp.lt.s32.totalorder %v2546_v63, 3  ;;  %v1074_v21 = vpop.permute.xlu1 %1073  ;;  %s4339_s20 = sld [smem:[#allocation2 + $0x59]] }
 0x179   :  { %v751_v60 = vmul.f32 %v4975_v27, %v744_v50  ;;  %v4976_v35 = vmov %v4975_v27  ;;  %v4977_v9 = vstv %s3076_s22  ;;  %v821_v41 = vadd.f32 %v819_v61, %v816_v14  ;;  %s4081_s22 = sld [smem:[#allocation2 + $0x51]] }
 0x17a   :  { %v752_v10 = vmul.f32 %v4976_v35, %v743_v56  ;;  %v956_v44 = vmul.f32 %v4977_v9, %v946_v20  ;;  %v4979_v6 = vmov %v4977_v9  ;;  %v822_v51 = vadd.f32 %v820_v36, %v817_v46 }
 0x17b   :  { %v957_v4 = vmul.f32 %v4979_v6, %v945_v55  ;;  %v3668_v7 = vadd.f32 %v1055_v43, %v1052_v25  ;;  %v3670_v40 = vadd.f32 %v1056_v31, %v1053_v29  ;;  %v1076_v55 = vsel %vm1075_vm15, %v1072_v13, %v1074_v21  ;;  %v1079_v31 = vpop.permute.xlu0 %1078 }
 0x17c   :  { %v961_v56 = vadd.f32 %v959_v47, %v956_v44  ;;  %v1077_v43 = vsel %vm1075_vm15, %v1074_v21, %v1072_v13  ;;  %v695_v29 = vadd.f32 %v693_v58, %v3464_v15  ;;  %v4982_v36 = vstv %s4978_s1  ;;  %v4988_v58 = vld [vmem:[#allocation49_spill] sm:$0xff]  ;;  %s4388_s1 = sld [smem:[#allocation2 + $0x5a]] }
 0x17d   :  { %v962_v50 = vadd.f32 %v960_v11, %v957_v4  ;;  %v3688_v14 = vmul.f32 %v4982_v36, %v703_v49  ;;  %v4983_v46 = vmov %v4982_v36  ;;  %v4984_v20 = vstv %s2648_s23  ;;  %v4987_v49 = vld [vmem:[#allocation50_spill] sm:$0xff]  ;;  %v1081_v4 = vpop.permute.xlu1 %1080  ;;  %s2184_s23 = smov 83  }
 0x17e   :  { %v3693_v61 = vmul.f32 %v4983_v46, %v3561_v16  ;;  %v749_v47 = vmul.f32 %v4984_v20, %v737_v23  ;;  %v696_v15 = vadd.f32 %v694_v53, %v3500_v33  ;;  %v3711_v16 = vsel %vm701_vm5, %v4988_v58, %v4987_v49  ;;  %v4989_v33 = vld [vmem:[#allocation55_spill] sm:$0xff]  ;;  %v4990_v53 = vld [vmem:[#allocation54_spill] sm:$0xff]  ;;  %1592 = vrot.lane.b32.xlu0 %v2243_v59, %s2184_s23 }
 0x17f   :  { %v3717_v23 = vsel %vm701_vm5, %v4987_v49, %v4988_v58  ;;  %v753_v25 = vadd.f32 %v751_v60, %v748_v54  ;;  %v770_v9 = vsel %vm769_vm11, %v4990_v53, %v4989_v33  ;;  %v831_v44 = vsel %vm3676_vm0, %v821_v41, 0.0  ;;  %1594 = vrot.lane.b32.xlu1 %v2265_v3, %s2184_s23  ;;  %vm3763_vm0 = vmand %vm371_vm6, %vm1095_vm1  ;;  %v1107_v49 = vpop.permute.xlu0 %1106 }
 0x180   :  { %v3719_v27 = vadd.f32 %v752_v10, %v749_v47  ;;  %vm4991_vm7 = vcmp.lt.s32.totalorder %v2581_v57, 14  ;;  %vm893_vm5 = vcmp.ge.s32.totalorder %v2546_v63, 3  ;;  %vm909_vm10 = vcmp.lt.s32.totalorder %v2546_v63, 2 }
 0x181   :  { %v832_v6 = vsel %vm4991_vm7, %v822_v51, 0.0  ;;  %v971_v10 = vsel %vm3701_vm8, %v961_v56, 0.0  ;;  %vm4992_vm13 = vcmp.ge.s32.totalorder %v2581_v57, 1  ;;  %v1082_v60 = vsel %vm1075_vm15, %v1079_v31, %v1081_v4 }
 0x182   :  { %v972_v54 = vsel %vm4992_vm13, %v962_v50, 0.0  ;;  %v1083_v13 = vsel %vm1075_vm15, %v1081_v4, %v1079_v31  ;;  %v4993_v41 = vstv %s3191_s9  ;;  %v4995_v36 = vstv %s3201_s27  ;;  %v1109_v31 = vpop.permute.xlu1 %1108  ;;  %1599 = vrot.lane.b32.xlu0 %v2232_v52, %s2184_s23  ;;  %s2190_s9 = smov 77   ;;  %s4203_s27 = sld [smem:[#allocation2 + $0x23]] }
 0x183   :  { %v1087_v51 = vmul.f32 %v4993_v41, %v1076_v55  ;;  %v4994_v21 = vmov %v4993_v41  ;;  %v1090_v46 = vmul.f32 %v4995_v36, %v1082_v60  ;;  %v4996_v20 = vmov %v4995_v36  ;;  %1601 = vrot.lane.b32.xlu1 %v2253_v0, %s2184_s23  ;;  %s4390_s23 = sld [smem:[#allocation2 + $0x2a]] }
 0x184   :  { %v1088_v35 = vmul.f32 %v4994_v21, %v1077_v43  ;;  %v1091_v56 = vmul.f32 %v4996_v20, %v1083_v13  ;;  %vm1145_vm13 = vcmp.lt.s32.totalorder %v2546_v63, 114  ;;  %v3752_v50 = vsel %vm755_vm14, %v753_v25, 0.0 }
 0x185   :  { %v771_v47 = vsel %vm769_vm11, %v4989_v33, %v4990_v53  ;;  %v833_v55 = vadd.f32 %v831_v44, %v695_v29  ;;  %v834_v11 = vadd.f32 %v832_v6, %v696_v15  ;;  %vm1025_vm15 = vcmp.lt.s32.totalorder %v4968_v22, 255 }
 0x186   :  { %v881_v58 = vsel %vm874_vm3, %v3198_v26, %v3224_v18  ;;  %v882_v29 = vsel %vm874_vm3, %v3224_v18, %v3198_v26  ;;  %v1092_v15 = vadd.f32 %v1090_v46, %v1087_v51  ;;  %v1093_v25 = vadd.f32 %v1091_v56, %v1088_v35  ;;  %1627 = vrot.lane.b32.xlu0 %v2243_v59, %s2185_s17 }
 0x187   :  { %vm788_vm14 = vcmp.ge.s32.totalorder %v2546_v63, 15  ;;  %v973_v33 = vadd.f32 %v971_v10, %v833_v55  ;;  %v974_v53 = vadd.f32 %v972_v54, %v834_v11  ;;  %v1111_v44 = vsel %vm1110_vm2, %v1107_v49, %v1109_v31  ;;  %v1116_v55 = vpop.permute.xlu1 %1115  ;;  %1629 = vrot.lane.b32.xlu1 %v2265_v3, %s2185_s17 }
 0x188   :  { %v1112_v6 = vsel %vm1110_vm2, %v1109_v31, %v1107_v49  ;;  %v875_v26 = vsel %vm874_vm3, %v3136_v48, %v3157_v1  ;;  %v876_v18 = vsel %vm874_vm3, %v3157_v1, %v3136_v48  ;;  %vm5000_vm1 = vcmp.lt.s32.totalorder %v2562_v62, 13  ;;  %v1114_v48 = vpop.permute.xlu0 %1113 }
 0x189   :  { %v1102_v4 = vsel %vm5000_vm1, %v1092_v15, 0.0  ;;  %v1103_v10 = vsel %vm3763_vm0, %v1093_v25, 0.0  ;;  %v5001_v54 = vstv %s2895_s25  ;;  %v5003_v1 = vstv %s4999_s21  ;;  %s3989_s25 = sld [smem:[#allocation2 + $0x1f]] }
 0x18a   :  { %v889_v60 = vmul.f32 %v5001_v54, %v882_v29  ;;  %v5002_v13 = vmov %v5001_v54  ;;  %v3798_v51 = vadd.f32 %v1102_v4, %v973_v33  ;;  %v3800_v21 = vadd.f32 %v1103_v10, %v974_v53  ;;  %1634 = vrot.lane.b32.xlu0 %v2232_v52, %s2185_s17  ;;  %s4392_s21 = sld [smem:[#allocation2 + $0x5b]] }
 0x18b   :  { %v890_v41 = vmul.f32 %v5002_v13, %v881_v58  ;;  %v781_v35 = vmul.f32 %v5003_v1, %v771_v47  ;;  %v5004_v36 = vmov %v5003_v1  ;;  %v776_v20 = vsel %vm769_vm11, %v2873_v12, %v2884_v17  ;;  %1636 = vrot.lane.b32.xlu1 %v2253_v0, %s2185_s17  ;;  %s4394_s17 = sld [smem:[#allocation2 + $0x2b]] }
 0x18c   :  { %v782_v46 = vmul.f32 %v5004_v36, %v770_v9  ;;  %v777_v56 = vsel %vm769_vm11, %v2884_v17, %v2873_v12  ;;  %vm1165_vm3 = vcmp.lt.s32.totalorder %v4968_v22, 242  ;;  %v5005_v11 = vstv %s2858_s13  ;;  %s5013_s13 = sld [smem:[#allocation48_spill]]  ;;  %v1144_v36 = vpop.permute.xlu1 %1143 }
 0x18d   :  { %v886_v47 = vmul.f32 %v5005_v11, %v876_v18  ;;  %v5006_v43 = vmov %v5005_v11  ;;  %v1117_v9 = vsel %vm1110_vm2, %v1114_v48, %v1116_v55  ;;  %v1118_v58 = vsel %vm1110_vm2, %v1116_v55, %v1114_v48 }
 0x18e   :  { %v887_v49 = vmul.f32 %v5006_v43, %v875_v26  ;;  %vm928_vm11 = vcmp.ge.s32.totalorder %v2546_v63, 2  ;;  %v5007_v12 = vstv %s3234_s11  ;;  %v5009_v25 = vstv %s3255_s12  ;;  %s4213_s11 = sld [smem:[#allocation2 + $0x54]] }
 0x18f   :  { %v1122_v17 = vmul.f32 %v5007_v12, %v1111_v44  ;;  %v5008_v29 = vmov %v5007_v12  ;;  %v1125_v31 = vmul.f32 %v5009_v25, %v1117_v9  ;;  %v5010_v33 = vmov %v5009_v25  ;;  %v1142_v44 = vpop.permute.xlu0 %1141  ;;  %s4229_s12 = sld [smem:[#allocation2 + $0x24]] }
 0x190   :  { %v1123_v15 = vmul.f32 %v5008_v29, %v1112_v6  ;;  %v1126_v53 = vmul.f32 %v5010_v33, %v1118_v58  ;;  %vm1180_vm8 = vcmp.lt.s32.totalorder %v2546_v63, 113  ;;  %v5011_v26 = vstv %s2729_s0  ;;  %v1151_v25 = vpop.permute.xlu1 %1150  ;;  %s2186_s0 = smov 81  }
 0x191   :  { %v784_v18 = vmul.f32 %v5011_v26, %v777_v56  ;;  %v5012_v4 = vmov %v5011_v26  ;;  %v891_v54 = vadd.f32 %v889_v60, %v886_v47  ;;  %v892_v13 = vadd.f32 %v890_v41, %v887_v49  ;;  %1662 = vrot.lane.b32.xlu0 %v2243_v59, %s2186_s0  ;;  %1664 = vrot.lane.b32.xlu1 %v2265_v3, %s2186_s0 }
 0x192   :  { %v785_v10 = vmul.f32 %v5012_v4, %v776_v20  ;;  %vm1060_vm2 = vcmp.lt.s32.totalorder %v4968_v22, 254  ;;  %vm5014_vm7 = vcmp.ge.s32.totalorder %v2562_v62, 3  ;;  %v910_v48 = vsel %vm909_vm10, %v3253_v42, %v3262_v24 }
 0x193   :  { %vm3846_vm0 = vmand %vm5014_vm7, %vm893_vm5  ;;  %v911_v60 = vsel %vm909_vm10, %v3262_v24, %v3253_v42  ;;  %v3858_v41 = vadd.f32 %v1125_v31, %v1122_v17  ;;  %v3860_v1 = vadd.f32 %v1126_v53, %v1123_v15  ;;  %v916_v20 = vsel %vm909_vm10, %v3301_v2, %v3316_v45 }
 0x194   :  { %v917_v56 = vsel %vm909_vm10, %v3316_v45, %v3301_v2  ;;  %v1146_v55 = vsel %vm1145_vm13, %v1142_v44, %v1144_v36  ;;  %v1147_v42 = vsel %vm1145_vm13, %v1144_v36, %v1142_v44  ;;  %v5017_v24 = vstv %s5013_s13  ;;  %v1179_v49 = vpop.permute.xlu1 %1178  ;;  %s4398_s13 = sld [smem:[#allocation2 + $0x5c]] }
 0x195   :  { %v716_v11 = vmul.f32 %v5017_v24, %v3717_v23  ;;  %v5018_v47 = vmov %v5017_v24  ;;  %v763_v2 = vadd.f32 %v3752_v50, %v3516_v38  ;;  %v764_v45 = vadd.f32 %v3719_v27, %v3519_v5  ;;  %1669 = vrot.lane.b32.xlu0 %v2232_v52, %s2186_s0  ;;  %1671 = vrot.lane.b32.xlu1 %v2253_v0, %s2186_s0  ;;  %s4402_s0 = sld [smem:[#allocation2 + $0x2c]] }
 0x196   :  { %v717_v43 = vmul.f32 %v5018_v47, %v3711_v16  ;;  %vm5019_vm5 = vcmp.lt.s32.totalorder %v2581_v57, 15  ;;  %v786_v23 = vadd.f32 %v784_v18, %v781_v35  ;;  %v787_v9 = vadd.f32 %v785_v10, %v782_v46  ;;  %v1149_v16 = vpop.permute.xlu0 %1148 }
 0x197   :  { %vm3890_vm10 = vmand %vm5019_vm5, %vm1025_vm15  ;;  %vm839_vm1 = vcmp.lt.s32.totalorder %v2546_v63, 13  ;;  %v901_v38 = vsel %vm3846_vm0, %v891_v54, 0.0  ;;  %v902_v5 = vsel %vm153_vm12, %v892_v13, 0.0  ;;  %vm5022_vm15 = vcmp.lt.s32.totalorder %v2562_v62, 15 }
 0x198   :  { %vm3905_vm7 = vmand %vm5022_vm15, %vm788_vm14  ;;  %v5025_v50 = vstv %s2932_s26  ;;  %v5027_v12 = vstv %s3006_s18  ;;  %vm1200_vm0 = vcmp.lt.s32.totalorder %v4968_v22, 241  ;;  %v1033_v33 = vsel %vm3890_vm10, %v3582_v32, 0.0  ;;  %s3997_s26 = sld [smem:[#allocation2 + $0x50]]  ;;  %s2187_s18 = smov 80  }
 0x199   :  { %v921_v35 = vmul.f32 %v5025_v50, %v911_v60  ;;  %v5026_v46 = vmov %v5025_v50  ;;  %v924_v17 = vmul.f32 %v5027_v12, %v917_v56  ;;  %v5028_v29 = vmov %v5027_v12  ;;  %vm5029_vm5 = vmmov %vm5022_vm15  ;;  %1697 = vrot.lane.b32.xlu0 %v2243_v59, %s2187_s18  ;;  %1699 = vrot.lane.b32.xlu1 %v2265_v3, %s2187_s18 }
 0x19a   :  { %v922_v58 = vmul.f32 %v5026_v46, %v910_v48  ;;  %v925_v15 = vmul.f32 %v5028_v29, %v916_v20  ;;  %v1032_v31 = vsel %vm5029_vm5, %v3580_v8, 0.0  ;;  %v1152_v53 = vsel %vm1145_vm13, %v1149_v16, %v1151_v25  ;;  %v1177_v56 = vpop.permute.xlu0 %1176 }
 0x19b   :  { %v1153_v26 = vsel %vm1145_vm13, %v1151_v25, %v1149_v16  ;;  %v5030_v18 = vstv %s3290_s8  ;;  %v5032_v13 = vstv %s3386_s15  ;;  %vm1215_vm14 = vcmp.lt.s32.totalorder %v2546_v63, 112  ;;  %s4239_s8 = sld [smem:[#allocation2 + $0x55]] }
 0x19c   :  { %v1157_v4 = vmul.f32 %v5030_v18, %v1146_v55  ;;  %v5031_v10 = vmov %v5030_v18  ;;  %v1160_v8 = vmul.f32 %v5032_v13, %v1152_v53  ;;  %v5033_v44 = vmov %v5032_v13  ;;  %s4265_s15 = sld [smem:[#allocation2 + $0x56]] }
 0x19d   :  { %v1158_v54 = vmul.f32 %v5031_v10, %v1147_v42  ;;  %v1161_v6 = vmul.f32 %v5033_v44, %v1153_v26  ;;  %vm720_vm10 = vcmp.ge.s32.totalorder %v2546_v63, 17  ;;  %v796_v32 = vsel %vm3905_vm7, %v786_v23, 0.0  ;;  %1704 = vrot.lane.b32.xlu0 %v2232_v52, %s2187_s18  ;;  %1706 = vrot.lane.b32.xlu1 %v2253_v0, %s2187_s18  ;;  %s4412_s18 = sld [smem:[#allocation2 + $0x5e]] }
 0x19e   :  { %vm5034_vm13 = vcmp.lt.s32.totalorder %v2581_v57, 15  ;;  %v903_v60 = vadd.f32 %v901_v38, %v763_v2  ;;  %v904_v36 = vadd.f32 %v902_v5, %v764_v45  ;;  %vm5035_vm15 = vcmp.ge.s32.totalorder %v2581_v57, 2  ;;  %v1184_v46 = vpop.permute.xlu0 %1183 }
 0x19f   :  { %v797_v48 = vsel %vm5034_vm13, %v787_v9, 0.0  ;;  %vm3950_vm5 = vmand %vm5035_vm15, %vm1165_vm3  ;;  %v926_v55 = vadd.f32 %v924_v17, %v921_v35  ;;  %v927_v42 = vadd.f32 %v925_v15, %v922_v58  ;;  %v1162_v24 = vadd.f32 %v1160_v8, %v1157_v4  ;;  %v1186_v17 = vpop.permute.xlu1 %1185 }
 0x1a0   :  { %v1163_v47 = vadd.f32 %v1161_v6, %v1158_v54  ;;  %vm5038_vm7 = vcmp.ge.s32.totalorder %v2562_v62, 2  ;;  %v1034_v45 = vadd.f32 %v1032_v31, %v903_v60  ;;  %v1035_v23 = vadd.f32 %v1033_v33, %v904_v36 }
 0x1a1   :  { %vm3958_vm13 = vmand %vm5038_vm7, %vm928_vm11  ;;  %v1181_v9 = vsel %vm1180_vm8, %v1177_v56, %v1179_v49  ;;  %v1182_v38 = vsel %vm1180_vm8, %v1179_v49, %v1177_v56  ;;  %v3969_v5 = vadd.f32 %v716_v11, %v3688_v14  ;;  %v3972_v16 = vadd.f32 %v717_v43, %v3693_v61 }
 0x1a2   :  { %vm858_vm3 = vcmp.ge.s32.totalorder %v2546_v63, 13  ;;  %vm5041_vm11 = vcmp.lt.s32.totalorder %v2581_v57, 14  ;;  %v1172_v50 = vsel %vm5038_vm7, %v1162_v24, 0.0  ;;  %v1173_v14 = vsel %vm3950_vm5, %v1163_v47, 0.0  ;;  %v1212_v44 = vpop.permute.xlu0 %1211 }
 0x1a3   :  { %vm3979_vm15 = vmand %vm5041_vm11, %vm1060_vm2  ;;  %v798_v61 = vadd.f32 %v796_v32, %v3524_v34  ;;  %v799_v11 = vadd.f32 %v797_v48, %v3547_v37  ;;  %v3993_v43 = vadd.f32 %v1172_v50, %v1034_v45  ;;  %v3995_v35 = vadd.f32 %v1173_v14, %v1035_v23 }
 0x1a4   :  { %v846_v58 = vsel %vm839_vm1, %v3074_v30, %v3088_v39  ;;  %v847_v34 = vsel %vm839_vm1, %v3088_v39, %v3074_v30  ;;  %v936_v37 = vsel %vm3958_vm13, %v926_v55, 0.0  ;;  %vm5044_vm2 = vcmp.ge.s32.totalorder %v2581_v57, 2 }
 0x1a5   :  { %v937_v12 = vsel %vm5044_vm2, %v927_v42, 0.0  ;;  %v1067_v29 = vsel %vm333_vm9, %v3668_v7, 0.0  ;;  %v1068_v15 = vsel %vm3979_vm15, %v3670_v40, 0.0  ;;  %v1187_v25 = vsel %vm1180_vm8, %v1184_v46, %v1186_v17 }
 0x1a6   :  { %v1188_v30 = vsel %vm1180_vm8, %v1186_v17, %v1184_v46  ;;  %v5045_v39 = vstv %s3400_s29  ;;  %v5047_v7 = vstv %s3408_s5  ;;  %v840_v40 = vsel %vm839_vm1, %v3015_v28, %v3027_v19  ;;  %s4281_s29 = sld [smem:[#allocation2 + $0x26]] }
 0x1a7   :  { %v1192_v31 = vmul.f32 %v5045_v39, %v1181_v9  ;;  %v5046_v33 = vmov %v5045_v39  ;;  %v1195_v26 = vmul.f32 %v5047_v7, %v1187_v25  ;;  %v5048_v18 = vmov %v5047_v7  ;;  %s4307_s5 = sld [smem:[#allocation2 + $0x27]] }
 0x1a8   :  { %v1193_v53 = vmul.f32 %v5046_v33, %v1182_v38  ;;  %v1196_v4 = vmul.f32 %v5048_v18, %v1188_v30  ;;  %v841_v10 = vsel %vm839_vm1, %v3027_v19, %v3015_v28  ;;  %v938_v54 = vadd.f32 %v936_v37, %v798_v61  ;;  %v1214_v28 = vpop.permute.xlu1 %1213  ;;  %v1219_v61 = vpop.permute.xlu0 %1218  ;;  %v5070_v18 = vld [vmem:[#allocation11_spill] sm:$0xff] }
 0x1a9   :  { %v939_v13 = vadd.f32 %v937_v12, %v799_v11  ;;  %vm5049_vm8 = vcmp.ge.s32.totalorder %v2581_v57, 1  ;;  %v5052_v6 = vstv %s2839_s30  ;;  %v1197_v36 = vadd.f32 %v1195_v26, %v1192_v31  ;;  %s4073_s30 = sld [smem:[#allocation2 + $0x20]]  ;;  %v5060_v11 = vld [vmem:[#allocation17_spill] sm:$0xff] }
 0x1aa   :  { %vm4043_vm5 = vmand %vm5049_vm8, %vm1200_vm0  ;;  %v854_v32 = vmul.f32 %v5052_v6, %v847_v34  ;;  %v5053_v48 = vmov %v5052_v6  ;;  %v1198_v20 = vadd.f32 %v1196_v4, %v1193_v53  ;;  %v1069_v19 = vadd.f32 %v1067_v29, %v938_v54  ;;  %v5066_v31 = vld [vmem:[#allocation13_spill] sm:$0xff]  ;;  %v5068_v53 = vld [vmem:[#allocation12_spill] sm:$0xff] }
 0x1ab   :  { %v855_v60 = vmul.f32 %v5053_v48, %v846_v58  ;;  %v1070_v56 = vadd.f32 %v1068_v15, %v939_v13  ;;  %v1216_v55 = vsel %vm1215_vm14, %v1212_v44, %v1214_v28  ;;  %v1217_v42 = vsel %vm1215_vm14, %v1214_v28, %v1212_v44  ;;  %vm5062_vm15 = vmmov %vm5049_vm8 }
 0x1ac   :  { %vm5054_vm1 = vcmp.ge.s32.totalorder %v2562_v62, 1  ;;  %v5057_v47 = vstv %s2788_s3  ;;  %v1208_v9 = vsel %vm4043_vm5, %v1198_v20, 0.0  ;;  %v1226_v50 = vstv %s3989_s25  ;;  %v1221_v37 = vpop.permute.xlu1 %1220  ;;  %s2188_s3 = smov 79   ;;  %s4404_s25 = sld [smem:[#allocation2 + $0x5d]] }
 0x1ad   :  { %vm4060_vm0 = vmand %vm5054_vm1, %vm720_vm10  ;;  %v851_v49 = vmul.f32 %v5057_v47, %v841_v10  ;;  %v5058_v2 = vmov %v5057_v47  ;;  %v4077_v27 = vadd.f32 %v1208_v9, %v1070_v56  ;;  %v1229_v14 = vstv %s3997_s26  ;;  %1730 = vrot.lane.b32.xlu0 %v2243_v59, %s2188_s3  ;;  %1732 = vrot.lane.b32.xlu1 %v2265_v3, %s2188_s3  ;;  %s4408_s26 = sld [smem:[#allocation2 + $0x2d]] }
 0x1ae   :  { %v852_v45 = vmul.f32 %v5058_v2, %v840_v40  ;;  %vm5059_vm13 = vmmov %vm5054_vm1  ;;  %v728_v12 = vsel %vm4060_vm0, %v3969_v5, 0.0  ;;  %v729_v17 = vsel %vm5062_vm15, %v3972_v16, 0.0  ;;  %vm5063_vm7 = vcmp.lt.s32.totalorder %v2562_v62, 13  ;;  %v1245_v40 = vpop.permute.xlu0 %1244  ;;  %v5074_v2 = vld [vmem:[#allocation58_spill] sm:$0xff] }
 0x1af   :  { %v1207_v23 = vsel %vm5059_vm13, %v1197_v36, 0.0  ;;  %vm5061_vm10 = vmmov %vm5041_vm11  ;;  %v856_v58 = vadd.f32 %v854_v32, %v851_v49  ;;  %vm1248_vm11 = vcmp.lt.s32.totalorder %v2546_v63, 111  ;;  %v1222_v15 = vsel %vm1215_vm14, %v1219_v61, %v1221_v37  ;;  %v5073_v49 = vld [vmem:[#allocation56_spill] sm:$0xff] }
 0x1b0   :  { %v4075_v38 = vadd.f32 %v1207_v23, %v1069_v19  ;;  %v589_v46 = vsel %vm5061_vm10, %v5060_v11, 0.0  ;;  %v857_v34 = vadd.f32 %v855_v60, %v852_v45  ;;  %vm4097_vm2 = vmand %vm5063_vm7, %vm858_vm3  ;;  %v1223_v25 = vsel %vm1215_vm14, %v1221_v37, %v1219_v61  ;;  %v1247_v44 = vpop.permute.xlu1 %1246  ;;  %v5077_v23 = vld [vmem:[#allocation59_spill] sm:$0xff] }
 0x1b1   :  { %v1227_v5 = vmul.f32 %v1226_v50, %v1216_v55  ;;  %v1228_v30 = vmul.f32 %v1226_v50, %v1217_v42  ;;  %v1230_v16 = vmul.f32 %v1229_v14, %v1222_v15  ;;  %v1231_v39 = vmul.f32 %v1229_v14, %v1223_v25  ;;  %1737 = vrot.lane.b32.xlu0 %v2232_v52, %s2188_s3 }
 0x1b2   :  { %v5069_v7 = vsel %vm3476_vm4, %v5068_v53, 0.0  ;;  %v591_v4 = vadd.f32 %v589_v46, %v5070_v18  ;;  %vm1130_vm3 = vcmp.lt.s32.totalorder %v4968_v22, 243  ;;  %vm1235_vm14 = vcmp.lt.s32.totalorder %v4968_v22, 240  ;;  %1739 = vrot.lane.b32.xlu1 %v2253_v0, %s2188_s3  ;;  %v1252_v47 = vpop.permute.xlu0 %1251  ;;  %s4427_s3 = sld [smem:[#allocation2 + $0x2f]] }
 0x1b3   :  { %v590_v26 = vadd.f32 %v5069_v7, %v5066_v31  ;;  %v866_v10 = vsel %vm4097_vm2, %v856_v58, 0.0  ;;  %v867_v54 = vsel %vm371_vm6, %v857_v34, 0.0  ;;  %v1232_v13 = vadd.f32 %v1230_v16, %v1227_v5  ;;  %vm4126_vm4 = vmand %vm153_vm12, %vm1130_vm3 }
 0x1b4   :  { %v1233_v8 = vadd.f32 %v1231_v39, %v1228_v30  ;;  %v731_v32 = vadd.f32 %v729_v17, %v591_v4  ;;  %v1249_v48 = vsel %vm1248_vm11, %v1245_v40, %v1247_v44  ;;  %v1250_v60 = vsel %vm1248_vm11, %v1247_v44, %v1245_v40  ;;  %v1254_v50 = vpop.permute.xlu1 %1253 }
 0x1b5   :  { %v730_v6 = vadd.f32 %v728_v12, %v590_v26  ;;  %v4131_v28 = vadd.f32 %v1232_v13, %v3798_v51  ;;  %v1259_v19 = vstv %s4073_s30  ;;  %v1262_v24 = vstv %s4081_s22  ;;  %v5076_v51 = vld [vmem:[#allocation57_spill] sm:$0xff]  ;;  %1765 = vrot.lane.b32.xlu0 %v2243_v59, %s2189_s4  ;;  %s4414_s30 = sld [smem:[#allocation2 + $0x2e]] }
 0x1b6   :  { %v1241_v20 = vsel %vm1235_vm14, %v1233_v8, 0.0  ;;  %v869_v55 = vadd.f32 %v867_v54, %v731_v32  ;;  %vm5075_vm8 = vcmask 1041409   ;;  %vm1268_vm1 = vcmp.lt.s32.totalorder %v4968_v22, 239  ;;  %1767 = vrot.lane.b32.xlu1 %v2265_v3, %s2189_s4  ;;  %s4421_s22 = sld [smem:[#allocation2 + $0x5f]] }
 0x1b7   :  { %v868_v56 = vadd.f32 %v866_v10, %v730_v6  ;;  %v4138_v42 = vadd.f32 %v1241_v20, %v3800_v21  ;;  %v995_v45 = vsel %vm5075_vm8, %v5074_v2, %v5073_v49  ;;  %vm5078_vm5 = vmmov %vm5075_vm8  ;;  %vm1283_vm0 = vcmp.lt.s32.totalorder %v2546_v63, 110 }
 0x1b8   :  { %v996_v9 = vsel %vm5078_vm5, %v5077_v23, %v5076_v51  ;;  %vm5079_vm13 = vcmp.ge.s32.totalorder %v2562_v62, 3  ;;  %v1138_v14 = vsel %vm4126_vm4, %v3860_v1, 0.0  ;;  %v1255_v61 = vsel %vm1248_vm11, %v1252_v47, %v1254_v50  ;;  %v1280_v1 = vpop.permute.xlu0 %1279  ;;  %v1282_v15 = vpop.permute.xlu1 %1281 }
 0x1b9   :  { %v1137_v21 = vsel %vm5079_vm13, %v3858_v41, 0.0  ;;  %v1256_v11 = vsel %vm1248_vm11, %v1254_v50, %v1252_v47  ;;  %v1260_v46 = vmul.f32 %v1259_v19, %v1249_v48  ;;  %v1261_v58 = vmul.f32 %v1259_v19, %v1250_v60  ;;  %1772 = vrot.lane.b32.xlu0 %v2232_v52, %s2189_s4 }
 0x1ba   :  { %v1263_v34 = vmul.f32 %v1262_v24, %v1255_v61  ;;  %v1264_v37 = vmul.f32 %v1262_v24, %v1256_v11  ;;  %v999_v41 = vadd.f32 %v995_v45, %v868_v56  ;;  %v1000_v12 = vadd.f32 %v996_v9, %v869_v55  ;;  %1774 = vrot.lane.b32.xlu1 %v2253_v0, %s2189_s4  ;;  %s4460_s4 = sld [smem:[#allocation2 + $0x61]] }
 0x1bb   :  { %vm5080_vm10 = vcmp.lt.s32.totalorder %v2581_v57, 15  ;;  %v1284_v30 = vsel %vm1283_vm0, %v1280_v1, %v1282_v15  ;;  %v1285_v16 = vsel %vm1283_vm0, %v1282_v15, %v1280_v1  ;;  %vm5081_vm11 = vcmp.lt.s32.totalorder %v2562_v62, 15 }
 0x1bc   :  { %vm1270_vm15 = vmand %vm5080_vm10, %vm1268_vm1  ;;  %v1265_v17 = vadd.f32 %v1263_v34, %v1260_v46  ;;  %v1266_v29 = vadd.f32 %v1264_v37, %v1261_v58  ;;  %v1139_v25 = vadd.f32 %v1137_v21, %v999_v41  ;;  %v1140_v5 = vadd.f32 %v1138_v14, %v1000_v12  ;;  %v1287_v18 = vpop.permute.xlu0 %1286  ;;  %v1289_v4 = vpop.permute.xlu1 %1288 }
 0x1bd   :  { %v1294_v7 = vstv %s4135_s19  ;;  %v1297_v26 = vstv %s4141_s24  ;;  %vm1303_vm7 = vcmp.lt.s32.totalorder %v4968_v22, 238  ;;  %v1290_v40 = vsel %vm1283_vm0, %v1287_v18, %v1289_v4  ;;  %1800 = vrot.lane.b32.xlu0 %v2243_v59, %s2190_s9  ;;  %s4435_s19 = sld [smem:[#allocation2 + $0x60]] }
 0x1be   :  { %v1275_v39 = vsel %vm5081_vm11, %v1265_v17, 0.0  ;;  %v1276_v31 = vsel %vm1270_vm15, %v1266_v29, 0.0  ;;  %v1291_v10 = vsel %vm1283_vm0, %v1289_v4, %v1287_v18  ;;  %vm1318_vm2 = vcmp.lt.s32.totalorder %v2546_v63, 109  ;;  %1802 = vrot.lane.b32.xlu1 %v2265_v3, %s2190_s9  ;;  %s4443_s24 = sld [smem:[#allocation2 + $0x30]] }
 0x1bf   :  { %v4177_v33 = vadd.f32 %v1275_v39, %v1139_v25  ;;  %v4179_v53 = vadd.f32 %v1276_v31, %v1140_v5  ;;  %v1295_v54 = vmul.f32 %v1294_v7, %v1284_v30  ;;  %v1296_v13 = vmul.f32 %v1294_v7, %v1285_v16 }
 0x1c0   :  { %v1298_v8 = vmul.f32 %v1297_v26, %v1290_v40  ;;  %v1299_v44 = vmul.f32 %v1297_v26, %v1291_v10  ;;  %vm5082_vm3 = vcmp.lt.s32.totalorder %v2581_v57, 14  ;;  %v1315_v6 = vpop.permute.xlu0 %1314  ;;  %v1317_v60 = vpop.permute.xlu1 %1316  ;;  %v1329_v55 = vstv %s4175_s7  ;;  %s2192_s7 = smov [#allocation7]  }
 0x1c1   :  { %vm1305_vm14 = vmand %vm5082_vm3, %vm1303_vm7  ;;  %v1319_v59 = vsel %vm1318_vm2, %v1315_v6, %v1317_v60  ;;  %v1320_v36 = vsel %vm1318_vm2, %v1317_v60, %v1315_v6  ;;  %1807 = vrot.lane.b32.xlu0 %v2232_v52, %s2190_s9  ;;  %v1332_v24 = vstv %s4183_s6  ;;  %vm1338_vm4 = vcmp.lt.s32.totalorder %v4968_v22, 237  ;;  %s1907_s6 = sshll.u32 %s2192_s7, 4  ;;  %s1908_s6 = int_to_ptr.vmem [resolvable:$true] %s1907_s6 }
 0x1c2   :  { %v1300_v32 = vadd.f32 %v1298_v8, %v1295_v54  ;;  %v1301_v48 = vadd.f32 %v1299_v44, %v1296_v13  ;;  %1809 = vrot.lane.b32.xlu1 %v2253_v0, %s2190_s9  ;;  %vm1353_vm8 = vcmp.lt.s32.totalorder %v2546_v63, 99  ;;  %vm1340_vm5 = vmand %vm371_vm6, %vm1338_vm4  ;;  %vm5083_vm1 = vcmp.lt.s32.totalorder %v2562_v62, 13  ;;  %s2113_s9 = scalar_lea.vmem %s1908_s6, 256  ;;  %p2118_p6 = scmp.lt.s32.totalorder %s1908_s6, %s1908_s6 }
 0x1c3   :  { %v1364_v34 = vstv %s4203_s27  ;;  %v1367_v37 = vstv %s4213_s11  ;;  %vm1373_vm0 = vcmp.lt.s32.totalorder %v4968_v22, 227  ;;  %vm1388_vm13 = vcmp.lt.s32.totalorder %v2546_v63, 98  ;;  %p2114_p5 = scmp.ne.s32.totalorder %s1908_s6, %s2113_s9  ;;  %p2119_p7 = scmp.lt.s32.totalorder %s2113_s9, %s2113_s9 }
 0x1c4   :  { %v1310_v20 = vsel %vm333_vm9, %v1300_v32, 0.0  ;;  %v1311_v3 = vsel %vm1305_vm14, %v1301_v48, 0.0  ;;  %v1322_v47 = vpop.permute.xlu0 %1321  ;;  %v1324_v52 = vpop.permute.xlu1 %1323  ;;  %vm1375_vm10 = vmand %vm153_vm12, %vm1373_vm0  ;;  %vm5084_vm15 = vcmp.ge.s32.totalorder %v2562_v62, 3  ;;  %v1399_v40 = vstv %s4229_s12 }
 0x1c5   :  { %v4206_v19 = vadd.f32 %v1310_v20, %v3993_v43  ;;  %v4209_v56 = vadd.f32 %v1311_v3, %v3995_v35  ;;  %v1325_v49 = vsel %vm1318_vm2, %v1322_v47, %v1324_v52  ;;  %v1326_v0 = vsel %vm1318_vm2, %v1324_v52, %v1322_v47  ;;  %p2120_p8 = por %p2119_p7, %p2118_p6 }
 0x1c6   :  { %v1330_v43 = vmul.f32 %v1329_v55, %v1319_v59  ;;  %v1331_v35 = vmul.f32 %v1329_v55, %v1320_v36  ;;  %v1333_v2 = vmul.f32 %v1332_v24, %v1325_v49  ;;  %v1334_v45 = vmul.f32 %v1332_v24, %v1326_v0 }
 0x1c7   :  { %v1402_v10 = vstv %s4239_s8  ;;  %vm1408_vm11 = vcmp.lt.s32.totalorder %v4968_v22, 226  ;;  %vm1423_vm7 = vcmp.lt.s32.totalorder %v2546_v63, 97  ;;  %vm5085_vm2 = vcmp.ge.s32.totalorder %v2581_v57, 2  ;;  %p2121_p9 = pnand %p2120_p8, %p2114_p5 }
 0x1c8   :  { %v1350_v51 = vpop.permute.xlu0 %1349  ;;  %v1335_v23 = vadd.f32 %v1333_v2, %v1330_v43  ;;  %v1336_v9 = vadd.f32 %v1334_v45, %v1331_v35  ;;  %v1352_v50 = vpop.permute.xlu1 %1351  ;;  %vm1410_vm3 = vmand %vm5085_vm2, %vm1408_vm11  ;;  %vm5086_vm14 = vcmp.ge.s32.totalorder %v2562_v62, 2  ;;  %v1434_v49 = vstv %s4255_s14 }
 0x1c9   :  { %v1354_v21 = vsel %vm1353_vm8, %v1350_v51, %v1352_v50  ;;  %v1355_v14 = vsel %vm1353_vm8, %v1352_v50, %v1350_v51  ;;  %v1437_v0 = vstv %s4265_s15  ;;  %vm1443_vm4 = vcmp.lt.s32.totalorder %v4968_v22, 225 }
 0x1ca   :  { %v1345_v61 = vsel %vm5083_vm1, %v1335_v23, 0.0  ;;  %v1346_v11 = vsel %vm1340_vm5, %v1336_v9, 0.0  ;;  %vm5087_vm5 = vcmp.ge.s32.totalorder %v2581_v57, 1  ;;  %vm5088_vm0 = vcmp.ge.s32.totalorder %v2562_v62, 1 }
 0x1cb   :  { %v4232_v46 = vadd.f32 %v1345_v61, %v4075_v38  ;;  %v4235_v58 = vadd.f32 %v1346_v11, %v4077_v27  ;;  %v1365_v38 = vmul.f32 %v1364_v34, %v1354_v21  ;;  %v1366_v27 = vmul.f32 %v1364_v34, %v1355_v14  ;;  %vm1445_vm1 = vmand %vm5087_vm5, %vm1443_vm4 }
 0x1cc   :  { %v1357_v41 = vpop.permute.xlu0 %1356  ;;  %v1359_v12 = vpop.permute.xlu1 %1358  ;;  %vm1526_vm11 = vcmp.lt.s32.totalorder %v2546_v63, 94  ;;  %vm5091_vm4 = vcmp.lt.s32.totalorder %v2581_v57, 14  ;;  %vm1561_vm5 = vcmp.lt.s32.totalorder %v2546_v63, 93 }
 0x1cd   :  { %v1360_v1 = vsel %vm1353_vm8, %v1357_v41, %v1359_v12  ;;  %v1361_v17 = vsel %vm1353_vm8, %v1359_v12, %v1357_v41  ;;  %vm1458_vm8 = vcmp.lt.s32.totalorder %v2546_v63, 96 }
 0x1ce   :  { %v1368_v29 = vmul.f32 %v1367_v37, %v1360_v1  ;;  %v1369_v15 = vmul.f32 %v1367_v37, %v1361_v17  ;;  %v1469_v1 = vstv %s4281_s29  ;;  %v1472_v17 = vstv %s4291_s28 }
 0x1d0   :  { %v1385_v25 = vpop.permute.xlu0 %1384  ;;  %v1370_v5 = vadd.f32 %v1368_v29, %v1365_v38  ;;  %v1371_v30 = vadd.f32 %v1369_v15, %v1366_v27  ;;  %v1387_v16 = vpop.permute.xlu1 %1386 }
 0x1d1   :  { %v1389_v39 = vsel %vm1388_vm13, %v1385_v25, %v1387_v16  ;;  %v1390_v31 = vsel %vm1388_vm13, %v1387_v16, %v1385_v25 }
 0x1d2   :  { %v1380_v7 = vsel %vm5084_vm15, %v1370_v5, 0.0  ;;  %v1381_v26 = vsel %vm1375_vm10, %v1371_v30, 0.0  ;;  %vm1478_vm10 = vcmp.lt.s32.totalorder %v4968_v22, 224  ;;  %vm1511_vm15 = vcmp.lt.s32.totalorder %v4968_v22, 223 }
 0x1d3   :  { %v4258_v18 = vadd.f32 %v1380_v7, %v4131_v28  ;;  %v4261_v4 = vadd.f32 %v1381_v26, %v4138_v42  ;;  %v1400_v28 = vmul.f32 %v1399_v40, %v1389_v39  ;;  %v1401_v42 = vmul.f32 %v1399_v40, %v1390_v31 }
 0x1d4   :  { %v1392_v54 = vpop.permute.xlu0 %1391  ;;  %v1394_v13 = vpop.permute.xlu1 %1393 }
 0x1d5   :  { %v1395_v8 = vsel %vm1388_vm13, %v1392_v54, %v1394_v13  ;;  %v1396_v44 = vsel %vm1388_vm13, %v1394_v13, %v1392_v54  ;;  %vm1491_vm13 = vcmp.lt.s32.totalorder %v2546_v63, 95  ;;  %v1502_v13 = vstv %s4307_s5 }
 0x1d6   :  { %v1403_v6 = vmul.f32 %v1402_v10, %v1395_v8  ;;  %v1404_v32 = vmul.f32 %v1402_v10, %v1396_v44  ;;  %v1505_v8 = vstv %s4317_s2 }
 0x1d8   :  { %v1420_v48 = vpop.permute.xlu0 %1419  ;;  %v1405_v60 = vadd.f32 %v1403_v6, %v1400_v28  ;;  %v1406_v59 = vadd.f32 %v1404_v32, %v1401_v42  ;;  %v1422_v36 = vpop.permute.xlu1 %1421 }
 0x1d9   :  { %v1424_v20 = vsel %vm1423_vm7, %v1420_v48, %v1422_v36  ;;  %v1425_v3 = vsel %vm1423_vm7, %v1422_v36, %v1420_v48 }
 0x1da   :  { %v1415_v55 = vsel %vm5086_vm14, %v1405_v60, 0.0  ;;  %v1416_v24 = vsel %vm1410_vm3, %v1406_v59, 0.0  ;;  %vm5090_vm3 = vcmp.lt.s32.totalorder %v2562_v62, 15  ;;  %vm1546_vm14 = vcmp.lt.s32.totalorder %v4968_v22, 222 }
 0x1db   :  { %v4284_v47 = vadd.f32 %v1415_v55, %v4177_v33  ;;  %v4287_v52 = vadd.f32 %v1416_v24, %v4179_v53  ;;  %v1435_v33 = vmul.f32 %v1434_v49, %v1424_v20  ;;  %v1436_v53 = vmul.f32 %v1434_v49, %v1425_v3 }
 0x1dc   :  { %v1427_v43 = vpop.permute.xlu0 %1426  ;;  %v1429_v35 = vpop.permute.xlu1 %1428 }
 0x1dd   :  { %v1430_v2 = vsel %vm1423_vm7, %v1427_v43, %v1429_v35  ;;  %v1431_v45 = vsel %vm1423_vm7, %v1429_v35, %v1427_v43  ;;  %vm5089_vm7 = vcmp.lt.s32.totalorder %v2581_v57, 15  ;;  %v1537_v35 = vstv %s4332_s16 }
 0x1de   :  { %v1438_v51 = vmul.f32 %v1437_v0, %v1430_v2  ;;  %v1439_v23 = vmul.f32 %v1437_v0, %v1431_v45  ;;  %vm1513_vm2 = vmand %vm5089_vm7, %vm1511_vm15  ;;  %v1540_v2 = vstv %s4339_s20  ;;  %vm1651_vm15 = vcmp.lt.s32.totalorder %v4968_v22, 210 }
 0x1df   :  { %vm1734_vm7 = vcmp.lt.s32.totalorder %v2546_v63, 79 }
 0x1e0   :  { %v1455_v9 = vpop.permute.xlu0 %1454  ;;  %v1440_v50 = vadd.f32 %v1438_v51, %v1435_v33  ;;  %v1441_v21 = vadd.f32 %v1439_v23, %v1436_v53  ;;  %v1457_v14 = vpop.permute.xlu1 %1456 }
 0x1e1   :  { %v1459_v61 = vsel %vm1458_vm8, %v1455_v9, %v1457_v14  ;;  %v1460_v11 = vsel %vm1458_vm8, %v1457_v14, %v1455_v9 }
 0x1e2   :  { %v1450_v34 = vsel %vm5088_vm0, %v1440_v50, 0.0  ;;  %v1451_v37 = vsel %vm1445_vm1, %v1441_v21, 0.0  ;;  %v1471_v25 = vmul.f32 %v1469_v1, %v1460_v11  ;;  %vm1596_vm1 = vcmp.lt.s32.totalorder %v2546_v63, 83 }
 0x1e3   :  { %v4310_v41 = vadd.f32 %v1450_v34, %v4206_v19  ;;  %v4313_v12 = vadd.f32 %v1451_v37, %v4209_v56  ;;  %v1470_v19 = vmul.f32 %v1469_v1, %v1459_v61  ;;  %vm1581_vm0 = vcmp.lt.s32.totalorder %v4968_v22, 221 }
 0x1e4   :  { %v1462_v38 = vpop.permute.xlu0 %1461  ;;  %v1464_v27 = vpop.permute.xlu1 %1463 }
 0x1e5   :  { %v1465_v29 = vsel %vm1458_vm8, %v1462_v38, %v1464_v27  ;;  %v1466_v15 = vsel %vm1458_vm8, %v1464_v27, %v1462_v38  ;;  %vm1548_vm8 = vmand %vm5091_vm4, %vm1546_vm14  ;;  %vm1754_vm14 = vcmp.lt.s32.totalorder %v4968_v22, 207 }
 0x1e6   :  { %v1473_v56 = vmul.f32 %v1472_v17, %v1465_v29  ;;  %v1474_v5 = vmul.f32 %v1472_v17, %v1466_v15 }
 0x1e8   :  { %v1488_v30 = vpop.permute.xlu0 %1487  ;;  %v1475_v16 = vadd.f32 %v1473_v56, %v1470_v19  ;;  %v1476_v39 = vadd.f32 %v1474_v5, %v1471_v25  ;;  %v1490_v31 = vpop.permute.xlu1 %1489 }
 0x1e9   :  { %v1492_v7 = vsel %vm1491_vm13, %v1488_v30, %v1490_v31  ;;  %v1493_v26 = vsel %vm1491_vm13, %v1490_v31, %v1488_v30 }
 0x1ea   :  { %v1484_v40 = vsel %vm1478_vm10, %v1476_v39, 0.0  ;;  %v4330_v10 = vadd.f32 %v1475_v16, %v4232_v46  ;;  %v1503_v6 = vmul.f32 %v1502_v13, %v1492_v7  ;;  %vm1631_vm10 = vcmp.lt.s32.totalorder %v2546_v63, 82 }
 0x1eb   :  { %v4335_v54 = vadd.f32 %v1484_v40, %v4235_v58  ;;  %v1504_v58 = vmul.f32 %v1502_v13, %v1493_v26  ;;  %v1572_v26 = vstv %s4386_s10  ;;  %v1575_v40 = vstv %s4388_s1 }
 0x1ec   :  { %v1495_v44 = vpop.permute.xlu0 %1494  ;;  %v1497_v28 = vpop.permute.xlu1 %1496  ;;  %v1607_v13 = vstv %s4390_s23 }
 0x1ed   :  { %v1498_v42 = vsel %vm1491_vm13, %v1495_v44, %v1497_v28  ;;  %v1499_v46 = vsel %vm1491_vm13, %v1497_v28, %v1495_v44  ;;  %vm1616_vm13 = vcmp.lt.s32.totalorder %v4968_v22, 211  ;;  %v1642_v28 = vstv %s4394_s17 }
 0x1ee   :  { %v1506_v32 = vmul.f32 %v1505_v8, %v1498_v42  ;;  %v1507_v48 = vmul.f32 %v1505_v8, %v1499_v46  ;;  %v1610_v8 = vstv %s4392_s21  ;;  %v1645_v42 = vstv %s4398_s13  ;;  %vm4498_vm4 = vmand %vm153_vm12, %vm1616_vm13 }
 0x1ef   :  { %v1677_v46 = vstv %s4402_s0  ;;  %vm1686_vm12 = vcmp.lt.s32.totalorder %v4968_v22, 209 }
 0x1f0   :  { %v1523_v60 = vpop.permute.xlu0 %1522  ;;  %v1508_v59 = vadd.f32 %v1506_v32, %v1503_v6  ;;  %v1509_v36 = vadd.f32 %v1507_v48, %v1504_v58  ;;  %v1525_v20 = vpop.permute.xlu1 %1524  ;;  %v1680_v6 = vstv %s4404_s25 }
 0x1f1   :  { %v1527_v3 = vsel %vm1526_vm11, %v1523_v60, %v1525_v20  ;;  %v1528_v55 = vsel %vm1526_vm11, %v1525_v20, %v1523_v60  ;;  %v1712_v60 = vstv %s4408_s26 }
 0x1f2   :  { %v1518_v24 = vsel %vm5090_vm3, %v1508_v59, 0.0  ;;  %v1519_v49 = vsel %vm1513_vm2, %v1509_v36, 0.0  ;;  %v1538_v23 = vmul.f32 %v1537_v35, %v1527_v3  ;;  %v1539_v9 = vmul.f32 %v1537_v35, %v1528_v55 }
 0x1f3   :  { %v4356_v0 = vadd.f32 %v1518_v24, %v4258_v18  ;;  %v4359_v43 = vadd.f32 %v1519_v49, %v4261_v4  ;;  %v1715_v36 = vstv %s4412_s18  ;;  %vm1769_vm2 = vcmp.lt.s32.totalorder %v2546_v63, 78 }
 0x1f4   :  { %v1530_v45 = vpop.permute.xlu0 %1529  ;;  %v1532_v33 = vpop.permute.xlu1 %1531  ;;  %vm1701_vm3 = vcmp.lt.s32.totalorder %v2546_v63, 80 }
 0x1f5   :  { %v1533_v53 = vsel %vm1526_vm11, %v1530_v45, %v1532_v33  ;;  %v1534_v51 = vsel %vm1526_vm11, %v1532_v33, %v1530_v45  ;;  %vm1666_vm11 = vcmp.lt.s32.totalorder %v2546_v63, 81 }
 0x1f6   :  { %v1541_v50 = vmul.f32 %v1540_v2, %v1533_v53  ;;  %v1542_v18 = vmul.f32 %v1540_v2, %v1534_v51  ;;  %v1745_v2 = vstv %s4414_s30 }
 0x1f8   :  { %v4370_v4 = vpop.permute.xlu0 %1557  ;;  %v1543_v21 = vadd.f32 %v1541_v50, %v1538_v23  ;;  %v1544_v14 = vadd.f32 %v1542_v18, %v1539_v9  ;;  %v4372_v61 = vpop.permute.xlu1 %1559 }
 0x1f9   :  { %v1562_v24 = vsel %vm1561_vm5, %v4370_v4, %v4372_v61  ;;  %v1563_v49 = vsel %vm1561_vm5, %v4372_v61, %v4370_v4 }
 0x1fa   :  { %v1553_v11 = vsel %vm333_vm9, %v1543_v21, 0.0  ;;  %v1554_v34 = vsel %vm1548_vm8, %v1544_v14, 0.0  ;;  %v1748_v21 = vstv %s4421_s22  ;;  %vm1789_vm8 = vcmp.lt.s32.totalorder %v4968_v22, 206 }
 0x1fb   :  { %v4377_v37 = vadd.f32 %v1553_v11, %v4284_v47  ;;  %v4380_v1 = vadd.f32 %v1554_v34, %v4287_v52  ;;  %v1573_v34 = vmul.f32 %v1572_v26, %v1562_v24 }
 0x1fc   :  { %v1565_v17 = vpop.permute.xlu0 %1564  ;;  %v1567_v38 = vpop.permute.xlu1 %1566 }
 0x1fd   :  { %v1568_v20 = vsel %vm1561_vm5, %v1565_v17, %v1567_v38  ;;  %v1569_v3 = vsel %vm1561_vm5, %v1567_v38, %v1565_v17  ;;  %v1574_v17 = vmul.f32 %v1572_v26, %v1563_v49  ;;  %vm4507_vm5 = vmand %vm371_vm6, %vm1581_vm0  ;;  %vm5097_vm0 = vcmp.ge.s32.totalorder %v2581_v57, 2 }
 0x1fe   :  { %v1576_v9 = vmul.f32 %v1575_v40, %v1568_v20  ;;  %v1577_v50 = vmul.f32 %v1575_v40, %v1569_v3  ;;  %vm4529_vm13 = vmand %vm5097_vm0, %vm1651_vm15  ;;  %vm1804_vm15 = vcmp.lt.s32.totalorder %v2546_v63, 77  ;;  %vm1721_vm0 = vcmp.lt.s32.totalorder %v4968_v22, 208 }
 0x200   :  { %v1593_v27 = vpop.permute.xlu0 %1592  ;;  %v1595_v29 = vpop.permute.xlu1 %1594  ;;  %v1578_v40 = vadd.f32 %v1576_v9, %v1573_v34 }
 0x201   :  { %v1597_v32 = vsel %vm1596_vm1, %v1593_v27, %v1595_v29  ;;  %v1598_v35 = vsel %vm1596_vm1, %v1595_v29, %v1593_v27 }
 0x202   :  { %v1608_v45 = vmul.f32 %v1607_v13, %v1597_v32  ;;  %v1609_v4 = vmul.f32 %v1607_v13, %v1598_v35  ;;  %v4492_v13 = vadd.f32 %v1577_v50, %v1574_v17 }
 0x204   :  { %v1600_v15 = vpop.permute.xlu0 %1599  ;;  %v1602_v19 = vpop.permute.xlu1 %1601  ;;  %v1589_v9 = vsel %vm4507_vm5, %v4492_v13, 0.0 }
 0x205   :  { %v1603_v44 = vsel %vm1596_vm1, %v1600_v15, %v1602_v19  ;;  %v1604_v48 = vsel %vm1596_vm1, %v1602_v19, %v1600_v15  ;;  %v1780_v19 = vstv %s4427_s3  ;;  %vm5096_vm1 = vcmp.ge.s32.totalorder %v2562_v62, 3 }
 0x206   :  { %v1611_v55 = vmul.f32 %v1610_v8, %v1603_v44  ;;  %v1612_v33 = vmul.f32 %v1610_v8, %v1604_v48  ;;  %v1818_v48 = vstv %s4460_s4 }
 0x208   :  { %v4382_v25 = vpop.permute.xlu0 %1627  ;;  %v4384_v56 = vpop.permute.xlu1 %1629  ;;  %v1613_v14 = vadd.f32 %v1611_v55, %v1608_v45  ;;  %v1614_v29 = vadd.f32 %v1612_v33, %v1609_v4 }
 0x209   :  { %v1632_v61 = vsel %vm1631_vm10, %v4382_v25, %v4384_v56  ;;  %v1633_v11 = vsel %vm1631_vm10, %v4384_v56, %v4382_v25 }
 0x20a   :  { %v1643_v56 = vmul.f32 %v1642_v28, %v1632_v61  ;;  %v1644_v26 = vmul.f32 %v1642_v28, %v1633_v11  ;;  %v1624_v49 = vsel %vm4498_vm4, %v1614_v29, 0.0 }
 0x20b   :  { %v1626_v11 = vadd.f32 %v1624_v49, %v4335_v54 }
 0x20c   :  { %v1635_v5 = vpop.permute.xlu0 %1634  ;;  %v1637_v47 = vpop.permute.xlu1 %1636 }
 0x20d   :  { %v1638_v53 = vsel %vm1631_vm10, %v1635_v5, %v1637_v47  ;;  %v1639_v51 = vsel %vm1631_vm10, %v1637_v47, %v1635_v5  ;;  %v1783_v5 = vstv %s4435_s19  ;;  %v1815_v47 = vstv %s4443_s24 }
 0x20e   :  { %v1646_v38 = vmul.f32 %v1645_v42, %v1638_v53  ;;  %v1647_v27 = vmul.f32 %v1645_v42, %v1639_v51  ;;  %v1623_v42 = vsel %vm5096_vm1, %v1613_v14, 0.0  ;;  %vm5100_vm10 = vcmp.lt.s32.totalorder %v2562_v62, 13 }
 0x20f   :  { %v1625_v50 = vadd.f32 %v1623_v42, %v4330_v10  ;;  %vm1824_vm1 = vcmp.lt.s32.totalorder %v4968_v22, 205 }
 0x210   :  { %v4396_v52 = vpop.permute.xlu0 %1662  ;;  %v4400_v30 = vpop.permute.xlu1 %1664  ;;  %v1648_v20 = vadd.f32 %v1646_v38, %v1643_v56  ;;  %v1649_v3 = vadd.f32 %v1647_v27, %v1644_v26 }
 0x212   :  { %v1659_v17 = vsel %vm4529_vm13, %v1649_v3, 0.0  ;;  %vm5106_vm13 = vcmp.lt.s32.totalorder %v2581_v57, 14 }
 0x214   :  { %v4406_v16 = vpop.permute.xlu0 %1669  ;;  %v4410_v39 = vpop.permute.xlu1 %1671 }
 0x215   :  { %v1673_v45 = vsel %vm1666_vm11, %v4406_v16, %v4410_v39  ;;  %v1674_v10 = vsel %vm1666_vm11, %v4410_v39, %v4406_v16 }
 0x216   :  { %v1681_v38 = vmul.f32 %v1680_v6, %v1673_v45  ;;  %v1661_v45 = vadd.f32 %v1659_v17, %v4359_v43 }
 0x218   :  { %v4416_v31 = vpop.permute.xlu0 %1697  ;;  %v4419_v7 = vpop.permute.xlu1 %1699 }
 0x21c   :  { %v4441_v58 = vpop.permute.xlu0 %1704  ;;  %v4451_v59 = vpop.permute.xlu1 %1706 }
 0x220   :  { %v1731_v23 = vpop.permute.xlu0 %1730  ;;  %v1733_v18 = vpop.permute.xlu1 %1732 }
 0x221   :  { %v1735_v55 = vsel %vm1734_vm7, %v1731_v23, %v1733_v18  ;;  %v1736_v24 = vsel %vm1734_vm7, %v1733_v18, %v1731_v23  ;;  %v4539_v23 = vsel %vm5100_vm10, %v1578_v40, 0.0  ;;  %v1667_v18 = vsel %vm1666_vm11, %v4396_v52, %v4400_v30 }
 0x222   :  { %v1746_v14 = vmul.f32 %v1745_v2, %v1735_v55  ;;  %v1747_v61 = vmul.f32 %v1745_v2, %v1736_v24  ;;  %v1678_v39 = vmul.f32 %v1677_v46, %v1667_v18  ;;  %v1682_v2 = vmul.f32 %v1680_v6, %v1674_v10 }
 0x223   :  { %v1709_v6 = vsel %vm1701_vm3, %v4451_v59, %v4441_v58  ;;  %vm5109_vm10 = vcmp.ge.s32.totalorder %v2581_v57, 1 }
 0x224   :  { %v1738_v15 = vpop.permute.xlu0 %1737  ;;  %v1740_v8 = vpop.permute.xlu1 %1739  ;;  %v1683_v3 = vadd.f32 %v1681_v38, %v1678_v39  ;;  %v1717_v24 = vmul.f32 %v1715_v36, %v1709_v6 }
 0x225   :  { %v1741_v32 = vsel %vm1734_vm7, %v1738_v15, %v1740_v8  ;;  %v1742_v28 = vsel %vm1734_vm7, %v1740_v8, %v1738_v15  ;;  %vm5101_vm7 = vcmp.ge.s32.totalorder %v2562_v62, 2  ;;  %v1703_v15 = vsel %vm1701_vm3, %v4419_v7, %v4416_v31 }
 0x226   :  { %v1749_v33 = vmul.f32 %v1748_v21, %v1741_v32  ;;  %v1750_v53 = vmul.f32 %v1748_v21, %v1742_v28  ;;  %v1668_v21 = vsel %vm1666_vm11, %v4400_v30, %v4396_v52  ;;  %v1658_v34 = vsel %vm5101_vm7, %v1648_v20, 0.0  ;;  %vm4621_vm7 = vmand %vm5109_vm10, %vm1686_vm12 }
 0x227   :  { %v1679_v54 = vmul.f32 %v1677_v46, %v1668_v21  ;;  %vm5102_vm11 = vcmp.lt.s32.totalorder %v2581_v57, 15  ;;  %v1708_v46 = vsel %vm1701_vm3, %v4441_v58, %v4451_v59  ;;  %v1660_v20 = vadd.f32 %v1658_v34, %v4356_v0 }
 0x228   :  { %v1766_v51 = vpop.permute.xlu0 %1765  ;;  %v1768_v4 = vpop.permute.xlu1 %1767  ;;  %v1751_v27 = vadd.f32 %v1749_v33, %v1746_v14  ;;  %v1752_v29 = vadd.f32 %v1750_v53, %v1747_v61  ;;  %vm4583_vm4 = vmand %vm5102_vm11, %vm1754_vm14  ;;  %vm5105_vm14 = vcmp.lt.s32.totalorder %v2562_v62, 15  ;;  %v1702_v53 = vsel %vm1701_vm3, %v4416_v31, %v4419_v7 }
 0x229   :  { %v1770_v52 = vsel %vm1769_vm2, %v1766_v51, %v1768_v4  ;;  %v1771_v30 = vsel %vm1769_vm2, %v1768_v4, %v1766_v51  ;;  %v1714_v51 = vmul.f32 %v1712_v60, %v1703_v15  ;;  %v1716_v18 = vmul.f32 %v1715_v36, %v1708_v46 }
 0x22a   :  { %v1781_v8 = vmul.f32 %v1780_v19, %v1770_v52  ;;  %v1782_v42 = vmul.f32 %v1780_v19, %v1771_v30  ;;  %v1761_v55 = vsel %vm5105_vm14, %v1751_v27, 0.0  ;;  %v1762_v58 = vsel %vm4583_vm4, %v1752_v29, 0.0 }
 0x22b   :  { %v1763_v4 = vadd.f32 %v1761_v55, %v1625_v50  ;;  %v1764_v43 = vadd.f32 %v1762_v58, %v1626_v11  ;;  %vm5112_vm3 = vcmp.ge.s32.totalorder %v2562_v62, 1  ;;  %v1713_v34 = vmul.f32 %v1712_v60, %v1702_v53 }
 0x22c   :  { %v1773_v16 = vpop.permute.xlu0 %1772  ;;  %v1775_v25 = vpop.permute.xlu1 %1774  ;;  %v1693_v50 = vsel %vm5112_vm3, %v1683_v3, 0.0  ;;  %v1719_v17 = vadd.f32 %v1717_v24, %v1714_v51  ;;  %v5114_v3 = vlaneseq }
 0x22d   :  { %v1776_v56 = vsel %vm1769_vm2, %v1773_v16, %v1775_v25  ;;  %v1777_v26 = vsel %vm1769_vm2, %v1775_v25, %v1773_v16  ;;  %vm4610_vm2 = vmand %vm5106_vm13, %vm1789_vm8  ;;  %v1718_v15 = vadd.f32 %v1716_v18, %v1713_v34  ;;  %v1590_v25 = vadd.f32 %v4539_v23, %v4310_v41 }
 0x22e   :  { %v1784_v32 = vmul.f32 %v1783_v5, %v1776_v56  ;;  %v1785_v28 = vmul.f32 %v1783_v5, %v1777_v26  ;;  %v1684_v5 = vadd.f32 %v1682_v2, %v1679_v54  ;;  %v1727_v60 = vsel %vm1721_vm0, %v1719_v17, 0.0 }
 0x22f   :  { %v1728_v6 = vadd.f32 %v1718_v15, %v1590_v25  ;;  %v1860_v55 = vshrl.u32 %v5114_v3, 7 }
 0x230   :  { %v1801_v19 = vpop.permute.xlu0 %1800  ;;  %v1786_v0 = vadd.f32 %v1784_v32, %v1781_v8  ;;  %v1787_v49 = vadd.f32 %v1785_v28, %v1782_v42  ;;  %v1803_v35 = vpop.permute.xlu1 %1802  ;;  %v1694_v11 = vsel %vm4621_vm7, %v1684_v5, 0.0 }
 0x231   :  { %v1805_v31 = vsel %vm1804_vm15, %v1801_v19, %v1803_v35  ;;  %v1806_v7 = vsel %vm1804_vm15, %v1803_v35, %v1801_v19  ;;  %v1696_v46 = vadd.f32 %v1694_v11, %v4380_v1 }
 0x232   :  { %v1796_v21 = vsel %vm333_vm9, %v1786_v0, 0.0  ;;  %v1797_v10 = vsel %vm4610_vm2, %v1787_v49, 0.0  ;;  %v1816_v16 = vmul.f32 %v1815_v47, %v1805_v31  ;;  %v1817_v39 = vmul.f32 %v1815_v47, %v1806_v7  ;;  %vm1826_vm9 = vmand %vm371_vm6, %vm1824_vm1 }
 0x233   :  { %v1798_v14 = vadd.f32 %v1796_v21, %v1660_v20  ;;  %v1799_v61 = vadd.f32 %v1797_v10, %v1661_v45  ;;  %v1591_v47 = vadd.f32 %v1589_v9, %v4313_v12  ;;  %vm5113_vm6 = vcmp.lt.s32.totalorder %v2562_v62, 13  ;;  %v2083_v10 = vld [vmem:[#allocation6] sm:$0xff] }
 0x234   :  { %v1808_v36 = vpop.permute.xlu0 %1807  ;;  %v1810_v38 = vpop.permute.xlu1 %1809  ;;  %v2191_v62 = vmov 1966171168   ;;  %v1880_v0 = vsub.s32 0, %v1860_v55  ;;  %v1884_v49 = vsub.s32 1, %v1860_v55 }
 0x235   :  { %v1837_v27 = vadd.f32 %v1798_v14, %v1763_v4  ;;  %v1838_v29 = vadd.f32 %v1799_v61, %v1764_v43  ;;  %v1811_v52 = vsel %vm1804_vm15, %v1808_v36, %v1810_v38  ;;  %v1812_v30 = vsel %vm1804_vm15, %v1810_v38, %v1808_v36  ;;  %v2084_v61 = vld [vmem:[#allocation6 + $0x8] sm:$0xff] }
 0x236   :  { %v1819_v54 = vmul.f32 %v1818_v48, %v1811_v52  ;;  %v1820_v2 = vmul.f32 %v1818_v48, %v1812_v30  ;;  %v1695_v48 = vadd.f32 %v1693_v50, %v4377_v37  ;;  %v1729_v56 = vadd.f32 %v1727_v60, %v1591_v47 }
 0x237   :  { %v1857_v9 = vunpack.c.l.s4 %v2191_v62 }
 0x238   :  { %v1821_v40 = vadd.f32 %v1819_v54, %v1816_v16  ;;  %v1822_v63 = vadd.f32 %v1820_v2, %v1817_v39 }
 0x239   :  { %v1858_v20 = vunpack.c.0.s8 %v1857_v9 }
 0x23a   :  { %v1831_v57 = vsel %vm5113_vm6, %v1821_v40, 0.0  ;;  %v1832_v22 = vsel %vm1826_vm9, %v1822_v63, 0.0 }
 0x23b   :  { %v1833_v26 = vadd.f32 %v1831_v57, %v1695_v48  ;;  %v1834_v8 = vadd.f32 %v1832_v22, %v1696_v46  ;;  %v1861_v59 = vsub.s32 %v1858_v20, %v1860_v55 }
 0x23d   :  { %v1835_v42 = vadd.f32 %v1833_v26, %v1728_v6  ;;  %v1836_v41 = vadd.f32 %v1834_v8, %v1729_v56 }
 0x23f   :  { %v1839_v23 = vadd.f32 %v1837_v27, %v1835_v42  ;;  %v1840_v32 = vadd.f32 %v1838_v29, %v1836_v41 }
 0x241   :  { %v2017_v44 = vmul.f32 -1.442695, %v1839_v23  ;;  %v2018_v28 = vmul.f32 -1.442695, %v1840_v32 }
 0x243   :  { %2075 = vpow2.f32 %v2017_v44 }
 0x244   :  { %2077 = vpow2.f32 %v2018_v28 }
 0x250   :  { %v2076_v12 = vpop.eup %2075 }
 0x251   :  { %v2078_v37 = vpop.eup %2077  ;;  %v1847_v13 = vadd.f32 1.0, %v2076_v12 }
 0x252   :  { %v1848_v1 = vadd.f32 1.0, %v2078_v37 }
 0x253   :  { %2079 = vrcp.f32 %v1847_v13 }
 0x254   :  { %2081 = vrcp.f32 %v1848_v1 }
 0x260   :  { %v2080_v58 = vpop.eup %2079 }
 0x261   :  { %v2082_v19 = vpop.eup %2081 }
 0x262   :  { %v1855_v5 = vcombine.low %v2080_v58, %v2082_v19 }
 0x264   :  { %v1862_v24 = vrot.slane %v1855_v5, %v1861_v59 }
 0x266   :  { %v1863_v35 = vcombine.high %v1862_v24, %v1862_v24  ;;  %v1870_v45 = vrot.slane %v1862_v24, %v1861_v59 }
 0x268   :  { %v1877_v33 = vrot.slane %v1863_v35, %v1861_v59  ;;  %v1881_v53 = vrot.slane %v1870_v45, %v1880_v0  ;;  %v1885_v51 = vrot.slane %v1870_v45, %v1884_v49 }
 0x26a   :  { %v1889_v18 = vrot.slane %v1877_v33, %v1880_v0  ;;  %v1893_v4 = vrot.slane %v1877_v33, %v1884_v49  ;;  %v1894_v43 = vcombine.low %v1881_v53, %v1885_v51 }
 0x26c   :  { %v1895_v21 = vcombine.low %v1889_v18, %v1893_v4  ;;  %v1898_v14 = vmul.f32 %v2083_v10, %v1894_v43 }
 0x26e   :  { %v1899_v31 = vmul.f32 %v2084_v61, %v1895_v21  ;;  %1900 = vst [vmem:[#allocation7] sm:$0xff] %v1898_v14 }
 0x270   :  { %1901 = vst [vmem:[#allocation7 + $0x8] sm:$0xff] %v1899_v31 }
 0x271   :  { %2124 = shalt.err (!%p2121_p9)
}
 0x272   :  { %s5115_s27 = smov 8   ;;  %s5116_s11 = smov 128  }
 0x273   :  { %s5117_s14 = sld [smem:[#allocation60_spill]] }
 0x279   :  { %1913 = dma.vmem_to_hbm [thread:$0]  %s1908_s6, 256, %s5117_s14, [#allocation4], %s5116_s11, %s5116_s11, %s5115_s27  }
 0x27a   :  { %2137 = dma.done.wait [#allocation4], 256  }
 0x27b   :  { %2138 = vsyncadd [#allocation4], 4294967040 }
 0x27c   :  { %1917 = vsyncpa [#allocation3], 1 }
 0x27d   :  { %1918 = vsyncpa [#allocation4], 1 }
 0x27e   :  { %1919 = vsyncpa [#allocation5], 1 }

</bundles_post_ra>
